<compile_context>
chip_gen: v6e
topology: v6e:2x2x1
jax: 0.10.0
libtpu: 0.0.40
codegen_flags: <defaults>
</compile_context>

<pallas_src>
import math

import jax
import jax.numpy as jnp
from jax import lax
from jax.experimental import pallas as pl
from jax.experimental.pallas import tpu as pltpu


# ----------------------------- fused Pallas kernel ---------------------------

def _hrfa_encoder_kernel(enc_ref, wbias_ref, rbias_ref, rsim_ref,
                         idb_w_ref, idb_r_ref,
                         wrw_t_ref, whw_ref, wrr_t_ref, whr_ref,
                         topw_t_ref, topb_ref, out_ref):
    """Fused HRFA encoder for one block of TB batch elements.

    enc_ref   : (TB, RC, RL, K)  encoded reviews (any float dtype; cast to bf16)
    wbias_ref : (TB, RC, RL) bf16  additive word mask bias (-1e10 at pad tokens)
    rbias_ref : (TB, RC)     f32   additive review mask bias (-1e10 at pad reviews)
    rsim_ref  : (TB, RC)     f32   cos(pi * rating diff)
    idb_w_ref : (TB, D) f32  precomputed  id_emb @ w_id.T + w_review.bias  (word)
    idb_r_ref : (TB, D) f32  same for the review-level attention
    wrw_t_ref, wrr_t_ref : (K, D) bf16   pre-transposed w_review weights
    whw_ref,  whr_ref    : (1, D) f32    scoring heads (h.bias cancels in softmax)
    topw_t_ref : (K, LF) bf16,  topb_ref : (1, LF) f32
    out_ref    : (1, 1, TB*LF) f32  lane-dense output slab
    """
    f32, bf16 = jnp.float32, jnp.bfloat16
    tb, rc, rl, k = enc_ref.shape
    d = wrw_t_ref.shape[1]
    lf = topw_t_ref.shape[1]

    enc_bf = enc_ref[...].astype(bf16)                          # (TB,RC,RL,K)

    # ---------------- word-level attention (softmax over RL) ----------------
    # Big projection on the MXU (minor dim K unchanged -> layout-free flatten).
    s1 = jnp.dot(enc_bf.reshape(tb * rc * rl, k), wrw_t_ref[...],
                 preferred_element_type=f32).reshape(tb, rc, rl, d)
    s = jnp.maximum(s1 + idb_w_ref[...][:, None, None, :], 0.0)  # relu
    # 1-wide scoring head: VPU multiply + lane reduction (no MXU N=1 matmul).
    score = jnp.sum(s * whw_ref[...], axis=-1)                   # (TB, RC, RL)
    score = score + wbias_ref[...].astype(f32)                   # additive mask bias
    score = score - jnp.max(score, axis=-1, keepdims=True)
    p = jnp.exp(score)
    p = p * pl.reciprocal(jnp.sum(p, axis=-1, keepdims=True), approx=True)

    # Attention pooling on the MXU: bf16 x bf16 -> f32 acc, no f32 copy of enc.
    watt = lax.dot_general(
        p.astype(bf16).reshape(tb * rc, 1, rl),
        enc_bf.reshape(tb * rc, rl, k),
        dimension_numbers=(((2,), (1,)), ((0,), (0,))),
        preferred_element_type=f32).reshape(tb, rc, k)           # (TB, RC, K)

    # --------------- review-level attention (softmax over RC) ---------------
    reviews = rsim_ref[...][:, :, None] * watt                   # rating-sim scale
    # One well-filled flat matmul (minor dim K unchanged in the reshape).
    s1r = jnp.dot(reviews.astype(bf16).reshape(tb * rc, k), wrr_t_ref[...],
                  preferred_element_type=f32).reshape(tb, rc, d)
    sr = jnp.maximum(s1r + idb_r_ref[...][:, None, :], 0.0)
    score_r = jnp.sum(sr * whr_ref[...], axis=-1)                # (TB, RC)
    score_r = score_r + rbias_ref[...]
    score_r = score_r - jnp.max(score_r, axis=-1, keepdims=True)
    pr = jnp.exp(score_r)
    pr = pr * pl.reciprocal(jnp.sum(pr, axis=-1, keepdims=True), approx=True)
    ratt = jnp.sum(pr[:, :, None] * reviews, axis=1)             # (TB, K)

    # ----------------------- top linear + tanh epilogue ----------------------
    y = jnp.dot(ratt.astype(bf16), topw_t_ref[...],
                preferred_element_type=f32) + topb_ref[...]      # (TB, LF)
    ty = jnp.tanh(y).astype(out_ref.dtype)

    # Lane-dense output: the whole step writes one contiguous (1, 1, TB*LF) row
    # (TB*LF is a multiple of 128 in the demo), so the HBM writeback is a dense
    # slab.  The TB narrow VMEM row-stores below touch one vreg total at these
    # shapes; for large TB*LF replace with a single flat reshape + store.
    for r in range(tb):                                          # static unroll
        out_ref[:, :, r * lf:(r + 1) * lf] = ty[None, r:r + 1, :]


# --------------------------------- wrapper -----------------------------------

def review_attention_encoder(params, cfg, review_tokens, encoded_review,
                             self_id, self_rating, other_rating, *,
                             batch_block=None):
    """Pallas forward of ReviewAttentionEncoder (eval mode, dropout = identity).

    batch_block (TB) must divide B and be a multiple of 8 (or equal B) so the
    (TB, .) blocks satisfy the TPU (8, 128) sublane tiling rule.
    """
    B, RC, RL = review_tokens.shape
    K, D, LF, pad = (cfg["kernel_num"], cfg["id_dim"],
                     cfg["latent_factors"], cfg["pad_id"])
    TB = B if batch_block is None else batch_block
    assert B % TB == 0, "batch_block must divide batch size"
    assert TB == B or TB % 8 == 0, "batch_block must be a multiple of 8"

    # ---- trace-time glue: masks -> additive biases, rating sim, id biases ----
    enc = encoded_review.reshape(B, RC, RL, K)     # keep dtype; cast in-kernel
    wmask_bias = jnp.where(review_tokens == pad, -1e10, 0.0).astype(jnp.bfloat16)
    rmask_bias = jnp.where(jnp.all(review_tokens == pad, axis=2),
                           -1e10, 0.0).astype(jnp.float32)
    if self_rating is not None and other_rating is not None:
        diff = (self_rating - other_rating) / float(cfg["max_rating"] - cfg["min_rating"])
        rsim = jnp.cos(math.pi * diff).astype(jnp.float32)          # (B, RC)
    else:
        rsim = jnp.ones((B, RC), jnp.float32)

    sid = self_id[:, 0]
    aw, ar = params["att_word"], params["att_review"]
    # id projection (+ w_review bias) once per batch element, in f32: removes
    # two in-kernel dots and six kernel inputs with zero extra HBM traffic.
    idb_w = (aw["emb"][sid] @ aw["wid"].T + aw["br"][0]).astype(jnp.float32)  # (B, D)
    idb_r = (ar["emb"][sid] @ ar["wid"].T + ar["br"][0]).astype(jnp.float32)  # (B, D)

    # pre-transposed / pre-cast weights: no in-kernel .T, bf16 MXU operands.
    wrw_t = aw["wr"].T.astype(jnp.bfloat16)      # (K, D)
    wrr_t = ar["wr"].T.astype(jnp.bfloat16)      # (K, D)
    whw = aw["wh"].astype(jnp.float32)           # (1, D)
    whr = ar["wh"].astype(jnp.float32)           # (1, D)
    topw_t = params["top_w"].T.astype(jnp.bfloat16)              # (K, LF)
    topb = params["top_b"].reshape(1, LF).astype(jnp.float32)
    # NOTE: h.bias (bh) is a uniform score shift -> cancels in softmax, dropped.

    grid = (B // TB,)

    def batched(*tail):
        return pl.BlockSpec((TB,) + tail, lambda i, _t=len(tail): (i,) + (0,) * _t)

    def full(*dims):
        return pl.BlockSpec(dims, lambda i, _t=len(dims): (0,) * _t)

    out = pl.pallas_call(
        _hrfa_encoder_kernel,
        out_shape=jax.ShapeDtypeStruct((B // TB, 1, TB * LF), jnp.float32),
        grid=grid,
        in_specs=[
            batched(RC, RL, K),     # enc
            batched(RC, RL),        # word mask bias (bf16)
            batched(RC),            # review mask bias
            batched(RC),            # rating similarity
            batched(D),             # id bias (word)
            batched(D),             # id bias (review)
            full(K, D), full(1, D),           # word-level attention weights
            full(K, D), full(1, D),           # review-level attention weights
            full(K, LF), full(1, LF),         # top linear
        ],
        out_specs=pl.BlockSpec((1, 1, TB * LF), lambda i: (i, 0, 0)),
        compiler_params=pltpu.CompilerParams(
            dimension_semantics=("parallel",),       # megacore-shard the batch axis
            vmem_limit_bytes=40 * 1024 * 1024),      # v7x-safe (64 MiB/TC physical)
    )(enc, wmask_bias, rmask_bias, rsim, idb_w, idb_r,
      wrw_t, whw, wrr_t, whr, topw_t, topb)
    return out.reshape(B, LF)


# ----------------------------- pure-JAX reference ----------------------------

def _attention_ref(review, id_emb, mask, p):
    s1 = review @ p["wr"].T + p["br"][0]
    s2 = id_emb @ p["wid"].T
    s = jax.nn.relu(s1 + s2[:, None, :])
    score = (s @ p["wh"].T)[..., 0] + p["bh"][0, 0]
    score = jnp.where(mask > 0.5, -1e10, score)
    a = jax.nn.softmax(score, axis=1)
    return jnp.einsum("nl,nlk->nk", a, review)


def _encoder_ref(params, cfg, review_tokens, encoded_review, self_id,
                 self_rating, other_rating):
    B, RC, RL = review_tokens.shape
    K, pad = cfg["kernel_num"], cfg["pad_id"]
    word_mask = (review_tokens == pad).reshape(B * RC, RL).astype(jnp.float32)
    review_mask = jnp.all(review_tokens == pad, axis=2).astype(jnp.float32)
    idx_word = jnp.tile(self_id, (1, RC)).reshape(B * RC)
    word_att = _attention_ref(encoded_review, params["att_word"]["emb"][idx_word],
                              word_mask, params["att_word"])
    reviews = word_att.reshape(B, RC, K)
    diff = (self_rating - other_rating) / float(cfg["max_rating"] - cfg["min_rating"])
    reviews = jnp.cos(math.pi * diff)[:, :, None] * reviews
    review_att = _attention_ref(reviews, params["att_review"]["emb"][self_id[:, 0]],
                                review_mask, params["att_review"])
    return jnp.tanh(review_att @ params["top_w"].T + params["top_b"])


# ---------------------------------- params -----------------------------------

def _init_attention_params(key, id_count, K, D, pad_id):
    k1, k2, k3, k4, k5, k6 = jax.random.split(key, 6)
    emb = 0.1 * jax.random.normal(k1, (id_count, D), jnp.float32)
    emb = emb.at[pad_id].set(0.0)  # padding_idx row is zero
    return {
        "emb": emb,
        "wr": 0.1 * jax.random.normal(k2, (D, K), jnp.float32),   # w_review.weight
        "br": 0.1 * jax.random.normal(k3, (1, D), jnp.float32),   # w_review.bias
        "wid": 0.1 * jax.random.normal(k4, (D, D), jnp.float32),  # w_id.weight (no bias)
        "wh": 0.1 * jax.random.normal(k5, (1, D), jnp.float32),   # h.weight
        "bh": 0.1 * jax.random.normal(k6, (1, 1), jnp.float32),   # h.bias
    }


def init_params(key, cfg, id_count):
    k1, k2, k3, k4 = jax.random.split(key, 4)
    return {
        "att_word": _init_attention_params(k1, id_count, cfg["kernel_num"],
                                           cfg["id_dim"], cfg["pad_id"]),
        "att_review": _init_attention_params(k2, id_count, cfg["kernel_num"],
                                             cfg["id_dim"], cfg["pad_id"]),
        "top_w": 0.1 * jax.random.normal(k3, (cfg["latent_factors"],
                                              cfg["kernel_num"]), jnp.float32),
        "top_b": 0.1 * jax.random.normal(k4, (cfg["latent_factors"],), jnp.float32),
    }


# ----------------------------------- demo ------------------------------------

if __name__ == "__main__":
    cfg = dict(kernel_num=32, id_dim=16, latent_factors=16,
               review_count=4, review_length=16,
               max_rating=5, min_rating=1, pad_id=0)
    B, RC, RL, K = 16, cfg["review_count"], cfg["review_length"], cfg["kernel_num"]
    ID_COUNT = 50

    key = jax.random.PRNGKey(0)
    kp, k1, k2, k3, k4, k5 = jax.random.split(key, 6)
    params = init_params(kp, cfg, ID_COUNT)

    review_tokens = jax.random.randint(k1, (B, RC, RL), 0, ID_COUNT, dtype=jnp.int32)
    encoded_review = jax.random.normal(k2, (B * RC, RL, K), jnp.float32)
    self_id = jax.random.randint(k3, (B, 1), 1, ID_COUNT, dtype=jnp.int32)
    self_rating = jax.random.randint(k4, (B, RC), 1, 6).astype(jnp.float32)
    other_rating = jax.random.randint(k5, (B, RC), 1, 6).astype(jnp.float32)

    # TB=8 -> grid=(2,), TB*LF=128 (lane-dense slab).  Production batches should
    # grow TB on v5e/v6e and keep >=2 grid steps per TensorCore on v7x.
    latent = review_attention_encoder(params, cfg, review_tokens, encoded_review,
                                      self_id, self_rating, other_rating,
                                      batch_block=8)
    latent = jax.block_until_ready(latent)

    ref = _encoder_ref(params, cfg, review_tokens, encoded_review,
                       self_id, self_rating, other_rating)
    assert latent.shape == (B, cfg["latent_factors"])
    max_err = float(jnp.max(jnp.abs(latent - ref)))
    # tolerance loosened for bf16 MXU operands + approx reciprocal (inference path)
    assert jnp.allclose(latent, ref, rtol=2e-2, atol=2e-2), \
        f"mismatch vs reference (max abs err {max_err})"

    print("KERNEL_OK")
</pallas_src>

<mosaic_0001>
module attributes {stable_mosaic.version = 11 : i64} {
  func.func @_hrfa_encoder_kernel(%arg0: i32, %arg1: memref<8x4x16x32xf32, #tpu.memory_space<vmem>>, %arg2: memref<8x4x16xbf16, #tpu.memory_space<vmem>>, %arg3: memref<8x4xf32, #tpu.memory_space<vmem>>, %arg4: memref<8x4xf32, #tpu.memory_space<vmem>>, %arg5: memref<8x16xf32, #tpu.memory_space<vmem>>, %arg6: memref<8x16xf32, #tpu.memory_space<vmem>>, %arg7: memref<32x16xbf16, #tpu.memory_space<vmem>>, %arg8: memref<1x16xf32, #tpu.memory_space<vmem>>, %arg9: memref<32x16xbf16, #tpu.memory_space<vmem>>, %arg10: memref<1x16xf32, #tpu.memory_space<vmem>>, %arg11: memref<32x16xbf16, #tpu.memory_space<vmem>>, %arg12: memref<1x16xf32, #tpu.memory_space<vmem>>, %arg13: memref<1x1x128xf32, #tpu.memory_space<vmem>>) attributes {dimension_semantics = [#tpu.dimension_semantics<parallel>], iteration_bounds = array<i64: 2>, scalar_prefetch = 0 : i64, scratch_operands = 0 : i64, tpu.core_type = #tpu.core_type<tc>, window_params = [{transform_indices = @transform_0, window_bounds = array<i64: 8, 4, 16, 32>}, {transform_indices = @transform_1, window_bounds = array<i64: 8, 4, 16>}, {transform_indices = @transform_2, window_bounds = array<i64: 8, 4>}, {transform_indices = @transform_3, window_bounds = array<i64: 8, 4>}, {transform_indices = @transform_4, window_bounds = array<i64: 8, 16>}, {transform_indices = @transform_5, window_bounds = array<i64: 8, 16>}, {pipeline_mode = #tpu.pipeline_mode<synchronous>, transform_indices = @transform_6, window_bounds = array<i64: 32, 16>}, {pipeline_mode = #tpu.pipeline_mode<synchronous>, transform_indices = @transform_7, window_bounds = array<i64: 1, 16>}, {pipeline_mode = #tpu.pipeline_mode<synchronous>, transform_indices = @transform_8, window_bounds = array<i64: 32, 16>}, {pipeline_mode = #tpu.pipeline_mode<synchronous>, transform_indices = @transform_9, window_bounds = array<i64: 1, 16>}, {pipeline_mode = #tpu.pipeline_mode<synchronous>, transform_indices = @transform_10, window_bounds = array<i64: 32, 16>}, {pipeline_mode = #tpu.pipeline_mode<synchronous>, transform_indices = @transform_11, window_bounds = array<i64: 1, 16>}, {transform_indices = @transform_12, window_bounds = array<i64: 1, 1, 128>}]} {
    %c0 = arith.constant 0 : index
    %c0_0 = arith.constant 0 : index
    %c0_1 = arith.constant 0 : index
    %c0_2 = arith.constant 0 : index
    %0 = vector.load %arg1[%c0, %c0_0, %c0_1, %c0_2] : memref<8x4x16x32xf32, #tpu.memory_space<vmem>>, vector<8x4x16x32xf32>
    %1 = arith.truncf %0 : vector<8x4x16x32xf32> to vector<8x4x16x32xbf16>
    %2 = vector.shape_cast %1 : vector<8x4x16x32xbf16> to vector<512x32xbf16>
    %c0_3 = arith.constant 0 : index
    %c0_4 = arith.constant 0 : index
    %3 = vector.load %arg7[%c0_3, %c0_4] : memref<32x16xbf16, #tpu.memory_space<vmem>>, vector<32x16xbf16>
    %cst = arith.constant dense<0.000000e+00> : vector<512x16xf32>
    %4 = tpu.matmul %2, %3, %cst {dimension_numbers = #tpu.dot_dimension_numbers<[1], [0], [0], [1], [0, 0, 1, 1], [], []>} : vector<512x32xbf16>, vector<32x16xbf16>, vector<512x16xf32> -> vector<512x16xf32>
    %5 = vector.shape_cast %4 : vector<512x16xf32> to vector<8x4x16x16xf32>
    %c0_5 = arith.constant 0 : index
    %c0_6 = arith.constant 0 : index
    %6 = vector.load %arg5[%c0_5, %c0_6] : memref<8x16xf32, #tpu.memory_space<vmem>>, vector<8x16xf32>
    %7 = vector.shape_cast %6 : vector<8x16xf32> to vector<8x1x1x16xf32>
    %8 = vector.broadcast %7 : vector<8x1x1x16xf32> to vector<8x4x16x16xf32>
    %9 = arith.addf %5, %8 : vector<8x4x16x16xf32>
    %cst_7 = arith.constant 0.000000e+00 : f32
    %10 = vector.broadcast %cst_7 : f32 to vector<8x4x16x16xf32>
    %11 = arith.maximumf %9, %10 : vector<8x4x16x16xf32>
    %c0_8 = arith.constant 0 : index
    %c0_9 = arith.constant 0 : index
    %12 = vector.load %arg8[%c0_8, %c0_9] : memref<1x16xf32, #tpu.memory_space<vmem>>, vector<1x16xf32>
    %13 = vector.shape_cast %12 : vector<1x16xf32> to vector<1x1x1x16xf32>
    %14 = vector.broadcast %13 : vector<1x1x1x16xf32> to vector<8x4x16x16xf32>
    %15 = arith.mulf %11, %14 : vector<8x4x16x16xf32>
    %cst_10 = arith.constant dense<0.000000e+00> : vector<8x4x16xf32>
    %16 = vector.multi_reduction <add>, %15, %cst_10 [3] : vector<8x4x16x16xf32> to vector<8x4x16xf32>
    %c0_11 = arith.constant 0 : index
    %c0_12 = arith.constant 0 : index
    %c0_13 = arith.constant 0 : index
    %17 = vector.load %arg2[%c0_11, %c0_12, %c0_13] : memref<8x4x16xbf16, #tpu.memory_space<vmem>>, vector<8x4x16xbf16>
    %18 = arith.extf %17 : vector<8x4x16xbf16> to vector<8x4x16xf32>
    %19 = arith.addf %16, %18 : vector<8x4x16xf32>
    %cst_14 = arith.constant dense<0xFF800000> : vector<8x4xf32>
    %20 = vector.multi_reduction <maximumf>, %19, %cst_14 [2] : vector<8x4x16xf32> to vector<8x4xf32>
    %21 = vector.shape_cast %20 : vector<8x4xf32> to vector<8x4x1xf32>
    %22 = vector.broadcast %21 : vector<8x4x1xf32> to vector<8x4x16xf32>
    %23 = arith.subf %19, %22 : vector<8x4x16xf32>
    %24 = math.exp %23 : vector<8x4x16xf32>
    %cst_15 = arith.constant dense<0.000000e+00> : vector<8x4xf32>
    %25 = vector.multi_reduction <add>, %24, %cst_15 [2] : vector<8x4x16xf32> to vector<8x4xf32>
    %26 = vector.shape_cast %25 : vector<8x4xf32> to vector<8x4x1xf32>
    %27 = tpu.reciprocal %26 {approx = true} : vector<8x4x1xf32> -> vector<8x4x1xf32>
    %28 = vector.broadcast %27 : vector<8x4x1xf32> to vector<8x4x16xf32>
    %29 = arith.mulf %24, %28 : vector<8x4x16xf32>
    %30 = arith.truncf %29 : vector<8x4x16xf32> to vector<8x4x16xbf16>
    %31 = vector.shape_cast %30 : vector<8x4x16xbf16> to vector<32x1x16xbf16>
    %32 = vector.shape_cast %1 : vector<8x4x16x32xbf16> to vector<32x16x32xbf16>
    %cst_16 = arith.constant dense<0.000000e+00> : vector<32x1x32xf32>
    %33 = tpu.matmul %31, %32, %cst_16 {dimension_numbers = #tpu.dot_dimension_numbers<[2], [1], [1], [2], [0, 0, 0, 1, 1, 2], [0], [0]>} : vector<32x1x16xbf16>, vector<32x16x32xbf16>, vector<32x1x32xf32> -> vector<32x1x32xf32>
    %34 = vector.shape_cast %33 : vector<32x1x32xf32> to vector<8x4x32xf32>
    %c0_17 = arith.constant 0 : index
    %c0_18 = arith.constant 0 : index
    %35 = vector.load %arg4[%c0_17, %c0_18] : memref<8x4xf32, #tpu.memory_space<vmem>>, vector<8x4xf32>
    %36 = vector.shape_cast %35 : vector<8x4xf32> to vector<8x4x1xf32>
    %37 = vector.broadcast %36 : vector<8x4x1xf32> to vector<8x4x32xf32>
    %38 = arith.mulf %37, %34 : vector<8x4x32xf32>
    %39 = arith.truncf %38 : vector<8x4x32xf32> to vector<8x4x32xbf16>
    %40 = vector.shape_cast %39 : vector<8x4x32xbf16> to vector<32x32xbf16>
    %c0_19 = arith.constant 0 : index
    %c0_20 = arith.constant 0 : index
    %41 = vector.load %arg9[%c0_19, %c0_20] : memref<32x16xbf16, #tpu.memory_space<vmem>>, vector<32x16xbf16>
    %cst_21 = arith.constant dense<0.000000e+00> : vector<32x16xf32>
    %42 = tpu.matmul %40, %41, %cst_21 {dimension_numbers = #tpu.dot_dimension_numbers<[1], [0], [0], [1], [0, 0, 1, 1], [], []>} : vector<32x32xbf16>, vector<32x16xbf16>, vector<32x16xf32> -> vector<32x16xf32>
    %43 = vector.shape_cast %42 : vector<32x16xf32> to vector<8x4x16xf32>
    %c0_22 = arith.constant 0 : index
    %c0_23 = arith.constant 0 : index
    %44 = vector.load %arg6[%c0_22, %c0_23] : memref<8x16xf32, #tpu.memory_space<vmem>>, vector<8x16xf32>
    %45 = vector.shape_cast %44 : vector<8x16xf32> to vector<8x1x16xf32>
    %46 = vector.broadcast %45 : vector<8x1x16xf32> to vector<8x4x16xf32>
    %47 = arith.addf %43, %46 : vector<8x4x16xf32>
    %cst_24 = arith.constant 0.000000e+00 : f32
    %48 = vector.broadcast %cst_24 : f32 to vector<8x4x16xf32>
    %49 = arith.maximumf %47, %48 : vector<8x4x16xf32>
    %c0_25 = arith.constant 0 : index
    %c0_26 = arith.constant 0 : index
    %50 = vector.load %arg10[%c0_25, %c0_26] : memref<1x16xf32, #tpu.memory_space<vmem>>, vector<1x16xf32>
    %51 = vector.shape_cast %50 : vector<1x16xf32> to vector<1x1x16xf32>
    %52 = vector.broadcast %51 : vector<1x1x16xf32> to vector<8x4x16xf32>
    %53 = arith.mulf %49, %52 : vector<8x4x16xf32>
    %cst_27 = arith.constant dense<0.000000e+00> : vector<8x4xf32>
    %54 = vector.multi_reduction <add>, %53, %cst_27 [2] : vector<8x4x16xf32> to vector<8x4xf32>
    %c0_28 = arith.constant 0 : index
    %c0_29 = arith.constant 0 : index
    %55 = vector.load %arg3[%c0_28, %c0_29] : memref<8x4xf32, #tpu.memory_space<vmem>>, vector<8x4xf32>
    %56 = arith.addf %54, %55 : vector<8x4xf32>
    %cst_30 = arith.constant dense<0xFF800000> : vector<8xf32>
    %57 = vector.multi_reduction <maximumf>, %56, %cst_30 [1] : vector<8x4xf32> to vector<8xf32>
    %58 = vector.shape_cast %57 : vector<8xf32> to vector<8x1xf32>
    %59 = vector.broadcast %58 : vector<8x1xf32> to vector<8x4xf32>
    %60 = arith.subf %56, %59 : vector<8x4xf32>
    %61 = math.exp %60 : vector<8x4xf32>
    %cst_31 = arith.constant dense<0.000000e+00> : vector<8xf32>
    %62 = vector.multi_reduction <add>, %61, %cst_31 [1] : vector<8x4xf32> to vector<8xf32>
    %63 = vector.shape_cast %62 : vector<8xf32> to vector<8x1xf32>
    %64 = tpu.reciprocal %63 {approx = true} : vector<8x1xf32> -> vector<8x1xf32>
    %65 = vector.broadcast %64 : vector<8x1xf32> to vector<8x4xf32>
    %66 = arith.mulf %61, %65 : vector<8x4xf32>
    %67 = vector.shape_cast %66 : vector<8x4xf32> to vector<8x4x1xf32>
    %68 = vector.broadcast %67 : vector<8x4x1xf32> to vector<8x4x32xf32>
    %69 = arith.mulf %68, %38 : vector<8x4x32xf32>
    %cst_32 = arith.constant dense<0.000000e+00> : vector<8x32xf32>
    %70 = vector.multi_reduction <add>, %69, %cst_32 [1] : vector<8x4x32xf32> to vector<8x32xf32>
    %71 = arith.truncf %70 : vector<8x32xf32> to vector<8x32xbf16>
    %c0_33 = arith.constant 0 : index
    %c0_34 = arith.constant 0 : index
    %72 = vector.load %arg11[%c0_33, %c0_34] : memref<32x16xbf16, #tpu.memory_space<vmem>>, vector<32x16xbf16>
    %cst_35 = arith.constant dense<0.000000e+00> : vector<8x16xf32>
    %73 = tpu.matmul %71, %72, %cst_35 {dimension_numbers = #tpu.dot_dimension_numbers<[1], [0], [0], [1], [0, 0, 1, 1], [], []>} : vector<8x32xbf16>, vector<32x16xbf16>, vector<8x16xf32> -> vector<8x16xf32>
    %c0_36 = arith.constant 0 : index
    %c0_37 = arith.constant 0 : index
    %74 = vector.load %arg12[%c0_36, %c0_37] : memref<1x16xf32, #tpu.memory_space<vmem>>, vector<1x16xf32>
    %75 = vector.broadcast %74 : vector<1x16xf32> to vector<8x16xf32>
    %76 = arith.addf %73, %75 : vector<8x16xf32>
    %77 = math.tanh %76 : vector<8x16xf32>
    %78 = vector.extract_strided_slice %77 {offsets = [0, 0], sizes = [1, 16], strides = [1, 1]} : vector<8x16xf32> to vector<1x16xf32>
    %79 = vector.shape_cast %78 : vector<1x16xf32> to vector<1x1x16xf32>
    %c0_38 = arith.constant 0 : index
    %c0_39 = arith.constant 0 : index
    %c0_40 = arith.constant 0 : index
    %80 = vector.load %arg13[%c0_38, %c0_39, %c0_40] : memref<1x1x128xf32, #tpu.memory_space<vmem>>, vector<1x1x16xf32>
    tpu.vector_store %arg13[%c0_38, %c0_39, %c0_40], %79 {strides = array<i32>} : memref<1x1x128xf32, #tpu.memory_space<vmem>>, vector<1x1x16xf32>,
    %81 = vector.extract_strided_slice %77 {offsets = [1, 0], sizes = [1, 16], strides = [1, 1]} : vector<8x16xf32> to vector<1x16xf32>
    %82 = vector.shape_cast %81 : vector<1x16xf32> to vector<1x1x16xf32>
    %c0_41 = arith.constant 0 : index
    %c0_42 = arith.constant 0 : index
    %c16 = arith.constant 16 : index
    %83 = vector.load %arg13[%c0_41, %c0_42, %c16] : memref<1x1x128xf32, #tpu.memory_space<vmem>>, vector<1x1x16xf32>
    tpu.vector_store %arg13[%c0_41, %c0_42, %c16], %82 {strides = array<i32>} : memref<1x1x128xf32, #tpu.memory_space<vmem>>, vector<1x1x16xf32>,
    %84 = vector.extract_strided_slice %77 {offsets = [2, 0], sizes = [1, 16], strides = [1, 1]} : vector<8x16xf32> to vector<1x16xf32>
    %85 = vector.shape_cast %84 : vector<1x16xf32> to vector<1x1x16xf32>
    %c0_43 = arith.constant 0 : index
    %c0_44 = arith.constant 0 : index
    %c32 = arith.constant 32 : index
    %86 = vector.load %arg13[%c0_43, %c0_44, %c32] : memref<1x1x128xf32, #tpu.memory_space<vmem>>, vector<1x1x16xf32>
    tpu.vector_store %arg13[%c0_43, %c0_44, %c32], %85 {strides = array<i32>} : memref<1x1x128xf32, #tpu.memory_space<vmem>>, vector<1x1x16xf32>,
    %87 = vector.extract_strided_slice %77 {offsets = [3, 0], sizes = [1, 16], strides = [1, 1]} : vector<8x16xf32> to vector<1x16xf32>
    %88 = vector.shape_cast %87 : vector<1x16xf32> to vector<1x1x16xf32>
    %c0_45 = arith.constant 0 : index
    %c0_46 = arith.constant 0 : index
    %c48 = arith.constant 48 : index
    %89 = vector.load %arg13[%c0_45, %c0_46, %c48] : memref<1x1x128xf32, #tpu.memory_space<vmem>>, vector<1x1x16xf32>
    tpu.vector_store %arg13[%c0_45, %c0_46, %c48], %88 {strides = array<i32>} : memref<1x1x128xf32, #tpu.memory_space<vmem>>, vector<1x1x16xf32>,
    %90 = vector.extract_strided_slice %77 {offsets = [4, 0], sizes = [1, 16], strides = [1, 1]} : vector<8x16xf32> to vector<1x16xf32>
    %91 = vector.shape_cast %90 : vector<1x16xf32> to vector<1x1x16xf32>
    %c0_47 = arith.constant 0 : index
    %c0_48 = arith.constant 0 : index
    %c64 = arith.constant 64 : index
    %92 = vector.load %arg13[%c0_47, %c0_48, %c64] : memref<1x1x128xf32, #tpu.memory_space<vmem>>, vector<1x1x16xf32>
    tpu.vector_store %arg13[%c0_47, %c0_48, %c64], %91 {strides = array<i32>} : memref<1x1x128xf32, #tpu.memory_space<vmem>>, vector<1x1x16xf32>,
    %93 = vector.extract_strided_slice %77 {offsets = [5, 0], sizes = [1, 16], strides = [1, 1]} : vector<8x16xf32> to vector<1x16xf32>
    %94 = vector.shape_cast %93 : vector<1x16xf32> to vector<1x1x16xf32>
    %c0_49 = arith.constant 0 : index
    %c0_50 = arith.constant 0 : index
    %c80 = arith.constant 80 : index
    %95 = vector.load %arg13[%c0_49, %c0_50, %c80] : memref<1x1x128xf32, #tpu.memory_space<vmem>>, vector<1x1x16xf32>
    tpu.vector_store %arg13[%c0_49, %c0_50, %c80], %94 {strides = array<i32>} : memref<1x1x128xf32, #tpu.memory_space<vmem>>, vector<1x1x16xf32>,
    %96 = vector.extract_strided_slice %77 {offsets = [6, 0], sizes = [1, 16], strides = [1, 1]} : vector<8x16xf32> to vector<1x16xf32>
    %97 = vector.shape_cast %96 : vector<1x16xf32> to vector<1x1x16xf32>
    %c0_51 = arith.constant 0 : index
    %c0_52 = arith.constant 0 : index
    %c96 = arith.constant 96 : index
    %98 = vector.load %arg13[%c0_51, %c0_52, %c96] : memref<1x1x128xf32, #tpu.memory_space<vmem>>, vector<1x1x16xf32>
    tpu.vector_store %arg13[%c0_51, %c0_52, %c96], %97 {strides = array<i32>} : memref<1x1x128xf32, #tpu.memory_space<vmem>>, vector<1x1x16xf32>,
    %99 = vector.extract_strided_slice %77 {offsets = [7, 0], sizes = [1, 16], strides = [1, 1]} : vector<8x16xf32> to vector<1x16xf32>
    %100 = vector.shape_cast %99 : vector<1x16xf32> to vector<1x1x16xf32>
    %c0_53 = arith.constant 0 : index
    %c0_54 = arith.constant 0 : index
    %c112 = arith.constant 112 : index
    %101 = vector.load %arg13[%c0_53, %c0_54, %c112] : memref<1x1x128xf32, #tpu.memory_space<vmem>>, vector<1x1x16xf32>
    tpu.vector_store %arg13[%c0_53, %c0_54, %c112], %100 {strides = array<i32>} : memref<1x1x128xf32, #tpu.memory_space<vmem>>, vector<1x1x16xf32>,
    return
  }
  func.func @transform_0(%arg0: i32) -> (i32, i32, i32, i32) {
    %c0_i32 = arith.constant 0 : i32
    %c0_i32_0 = arith.constant 0 : i32
    %c0_i32_1 = arith.constant 0 : i32
    %c0_i32_2 = arith.constant 0 : i32
    return %arg0, %c0_i32, %c0_i32_0, %c0_i32_1 : i32, i32, i32, i32
  }
  func.func @transform_1(%arg0: i32) -> (i32, i32, i32) {
    %c0_i32 = arith.constant 0 : i32
    %c0_i32_0 = arith.constant 0 : i32
    %c0_i32_1 = arith.constant 0 : i32
    return %arg0, %c0_i32, %c0_i32_0 : i32, i32, i32
  }
  func.func @transform_2(%arg0: i32) -> (i32, i32) {
    %c0_i32 = arith.constant 0 : i32
    %c0_i32_0 = arith.constant 0 : i32
    return %arg0, %c0_i32 : i32, i32
  }
  func.func @transform_3(%arg0: i32) -> (i32, i32) {
    %c0_i32 = arith.constant 0 : i32
    %c0_i32_0 = arith.constant 0 : i32
    return %arg0, %c0_i32 : i32, i32
  }
  func.func @transform_4(%arg0: i32) -> (i32, i32) {
    %c0_i32 = arith.constant 0 : i32
    %c0_i32_0 = arith.constant 0 : i32
    return %arg0, %c0_i32 : i32, i32
  }
  func.func @transform_5(%arg0: i32) -> (i32, i32) {
    %c0_i32 = arith.constant 0 : i32
    %c0_i32_0 = arith.constant 0 : i32
    return %arg0, %c0_i32 : i32, i32
  }
  func.func @transform_6(%arg0: i32) -> (i32, i32) {
    %c0_i32 = arith.constant 0 : i32
    %c0_i32_0 = arith.constant 0 : i32
    %c0_i32_1 = arith.constant 0 : i32
    return %c0_i32, %c0_i32_0 : i32, i32
  }
  func.func @transform_7(%arg0: i32) -> (i32, i32) {
    %c0_i32 = arith.constant 0 : i32
    %c0_i32_0 = arith.constant 0 : i32
    %c0_i32_1 = arith.constant 0 : i32
    return %c0_i32, %c0_i32_0 : i32, i32
  }
  func.func @transform_8(%arg0: i32) -> (i32, i32) {
    %c0_i32 = arith.constant 0 : i32
    %c0_i32_0 = arith.constant 0 : i32
    %c0_i32_1 = arith.constant 0 : i32
    return %c0_i32, %c0_i32_0 : i32, i32
  }
  func.func @transform_9(%arg0: i32) -> (i32, i32) {
    %c0_i32 = arith.constant 0 : i32
    %c0_i32_0 = arith.constant 0 : i32
    %c0_i32_1 = arith.constant 0 : i32
    return %c0_i32, %c0_i32_0 : i32, i32
  }
  func.func @transform_10(%arg0: i32) -> (i32, i32) {
    %c0_i32 = arith.constant 0 : i32
    %c0_i32_0 = arith.constant 0 : i32
    %c0_i32_1 = arith.constant 0 : i32
    return %c0_i32, %c0_i32_0 : i32, i32
  }
  func.func @transform_11(%arg0: i32) -> (i32, i32) {
    %c0_i32 = arith.constant 0 : i32
    %c0_i32_0 = arith.constant 0 : i32
    %c0_i32_1 = arith.constant 0 : i32
    return %c0_i32, %c0_i32_0 : i32, i32
  }
  func.func @transform_12(%arg0: i32) -> (i32, i32, i32) {
    %c0_i32 = arith.constant 0 : i32
    %c0_i32_0 = arith.constant 0 : i32
    %c0_i32_1 = arith.constant 0 : i32
    return %arg0, %c0_i32, %c0_i32_0 : i32, i32, i32
  }
}

</mosaic_0001>

<bundles_post_ra>
// kernel: tpu_custom_call.1
= control target key start
LH: loop header
LB: loop body
LE: loop exit
PB: predicated region body
PF: predicated region fallthrough
CT: control target
= control target key end

     0   :  { %17 = vsyncpa [#allocation3], 0  ;;  %s10442_s0 = inlined_call_operand.hbm [shape: f32[16,4,16,32], index: 0, kind: input, shape index: {}]   ;;  %s10443_s1 = inlined_call_operand.vmem [shape: bf16[16,4,16], index: 1, kind: input, shape index: {}]   ;;  %s10444_s2 = inlined_call_operand.vmem [shape: f32[16,4], index: 2, kind: input, shape index: {}]   ;;  %s10445_s3 = inlined_call_operand.vmem [shape: f32[16,4], index: 3, kind: input, shape index: {}]   ;;  %s10446_s4 = inlined_call_operand.vmem [shape: f32[16,16], index: 4, kind: input, shape index: {}]   ;;  %s10447_s5 = inlined_call_operand.vmem [shape: f32[16,16], index: 5, kind: input, shape index: {}]   ;;  %s10448_s6 = inlined_call_operand.vmem [shape: bf16[32,16], index: 6, kind: input, shape index: {}]   ;;  %s10449_s7 = inlined_call_operand.vmem [shape: f32[1,16], index: 7, kind: input, shape index: {}]   ;;  %s10450_s8 = inlined_call_operand.vmem [shape: bf16[32,16], index: 8, kind: input, shape index: {}]   ;;  %s10451_s9 = inlined_call_operand.vmem [shape: f32[1,16], index: 9, kind: input, shape index: {}]   ;;  %s10452_s10 = inlined_call_operand.vmem [shape: bf16[32,16], index: 10, kind: input, shape index: {}]   ;;  %s10453_s11 = inlined_call_operand.vmem [shape: f32[1,16], index: 11, kind: input, shape index: {}]   ;;  %s10454_s12 = inlined_call_operand.hbm [shape: f32[2,1,128], index: 12, kind: output, shape index: {}]  }
   0x1   :  { %19 = vsyncpa [#allocation3 + $0x1], 0 }
   0x2   :  { %20 = vsyncpa [#allocation4], 0 }
   0x3   :  { %22 = vsyncpa [#allocation4 + $0x1], 0  ;;  %s7881_s21 = smov 0   ;;  %s7883_s22 = smov 0  }
   0x4   :  { %s7885_s23 = smov 0   ;;  %s7887_s24 = smov 0  }
   0x5 LB: > { %10572 = sst [smem:[#allocation8_spill]] %s7786_s21  ;;  %s7902_s25 = sadd.s32 4294967295, %s7798_s24   ;;  %s7798_s24 = sphi %s7887_s24, %s10857_s24   ;;  %s7794_s23 = sphi %s7885_s23, %s10859_s23   ;;  %s7790_s22 = sphi %s7883_s22, %s10861_s22   ;;  %s7786_s21 = sphi %s7881_s21, %s10860_s21  }
   0x6   : > { %10573 = sst [smem:[#allocation9_spill]] %s7794_s23  ;;  %s6990_s26 = sadd.s32 4294967294, %s7798_s24  }
   0x7   : > { %s7906_s27 = sadd.s32 1, %s7798_s24   ;;  %s35_s28 = sadd.s32 1, %s7794_s23 }
   0x8   : > { %10574 = sst [smem:[#allocation10_spill]] %s7906_s27  ;;  %s32_s29 = ssub.s32 %s7798_s24, %s7906_s27 }
   0x9   : > { %p42_p0 = scmp.ne.s32.totalorder %s7794_s23, %s7790_s22  ;;  %p33_p1 = scmp.eq.s32.totalorder %s32_s29, 0 }
   0xa   : > { %p43_p2 = scmp.eq.s32.totalorder %s7798_s24, 0  ;;  %p48_p3 = scmp.ne.s32.totalorder %s7790_s22, %s7786_s21 }
   0xb   : > { %p49_p4 = scmp.eq.s32.totalorder %s7902_s25, 0  ;;  %p328_p7 = scmp.eq.s32.totalorder %s7902_s25, 1 }
   0xc   : > { %s7918_s30 = scalar_select %p33_p1, %s7794_s23, %s35_s28  }
   0xd   : > { %p7920_p5 = por %p43_p2, %p42_p0  ;;  %p7924_p6 = por %p49_p4, %p48_p3 }
   0xe   : > { %10575 = sst [smem:[#allocation11_spill]] %s7918_s30  ;;  %p334_p8 = scmp.eq.s32.totalorder %s6990_s26, 1 }
   0xf   : > { %s10577_s14 = scalar_select %p7924_p6, 1, 0 }
  0x10   : > { %p7483_p10 = scmp.lt.s32.totalorder %s7798_s24, 2  ;;  %p7931_p11 = por %p328_p7, %p42_p0 }
  0x11   : > { %p7935_p12 = por %p334_p8, %p48_p3  ;;  %s372_s17 = sand.u32 1, %s7794_s23  }
  0x12   : > { %s10578_s15 = scalar_select %p7931_p11, 1, 0 }
  0x13   : > { %s10579_s16 = scalar_select %p7935_p12, 1, 0 }
  0x14   : > { %s7089_s18 = sshll.u32 %s7798_s24, 13  ;;  %s6993_s19 = sshll.u32 %s372_s17, 9 }
  0x15   : > { %10580 = sst [smem:[#allocation12_spill]] %s10579_s16  ;;  %s7944_s29 = scalar_lea.hbm %s10442_s0, %s7089_s18 }
  0x16   : > { %s376_s26 = scalar_lea.vmem [#allocation2], %s6993_s19  ;;  %p7948_p13 = pnand %p7483_p10, %p7920_p5 }
  0x17   : > { %s384_s30 = sshll.u32 %s376_s26, 4  ;;  %s7954_s23 = scalar_lea.sflag [#allocation3], %s372_s17  ;;  %s7952_s30 = int_to_ptr.vmem [resolvable:$true] %s384_s30 }
  0x18   : > { %s7706_s16 = scalar_lea.hbm %s7944_s29, 8192  ;;  %p7708_p1 = pneg %p7948_p13 }
  0x19   : > { %p7707_p0 = scmp.ne.s32.totalorder %s7944_s29, %s7706_s16  ;;  %s7711_s19 = scalar_lea.hbm %s10442_s0, 16384 }
  0x1a   : > { %p7712_p4 = scmp.lt.s32.totalorder %s7944_s29, %s10442_s0  ;;  %p7713_p5 = scmp.lt.s32.totalorder %s7711_s19, %s7706_s16 }
  0x1b   : > { %p7709_p2 = pnand %p7708_p1, %p7707_p0 }
  0x1c   : > { %p7714_p7 = por %p7713_p5, %p7712_p4 }
  0x1d   : > { %p7710_p3 = pneg %p7709_p2 }
  0x1f   : > { %p7715_p8 = pnand %p7714_p7, %p7710_p3 }
  0x21   : > { %7718 = shalt.err (!%p7715_p8)
}
  0x22   : > { %s7719_s17 = scalar_lea.vmem %s7952_s30, 8192  ;;  %s7800_s26 = smov [#allocation2]  }
  0x23   : > { %p7720_p10 = scmp.ne.s32.totalorder %s7952_s30, %s7719_s17  ;;  %s7724_s21 = sshll.u32 %s7800_s26, 4  ;;  %s7725_s21 = int_to_ptr.vmem [resolvable:$false] %s7724_s21 }
  0x24   : > { %s7726_s18 = scalar_lea.vmem %s7725_s21, 16384  ;;  %p7727_p2 = scmp.lt.s32.totalorder %s7952_s30, %s7725_s21 }
  0x25   : > { %p7722_p9 = pnand %p7720_p10, %p7708_p1  ;;  %p7728_p12 = scmp.lt.s32.totalorder %s7726_s18, %s7719_s17 }
  0x27   : > { %p7723_p0 = pneg %p7722_p9  ;;  %p7729_p11 = por %p7728_p12, %p7727_p2 }
  0x29   : > { %p7730_p6 = pnand %p7729_p11, %p7723_p0 }
  0x2b   : > { %7733 = shalt.err (!%p7730_p6)
}
  0x2c   : > { %s7801_s16 = smov 128   ;;  %s7802_s20 = smov 8  }
  0x2d   : > { %7478 = dma.hbm_to_vmem [thread:$0]  (!%p7948_p13), %s7944_s29, 8192, %s7952_s30, %s7954_s23, %s7801_s16, %s7801_s16, %s7802_s20  }
  0x2e   : > { %p6997_p9 = scmp.ge.s32.totalorder %s7798_s24, 1  ;;  %p429_p1 = scmp.lt.s32.totalorder %s7798_s24, 3 }
  0x30   : > { %p430_p3 = pnand %p6997_p9, %p429_p1 }
  0x32   : > { %433 = sbr.rel (%p430_p3) target bundleno = 3678 (0xe5e), region = 68 }
  0x37   : > { %s7978_s21 = sand.u32 1, %s7790_s22   ;;  %p10582_p6 = scmp.ne.s32.totalorder %s10577_s14, 0 }
  0x38   : > { %s6998_s19 = sshll.u32 %s7978_s21, 9  ;;  %s436_s13 = scalar_lea.sflag [#allocation3], %s7978_s21 }
  0x39   : > { %s7982_s28 = scalar_lea.vmem [#allocation2], %s6998_s19 }
  0x3a   : > { %7777 = dma.done.wait (%p10582_p6), %s436_s13, 8192  }
  0x3b   : > { %7779 = vsyncadd (%p10582_p6), %s436_s13, 4294959104  ;;  %s6999_s23 = sshll.u32 %s7902_s25, 3  ;;  %v7533_v0 = vld [vmem:[%s10448_s6 + $0x8] sm:$0xff]   ;;  %v7534_v1 = vld [vmem:[%s10448_s6] sm:$0xff]   ;;  %vm636_vm0 = vcmask 261120   ;;  %v10462_v10 = vlaneseq  ;;  %p507_p12 = scmp.lt.s32.totalorder %s7902_s25, 1 }
  0x3c   : > { %p502_p11 = scmp.lt.s32.totalorder %s6999_s23, 15  ;;  %7195 = vmatprep.subr.bf16.mxu0 %v7533_v0  ;;  %v524_v2 = vld [vmem:[%s7982_s28] sm:$0xff]  ;;  %v525_v3 = vld [vmem:[%s7982_s28 + $0x8] sm:$0xff]  ;;  %v526_v5 = vld [vmem:[%s7982_s28 + $0x10] sm:$0xff]  ;;  %vm1312_vm1 = vcmask 130048   ;;  %vm2276_vm2 = vcmask 130112  }
  0x3d   : > { %7196 = vmatpush3.bf16.msra.mxu0 %v7533_v0  ;;  %v7997_v4 = vpack.c.bf16 %v525_v3, %v524_v2  ;;  %v527_v6 = vld [vmem:[%s7982_s28 + $0x18] sm:$0xff]  ;;  %v528_v7 = vld [vmem:[%s7982_s28 + $0x20] sm:$0xff]  ;;  %v529_v8 = vld [vmem:[%s7982_s28 + $0x28] sm:$0xff]  ;;  %v8012_v12 = vshrl.u32 %v10462_v10, 7  ;;  %s508_s20 = scalar_select %p507_p12, %s7902_s25, 1  ;;  %vm2557_vm3 = vcmask 1041409  }
  0x3e   : > { %7197 = vmatprep.subr.bf16.mxu0 %v7534_v1  ;;  %s10863_s23 = smov (!%p502_p11, %s6999_s23), 15  ;;  %v8005_v9 = vpack.c.bf16 %v527_v6, %v526_v5  ;;  %v8007_v11 = vpack.c.bf16 %v529_v8, %v528_v7  ;;  %v530_v13 = vld [vmem:[%s7982_s28 + $0x30] sm:$0xff]  ;;  %v531_v14 = vld [vmem:[%s7982_s28 + $0x38] sm:$0xff]  ;;  %v532_v15 = vld [vmem:[%s7982_s28 + $0x40] sm:$0xff]  ;;  %vm2559_vm4 = vcmask 1042434   ;;  %vm2561_vm5 = vcmask 1043459  }
  0x3f   : > { %10583 = vst [vmem:[#allocation13_spill] sm:$0xff] %v7997_v4  ;;  %7199 = vmatprep.mubr.msk.bf16.mxu0 %vm636_vm0, %v7997_v4  ;;  %s7000_s14 = sshll.u32 %s10863_s23, 1  ;;  %10586 = vst [vmem:[#allocation16_spill] sm:$0xff] %v8012_v12  ;;  %v533_v16 = vld [vmem:[%s7982_s28 + $0x48] sm:$0xff]  ;;  %v8025_v17 = vpack.c.bf16 %v531_v14, %v530_v13  ;;  %v8028_v18 = vsub.s32 0, %v8012_v12  ;;  %v8034_v22 = vsub.s32 1, %v8012_v12 }
  0x40   : > { %10584 = vst [vmem:[#allocation14_spill] sm:$0xff] %v8005_v9  ;;  %10585 = vst [vmem:[#allocation15_spill] sm:$0xff] %v8007_v11  ;;  %s8023_s16 = scalar_lea.vmem %s10443_s1, %s7000_s14  ;;  %v8030_v19 = vpack.c.bf16 %v533_v16, %v532_v15  ;;  %v534_v23 = vld [vmem:[%s7982_s28 + $0x50] sm:$0xff]  ;;  %v535_v24 = vld [vmem:[%s7982_s28 + $0x58] sm:$0xff]  ;;  %v8043_v27 = vsub.s32 2, %v8012_v12  ;;  %v8053_v32 = vsub.s32 3, %v8012_v12 }
  0x41   : > { %7198 = vmatpush3.bf16.msra.mxu0 %v7534_v1  ;;  %10587 = vst [vmem:[#allocation17_spill] sm:$0xff] %v8025_v17  ;;  %v1505_v20 = vld [vmem:[%s8023_s16] sm:$0x3]  ;;  %v537_v28 = vld [vmem:[%s7982_s28 + $0x68] sm:$0xff]  ;;  %v8049_v30 = vpack.c.bf16 %v535_v24, %v534_v23  ;;  %v1506_v34 = vld [vmem:[%s8023_s16 + $0x2] sm:$0x3] }
  0x42   : > { %10588 = vst [vmem:[#allocation18_spill] sm:$0xff] %v8030_v19  ;;  %v1513_v21 = vunpack.c.l.bf16 %v1505_v20  ;;  %v536_v25 = vld [vmem:[%s7982_s28 + $0x60] sm:$0xff]  ;;  %v1514_v36 = vunpack.c.l.bf16 %v1506_v34  ;;  %v538_v37 = vld [vmem:[%s7982_s28 + $0x70] sm:$0xff]  ;;  %v539_v38 = vld [vmem:[%s7982_s28 + $0x78] sm:$0xff]  ;;  %s8205_s19 = sshll.u32 %s508_s20, 3  ;;  %vm2592_vm6 = vcmask 125952  }
  0x43   : > { %10589 = vst [vmem:[#allocation19_spill] sm:$0xff] %v8049_v30  ;;  %v8055_v33 = vpack.c.bf16 %v537_v28, %v536_v25  ;;  %v540_v39 = vld [vmem:[%s7982_s28 + $0x80] sm:$0xff]  ;;  %v541_v40 = vld [vmem:[%s7982_s28 + $0x88] sm:$0xff]  ;;  %v8067_v41 = vpack.c.bf16 %v539_v38, %v538_v37  ;;  %v542_v45 = vld [vmem:[%s7982_s28 + $0x90] sm:$0xff]  ;;  %s518_s27 = scalar_lea.vmem %s10446_s4, %s8205_s19  ;;  %vm7806_vm7 = vmmov 0   ;;  %s514_s18 = scalar_lea.vmem %s10445_s3, %s8205_s19  ;;  %vm6406_vm8 = vcmask 1044484  }
  0x44   : > { %7200 = vmatmul.mubr.msk.bf16.vlgmr.msra.gmra.mxu0 %vm636_vm0, %v8005_v9  ;;  %v1532_v26 = vrot.slane %v1513_v21, %v8028_v18  ;;  %v1543_v29 = vrot.slane %v1513_v21, %v8034_v22  ;;  %v1554_v31 = vrot.slane %v1513_v21, %v8043_v27  ;;  %v1565_v35 = vrot.slane %v1513_v21, %v8053_v32  ;;  %v543_v46 = vld [vmem:[%s7982_s28 + $0x98] sm:$0xff]  ;;  %v1507_v47 = vld [vmem:[%s8023_s16 + $0x4] sm:$0x3]  ;;  %v545_v49 = vld [vmem:[%s7982_s28 + $0xa8] sm:$0xff]  ;;  %s510_s29 = scalar_lea.vmem %s10444_s2, %s8205_s19  ;;  %s522_s14 = scalar_lea.vmem %s10447_s5, %s8205_s19 }
  0x45   : > { %7203 = vmatprep.mubr.msk.bf16.mxu0 %vm636_vm0, %v8007_v11  ;;  %10590 = vst [vmem:[#allocation20_spill] sm:$0xff] %v8055_v33  ;;  %10591 = vst [vmem:[#allocation21_spill] sm:$0xff] %v8067_v41  ;;  %v1576_v42 = vrot.slane %v1514_v36, %v8028_v18  ;;  %v8070_v43 = vpack.c.bf16 %v541_v40, %v540_v39  ;;  %v1598_v44 = vrot.slane %v1514_v36, %v8043_v27  ;;  %v544_v48 = vld [vmem:[%s7982_s28 + $0xa0] sm:$0xff]  ;;  %v546_v56 = vld [vmem:[%s7982_s28 + $0xb0] sm:$0xff]  ;;  %vm6408_vm9 = vcmask 1045509   ;;  %s7808_s30 = smov 32  }
  0x46   : > { %1538 = vbcast.lane.b32.xlu1 %v1532_v26, 264  ;;  %1534 = vbcast.lane.b32.xlu0 %v1532_v26, 256  ;;  %v8082_v50 = vpack.c.bf16 %v543_v46, %v542_v45  ;;  %v1609_v51 = vrot.slane %v1514_v36, %v8053_v32  ;;  %v1515_v52 = vunpack.c.l.bf16 %v1507_v47  ;;  %v8085_v53 = vpack.c.bf16 %v545_v49, %v544_v48  ;;  %v547_v57 = vld [vmem:[%s7982_s28 + $0xb8] sm:$0xff]  ;;  %v548_v58 = vld [vmem:[%s7982_s28 + $0xc0] sm:$0xff]  ;;  %v549_v59 = vld [vmem:[%s7982_s28 + $0xc8] sm:$0xff]  ;;  %s7810_s17 = smov 64  }
  0x47   : > { %10592 = vst [vmem:[#allocation22_spill] sm:$0xff] %v8070_v43  ;;  %v1587_v54 = vrot.slane %v1514_v36, %v8034_v22  ;;  %v8097_v60 = vpack.c.bf16 %v547_v57, %v546_v56  ;;  %v8100_v62 = vpack.c.bf16 %v549_v59, %v548_v58  ;;  %v550_v0 = vld [vmem:[%s7982_s28 + $0xd0] sm:$0xff]  ;;  %v551_v1 = vld [vmem:[%s7982_s28 + $0xd8] sm:$0xff]  ;;  %v1508_v2 = vld [vmem:[%s8023_s16 + $0x6] sm:$0x3]  ;;  %vm6410_vm10 = vcmask 1046534  }
  0x48   : > { %10593 = vst [vmem:[#allocation23_spill] sm:$0xff] %v8082_v50  ;;  %10594 = vst [vmem:[#allocation24_spill] sm:$0xff] %v8085_v53  ;;  %v1620_v55 = vrot.slane %v1515_v52, %v8028_v18  ;;  %v1631_v61 = vrot.slane %v1515_v52, %v8034_v22  ;;  %v1642_v63 = vrot.slane %v1515_v52, %v8043_v27  ;;  %v552_v3 = vld [vmem:[%s7982_s28 + $0xe0] sm:$0xff]  ;;  %v553_v5 = vld [vmem:[%s7982_s28 + $0xe8] sm:$0xff]  ;;  %v1516_v8 = vunpack.c.l.bf16 %v1508_v2  ;;  %s7812_s19 = smov 96   ;;  %s7813_s26 = smov 80  }
  0x49   : > { %10595 = vst [vmem:[#allocation25_spill] sm:$0xff] %v8097_v60  ;;  %10596 = vst [vmem:[#allocation26_spill] sm:$0xff] %v8100_v62  ;;  %v8112_v6 = vpack.c.bf16 %v551_v1, %v550_v0  ;;  %v1653_v7 = vrot.slane %v1515_v52, %v8053_v32  ;;  %v8115_v13 = vpack.c.bf16 %v553_v5, %v552_v3  ;;  %v554_v15 = vld [vmem:[%s7982_s28 + $0xf0] sm:$0xff]  ;;  %v555_v16 = vld [vmem:[%s7982_s28 + $0xf8] sm:$0xff]  ;;  %vm6412_vm11 = vcmask 1047559   ;;  %p10852_p4 = scmp.ne.s32.totalorder %s10578_s15, 0 }
  0x4a   : > { %1545 = vbcast.lane.b32.xlu1 %v1543_v29, 256  ;;  %1556 = vbcast.lane.b32.xlu0 %v1554_v31, 256  ;;  %v1664_v14 = vrot.slane %v1516_v8, %v8028_v18  ;;  %v556_v20 = vld [vmem:[%s7982_s28 + $0x100] sm:$0xff]  ;;  %v557_v21 = vld [vmem:[%s7982_s28 + $0x108] sm:$0xff]  ;;  %v8126_v23 = vpack.c.bf16 %v555_v16, %v554_v15  ;;  %v1675_v24 = vrot.slane %v1516_v8, %v8034_v22  ;;  %v558_v28 = vld [vmem:[%s7982_s28 + $0x110] sm:$0xff]  ;;  %vm6415_vm12 = vcmask 31744  }
  0x4b   : > { %10597 = vst [vmem:[#allocation27_spill] sm:$0xff] %v8112_v6  ;;  %10598 = vst [vmem:[#allocation28_spill] sm:$0xff] %v8115_v13  ;;  %v8129_v25 = vpack.c.bf16 %v557_v21, %v556_v20  ;;  %v1686_v26 = vrot.slane %v1516_v8, %v8043_v27  ;;  %v561_v34 = vld [vmem:[%s7982_s28 + $0x128] sm:$0xff]  ;;  %v1697_v36 = vrot.slane %v1516_v8, %v8053_v32  ;;  %v562_v38 = vld [vmem:[%s7982_s28 + $0x130] sm:$0xff]  ;;  %vm6657_vm13 = vcmask 257024  }
  0x4c   : > { %7204 = vmatmul.mubr.msk.bf16.gmra.mxu0 %vm636_vm0, %v8025_v17  ;;  %10599 = vst [vmem:[#allocation29_spill] sm:$0xff] %v8126_v23  ;;  %v563_v39 = vld [vmem:[%s7982_s28 + $0x138] sm:$0xff]  ;;  %v564_v40 = vld [vmem:[%s7982_s28 + $0x140] sm:$0xff]  ;;  %v566_v46 = vld [vmem:[%s7982_s28 + $0x150] sm:$0xff]  ;;  %vm6813_vm14 = vcmask 122880   ;;  %vm6819_vm15 = vcmask 255105  }
  0x4d   : > { %7207 = vmatprep.mubr.msk.bf16.mxu0 %vm636_vm0, %v8030_v19  ;;  %10600 = vst [vmem:[#allocation30_spill] sm:$0xff] %v8129_v25  ;;  %v567_v47 = vld [vmem:[%s7982_s28 + $0x158] sm:$0xff]  ;;  %v568_v48 = vld [vmem:[%s7982_s28 + $0x160] sm:$0xff]  ;;  %v569_v49 = vld [vmem:[%s7982_s28 + $0x168] sm:$0xff] }
  0x4e   : > { %1549 = vbcast.lane.b32.xlu1 %v1543_v29, 264  ;;  %1567 = vbcast.lane.b32.xlu0 %v1565_v35, 256  ;;  %v559_v29 = vld [vmem:[%s7982_s28 + $0x118] sm:$0xff]  ;;  %v8167_v52 = vpack.c.bf16 %v569_v49, %v568_v48  ;;  %v572_v57 = vld [vmem:[%s7982_s28 + $0x180] sm:$0xff]  ;;  %v573_v58 = vld [vmem:[%s7982_s28 + $0x188] sm:$0xff] }
  0x4f   : > { %v8181_v59 = vpack.c.bf16 %v573_v58, %v572_v57  ;;  %v576_v1 = vld [vmem:[%s7982_s28 + $0x1a0] sm:$0xff]  ;;  %v577_v2 = vld [vmem:[%s7982_s28 + $0x1a8] sm:$0xff]  ;;  %v578_v5 = vld [vmem:[%s7982_s28 + $0x1b0] sm:$0xff] }
  0x50   : > { %10606 = vst [vmem:[#allocation36_spill] sm:$0xff] %v8167_v52  ;;  %v8193_v3 = vpack.c.bf16 %v577_v2, %v576_v1  ;;  %v8214_v21 = vld [vmem:[%s518_s27] sm:$0xff] }
  0x51   : > { %10608 = vst [vmem:[#allocation38_spill] sm:$0xff] %v8181_v59 }
  0x52   : > { %1560 = vbcast.lane.b32.xlu1 %v1554_v31, 264  ;;  %1578 = vbcast.lane.b32.xlu0 %v1576_v42, 256  ;;  %v560_v31 = vld [vmem:[%s7982_s28 + $0x120] sm:$0xff]  ;;  %10610 = vst [vmem:[#allocation40_spill] sm:$0xff] %v8193_v3 }
  0x53   : > { %v8143_v37 = vpack.c.bf16 %v561_v34, %v560_v31 }
  0x54   : > { %7208 = vmatmul.mubr.msk.bf16.gmra.mxu0 %vm636_vm0, %v8049_v30 }
  0x55   : > { %7211 = vmatprep.mubr.msk.bf16.mxu0 %vm636_vm0, %v8055_v33  ;;  %10602 = vst [vmem:[#allocation32_spill] sm:$0xff] %v8143_v37 }
  0x56   : > { %1571 = vbcast.lane.b32.xlu1 %v1565_v35, 264  ;;  %1600 = vbcast.lane.b32.xlu0 %v1598_v44, 256  ;;  %v8140_v35 = vpack.c.bf16 %v559_v29, %v558_v28 }
  0x58   : > { %10601 = vst [vmem:[#allocation31_spill] sm:$0xff] %v8140_v35 }
  0x5a   : > { %1582 = vbcast.lane.b32.xlu1 %v1576_v42, 264  ;;  %1611 = vbcast.lane.b32.xlu0 %v1609_v51, 256  ;;  %v565_v42 = vld [vmem:[%s7982_s28 + $0x148] sm:$0xff] }
  0x5b   : > { %v8155_v45 = vpack.c.bf16 %v565_v42, %v564_v40 }
  0x5c   : > { %7212 = vmatmul.mubr.msk.bf16.gmra.mxu0 %vm636_vm0, %v8067_v41 }
  0x5d   : > { %7215 = vmatprep.mubr.msk.bf16.mxu0 %vm636_vm0, %v8070_v43  ;;  %10604 = vst [vmem:[#allocation34_spill] sm:$0xff] %v8155_v45 }
  0x5e   : > { %1589 = vbcast.lane.b32.xlu1 %v1587_v54, 256  ;;  %1626 = vbcast.lane.b32.xlu0 %v1620_v55, 264 }
  0x62   : > { %1593 = vbcast.lane.b32.xlu1 %v1587_v54, 264  ;;  %1637 = vbcast.lane.b32.xlu0 %v1631_v61, 264  ;;  %v570_v54 = vld [vmem:[%s7982_s28 + $0x170] sm:$0xff] }
  0x64   : > { %7216 = vmatmul.mubr.msk.bf16.gmra.mxu0 %vm636_vm0, %v8082_v50 }
  0x65   : > { %7219 = vmatprep.mubr.msk.bf16.mxu0 %vm636_vm0, %v8085_v53 }
  0x66   : > { %1604 = vbcast.lane.b32.xlu1 %v1598_v44, 264  ;;  %1648 = vbcast.lane.b32.xlu0 %v1642_v63, 264  ;;  %v8153_v44 = vpack.c.bf16 %v563_v39, %v562_v38 }
  0x68   : > { %10603 = vst [vmem:[#allocation33_spill] sm:$0xff] %v8153_v44 }
  0x6a   : > { %1615 = vbcast.lane.b32.xlu1 %v1609_v51, 264  ;;  %1659 = vbcast.lane.b32.xlu0 %v1653_v7, 264  ;;  %v8165_v51 = vpack.c.bf16 %v567_v47, %v566_v46 }
  0x6c   : > { %7220 = vmatmul.mubr.msk.bf16.gmra.mxu0 %vm636_vm0, %v8097_v60  ;;  %10605 = vst [vmem:[#allocation35_spill] sm:$0xff] %v8165_v51 }
  0x6d   : > { %7223 = vmatprep.mubr.msk.bf16.mxu0 %vm636_vm0, %v8100_v62 }
  0x6e   : > { %1622 = vbcast.lane.b32.xlu1 %v1620_v55, 256  ;;  %1670 = vbcast.lane.b32.xlu0 %v1664_v14, 264  ;;  %v571_v55 = vld [vmem:[%s7982_s28 + $0x178] sm:$0xff] }
  0x6f   : > { %v8175_v56 = vpack.c.bf16 %v571_v55, %v570_v54 }
  0x71   : > { %10607 = vst [vmem:[#allocation37_spill] sm:$0xff] %v8175_v56 }
  0x72   : > { %1633 = vbcast.lane.b32.xlu1 %v1631_v61, 256  ;;  %1681 = vbcast.lane.b32.xlu0 %v1675_v24, 264  ;;  %v574_v61 = vld [vmem:[%s7982_s28 + $0x190] sm:$0xff] }
  0x74   : > { %7224 = vmatmul.mubr.msk.bf16.gmra.mxu0 %vm636_vm0, %v8112_v6 }
  0x75   : > { %7227 = vmatprep.mubr.msk.bf16.mxu0 %vm636_vm0, %v8115_v13 }
  0x76   : > { %1644 = vbcast.lane.b32.xlu1 %v1642_v63, 256  ;;  %1692 = vbcast.lane.b32.xlu0 %v1686_v26, 264  ;;  %v575_v63 = vld [vmem:[%s7982_s28 + $0x198] sm:$0xff] }
  0x77   : > { %v8185_v0 = vpack.c.bf16 %v575_v63, %v574_v61 }
  0x79   : > { %10609 = vst [vmem:[#allocation39_spill] sm:$0xff] %v8185_v0 }
  0x7a   : > { %1655 = vbcast.lane.b32.xlu1 %v1653_v7, 256  ;;  %1703 = vbcast.lane.b32.xlu0 %v1697_v36, 264  ;;  %v579_v7 = vld [vmem:[%s7982_s28 + $0x1b8] sm:$0xff] }
  0x7b   : > { %v8197_v8 = vpack.c.bf16 %v579_v7, %v578_v5 }
  0x7c   : > { %7228 = vmatmul.mubr.msk.bf16.gmra.mxu0 %vm636_vm0, %v8126_v23 }
  0x7d   : > { %7231 = vmatprep.mubr.msk.bf16.mxu0 %vm636_vm0, %v8129_v25  ;;  %10611 = vst [vmem:[#allocation41_spill] sm:$0xff] %v8197_v8 }
  0x7e   : > { %1666 = vbcast.lane.b32.xlu1 %v1664_v14, 256  ;;  %v7803_v14 = vmov 1966171168  }
  0x7f   : > { %v1026_v15 = vunpack.c.l.s4 %v7803_v14 }
  0x81   : > { %v1027_v16 = vunpack.c.0.s8 %v1026_v15 }
  0x82   : > { %1677 = vbcast.lane.b32.xlu1 %v1675_v24, 256 }
  0x83   : > { %v8212_v20 = vsub.s32 %v1027_v16, %v8012_v12 }
  0x84   : > { %7232 = vmatmul.mubr.msk.bf16.gmra.mxu0 %vm636_vm0, %v8140_v35 }
  0x85   : > { %7235 = vmatprep.mubr.msk.bf16.mxu0 %vm636_vm0, %v8143_v37  ;;  %10612 = vst [vmem:[#allocation42_spill] sm:$0xff] %v8212_v20  ;;  %v1031_v24 = vrot.slane %v8214_v21, %v8212_v20 }
  0x86   : > { %1688 = vbcast.lane.b32.xlu1 %v1686_v26, 256 }
  0x87   : > { %v8219_v26 = vrot.slane %v1031_v24, %v8212_v20  ;;  %v1039_v42 = vcombine.high %v1031_v24, %v1031_v24 }
  0x89   : > { %v1076_v28 = vrot.slane %v8219_v26, %v8028_v18  ;;  %v8232_v63 = vrot.slane %v1039_v42, %v8212_v20 }
  0x8a   : > { %1699 = vbcast.lane.b32.xlu1 %v1697_v36, 256  ;;  %v8226_v36 = vld [vmem:[%s10449_s7] ss:$0 sm:$0xff] }
  0x8c   : > { %7236 = vmatmul.mubr.msk.bf16.gmra.mxu0 %vm636_vm0, %v8153_v44 }
  0x8d   : > { %7239 = vmatprep.mubr.msk.bf16.mxu0 %vm636_vm0, %v8155_v45 }
  0x94   : > { %7240 = vmatmul.mubr.msk.bf16.gmra.mxu0 %vm636_vm0, %v8165_v51 }
  0x95   : > { %7243 = vmatprep.mubr.msk.bf16.mxu0 %vm636_vm0, %v8167_v52 }
  0x9c   : > { %7244 = vmatmul.mubr.msk.bf16.gmra.mxu0 %vm636_vm0, %v8175_v56 }
  0x9d   : > { %7247 = vmatprep.mubr.msk.bf16.mxu0 %vm636_vm0, %v8181_v59 }
  0xa4   : > { %7248 = vmatmul.mubr.msk.bf16.gmra.mxu0 %vm636_vm0, %v8185_v0 }
  0xa5   : > { %7251 = vmatprep.mubr.msk.bf16.mxu0 %vm636_vm0, %v8193_v3 }
  0xac   : > { %7252 = vmatmul.mubr.msk.bf16.gmra.mxu0 %vm636_vm0, %v8197_v8 }
 0x104   : > { %v7201_v29 = vpop.f32.mrf.mxu0 }
 0x105   : > { %v1115_v31 = vadd.f32 %v7201_v29, %v1076_v28 }
 0x106   : > { %v767_v34 = vpop.f32.mrf.mxu0 }
 0x107   : > { %v1179_v38 = vmax.f32 %v1115_v31, 0.0  ;;  %v1113_v39 = vadd.f32 %v1076_v28, %v767_v34  ;;  %v1080_v34 = vrot.slane %v8232_v63, %v8028_v18 }
 0x108   : > { %v7202_v40 = vpop.f32.mrf.mxu0 }
 0x109   : > { %v1177_v46 = vmax.f32 %v1113_v39, 0.0  ;;  %v1116_v47 = vadd.f32 %v7202_v40, %v1076_v28  ;;  %v1250_v48 = vmul.f32 %v8226_v36, %v1179_v38 }
 0x10a   : > { %v770_v49 = vpop.f32.mrf.mxu0 }
 0x10b   : > { %v1180_v54 = vmax.f32 %v1116_v47, 0.0  ;;  %v1114_v55 = vadd.f32 %v1076_v28, %v770_v49  ;;  %v1319_v57 = vsel %vm1312_vm1, %v1250_v48, 0.0  ;;  %v1248_v58 = vmul.f32 %v8226_v36, %v1177_v46 }
 0x10c   : > { %1320 = vadd.xlane.f32.xlu1 %v1319_v57  ;;  %v7205_v61 = vpop.f32.mrf.mxu0 }
 0x10d   : > { %v1178_v1 = vmax.f32 %v1114_v55, 0.0  ;;  %v1119_v2 = vadd.f32 %v7205_v61, %v1076_v28  ;;  %v1313_v5 = vsel %vm1312_vm1, %v1248_v58, 0.0  ;;  %v1251_v7 = vmul.f32 %v8226_v36, %v1180_v54 }
 0x10e   : > { %1314 = vadd.xlane.f32.xlu0 %v1313_v5  ;;  %v783_v14 = vpop.f32.mrf.mxu0 }
 0x10f   : > { %v1183_v15 = vmax.f32 %v1119_v2, 0.0  ;;  %v1117_v16 = vadd.f32 %v1076_v28, %v783_v14  ;;  %v1322_v24 = vsel %vm1312_vm1, %v1251_v7, 0.0  ;;  %v1249_v29 = vmul.f32 %v8226_v36, %v1178_v1 }
 0x110   : > { %1323 = vadd.xlane.f32.xlu1 %v1322_v24  ;;  %v7206_v31 = vpop.f32.mrf.mxu0 }
 0x111   : > { %v1181_v38 = vmax.f32 %v1117_v16, 0.0  ;;  %v1120_v39 = vadd.f32 %v7206_v31, %v1076_v28  ;;  %v1316_v40 = vsel %vm1312_vm1, %v1249_v29, 0.0  ;;  %v1254_v42 = vmul.f32 %v8226_v36, %v1183_v15 }
 0x112   : > { %1317 = vadd.xlane.f32.xlu0 %v1316_v40  ;;  %v786_v46 = vpop.f32.mrf.mxu0 }
 0x113   : > { %v1184_v47 = vmax.f32 %v1120_v39, 0.0  ;;  %v1118_v48 = vadd.f32 %v1076_v28, %v786_v46  ;;  %v1331_v54 = vsel %vm1312_vm1, %v1254_v42, 0.0  ;;  %v1252_v61 = vmul.f32 %v8226_v36, %v1181_v38 }
 0x114   : > { %v7209_v49 = vpop.f32.mrf.mxu0  ;;  %v1069_v46 = vcombine.high %v8219_v26, %v8219_v26 }
 0x115   : > { %v1182_v55 = vmax.f32 %v1118_v48, 0.0  ;;  %v1123_v57 = vadd.f32 %v7209_v49, %v1080_v34  ;;  %v1255_v58 = vmul.f32 %v8226_v36, %v1184_v47  ;;  %v1325_v24 = vsel %vm1312_vm1, %v1252_v61, 0.0 }
 0x116   : > { %1332 = vadd.xlane.f32.xlu0 %v1331_v54  ;;  %v799_v1 = vpop.f32.mrf.mxu0 }
 0x117   : > { %v1187_v2 = vmax.f32 %v1123_v57, 0.0  ;;  %v1121_v5 = vadd.f32 %v1080_v34, %v799_v1  ;;  %v1334_v7 = vsel %vm1312_vm1, %v1255_v58, 0.0  ;;  %v1253_v14 = vmul.f32 %v8226_v36, %v1182_v55 }
 0x118   : > { %1335 = vadd.xlane.f32.xlu1 %v1334_v7  ;;  %v7210_v15 = vpop.f32.mrf.mxu0  ;;  %v1084_v1 = vrot.slane %v1069_v46, %v8028_v18 }
 0x119   : > { %v1185_v28 = vmax.f32 %v1121_v5, 0.0  ;;  %v1124_v16 = vadd.f32 %v7210_v15, %v1080_v34  ;;  %v1258_v29 = vmul.f32 %v8226_v36, %v1187_v2  ;;  %v1328_v38 = vsel %vm1312_vm1, %v1253_v14, 0.0 }
 0x11a   : > { %1326 = vadd.xlane.f32.xlu0 %v1325_v24  ;;  %v802_v31 = vpop.f32.mrf.mxu0 }
 0x11b   : > { %v1122_v39 = vadd.f32 %v1080_v34, %v802_v31  ;;  %v1188_v40 = vmax.f32 %v1124_v16, 0.0  ;;  %v1343_v49 = vsel %vm1312_vm1, %v1258_v29, 0.0  ;;  %v1256_v54 = vmul.f32 %v8226_v36, %v1185_v28 }
 0x11c   : > { %1329 = vadd.xlane.f32.xlu1 %v1328_v38  ;;  %v7213_v42 = vpop.f32.mrf.mxu0 }
 0x11d   : > { %v1186_v47 = vmax.f32 %v1122_v39, 0.0  ;;  %v1127_v48 = vadd.f32 %v7213_v42, %v1080_v34  ;;  %v1259_v2 = vmul.f32 %v8226_v36, %v1188_v40  ;;  %v1337_v26 = vsel %vm1312_vm1, %v1256_v54, 0.0 }
 0x11e   : > { %1344 = vadd.xlane.f32.xlu0 %v1343_v49  ;;  %v815_v55 = vpop.f32.mrf.mxu0 }
 0x11f   : > { %v1257_v57 = vmul.f32 %v8226_v36, %v1186_v47  ;;  %v1125_v58 = vadd.f32 %v1080_v34, %v815_v55  ;;  %v1191_v5 = vmax.f32 %v1127_v48, 0.0  ;;  %v1346_v31 = vsel %vm1312_vm1, %v1259_v2, 0.0 }
 0x120   : > { %v7214_v61 = vpop.f32.mrf.mxu0 }
 0x121   : > { %v1128_v7 = vadd.f32 %v7214_v61, %v1080_v34  ;;  %v1340_v14 = vsel %vm1312_vm1, %v1257_v57, 0.0  ;;  %v1189_v24 = vmax.f32 %v1125_v58, 0.0  ;;  %v1262_v40 = vmul.f32 %v8226_v36, %v1191_v5 }
 0x122   : > { %1338 = vadd.xlane.f32.xlu0 %v1337_v26  ;;  %1341 = vadd.xlane.f32.xlu1 %v1340_v14  ;;  %v818_v15 = vpop.f32.mrf.mxu0 }
 0x123   : > { %v1192_v28 = vmax.f32 %v1128_v7, 0.0  ;;  %v1126_v16 = vadd.f32 %v1080_v34, %v818_v15  ;;  %v1355_v55 = vsel %vm1312_vm1, %v1262_v40, 0.0  ;;  %v1260_v57 = vmul.f32 %v8226_v36, %v1189_v24 }
 0x124   : > { %v7217_v29 = vpop.f32.mrf.mxu0 }
 0x125   : > { %v1190_v39 = vmax.f32 %v1126_v16, 0.0  ;;  %v1131_v38 = vadd.f32 %v7217_v29, %v1084_v1  ;;  %v1263_v42 = vmul.f32 %v8226_v36, %v1192_v28  ;;  %v1349_v15 = vsel %vm1312_vm1, %v1260_v57, 0.0 }
 0x126   : > { %1347 = vadd.xlane.f32.xlu0 %v1346_v31  ;;  %v831_v46 = vpop.f32.mrf.mxu0 }
 0x127   : > { %v1358_v47 = vsel %vm1312_vm1, %v1263_v42, 0.0  ;;  %v1261_v48 = vmul.f32 %v8226_v36, %v1190_v39  ;;  %v1129_v49 = vadd.f32 %v1084_v1, %v831_v46  ;;  %v1195_v34 = vmax.f32 %v1131_v38, 0.0 }
 0x128   : > { %1359 = vadd.xlane.f32.xlu1 %v1358_v47  ;;  %v7218_v54 = vpop.f32.mrf.mxu0  ;;  %v1071_v39 = vcombine.high %v8232_v63, %v8232_v63 }
 0x129   : > { %v1352_v2 = vsel %vm1312_vm1, %v1261_v48, 0.0  ;;  %v1193_v5 = vmax.f32 %v1129_v49, 0.0  ;;  %v1132_v7 = vadd.f32 %v7218_v54, %v1084_v1  ;;  %v1266_v28 = vmul.f32 %v8226_v36, %v1195_v34 }
 0x12a   : > { %1356 = vadd.xlane.f32.xlu0 %v1355_v55  ;;  %v834_v58 = vpop.f32.mrf.mxu0  ;;  %v1088_v55 = vrot.slane %v1071_v39, %v8028_v18 }
 0x12b   : > { %v1130_v61 = vadd.f32 %v1084_v1, %v834_v58  ;;  %v1196_v31 = vmax.f32 %v1132_v7, 0.0  ;;  %v1264_v38 = vmul.f32 %v8226_v36, %v1193_v5  ;;  %v1367_v46 = vsel %vm1312_vm1, %v1266_v28, 0.0 }
 0x12c   : > { %1353 = vadd.xlane.f32.xlu1 %v1352_v2  ;;  %v7221_v26 = vpop.f32.mrf.mxu0  ;;  %v7804_v7 = vmov 0  }
 0x12d   : > { %v1194_v14 = vmax.f32 %v1130_v61, 0.0  ;;  %v1135_v42 = vadd.f32 %v7221_v26, %v1084_v1  ;;  %v1361_v57 = vsel %vm1312_vm1, %v1264_v38, 0.0  ;;  %v1267_v63 = vmul.f32 %v8226_v36, %v1196_v31  ;;  %7531 = vset.pattern.permute.xlu1 %v7804_v7  ;;  %7532 = vset.pattern.permute.xlu0 %v7804_v7 }
 0x12e   : > { %1350 = vadd.xlane.f32.xlu0 %v1349_v15  ;;  %v847_v16 = vpop.f32.mrf.mxu0 }
 0x12f   : > { %v1265_v29 = vmul.f32 %v8226_v36, %v1194_v14  ;;  %v1199_v58 = vmax.f32 %v1135_v42, 0.0  ;;  %v1133_v61 = vadd.f32 %v1084_v1, %v847_v16  ;;  %v1370_v31 = vsel %vm1312_vm1, %v1267_v63, 0.0 }
 0x130   : > { %v7222_v24 = vpop.f32.mrf.mxu0 }
 0x131   : > { %v1136_v40 = vadd.f32 %v7222_v24, %v1084_v1  ;;  %v1364_v47 = vsel %vm1312_vm1, %v1265_v29, 0.0  ;;  %v1197_v16 = vmax.f32 %v1133_v61, 0.0  ;;  %v1270_v42 = vmul.f32 %v8226_v36, %v1199_v58 }
 0x132   : > { %1368 = vadd.xlane.f32.xlu0 %v1367_v46  ;;  %1365 = vadd.xlane.f32.xlu1 %v1364_v47  ;;  %v850_v48 = vpop.f32.mrf.mxu0 }
 0x133   : > { %v1200_v49 = vmax.f32 %v1136_v40, 0.0  ;;  %v1134_v54 = vadd.f32 %v1084_v1, %v850_v48  ;;  %v1024_v1 = vcombine.high %v8214_v21, %v8214_v21  ;;  %v1379_v21 = vsel %vm1312_vm1, %v1270_v42, 0.0 }
 0x134   : > { %v7225_v34 = vpop.f32.mrf.mxu0  ;;  %v1268_v63 = vmul.f32 %v8226_v36, %v1197_v16 }
 0x135   : > { %v1198_v2 = vmax.f32 %v1134_v54, 0.0  ;;  %v1271_v5 = vmul.f32 %v8226_v36, %v1200_v49  ;;  %v1139_v29 = vadd.f32 %v7225_v34, %v1088_v55  ;;  %v8288_v34 = vrot.slane %v1024_v1, %v8212_v20 }
 0x136   : > { %1362 = vadd.xlane.f32.xlu0 %v1361_v57  ;;  %v863_v26 = vpop.f32.mrf.mxu0 }
 0x137   : > { %v1137_v14 = vadd.f32 %v1088_v55, %v863_v26  ;;  %v1382_v15 = vsel %vm1312_vm1, %v1271_v5, 0.0  ;;  %v1269_v28 = vmul.f32 %v8226_v36, %v1198_v2  ;;  %v1203_v49 = vmax.f32 %v1139_v29, 0.0 }
 0x138   : > { %1383 = vadd.xlane.f32.xlu1 %v1382_v15  ;;  %v7226_v24 = vpop.f32.mrf.mxu0  ;;  %v8296_v7 = vrot.slane %v8288_v34, %v8212_v20  ;;  %v1373_v29 = vsel %vm1312_vm1, %v1268_v63, 0.0  ;;  %v1040_v59 = vcombine.high %v8288_v34, %v8288_v34 }
 0x139   : > { %v1201_v39 = vmax.f32 %v1137_v14, 0.0  ;;  %v1140_v38 = vadd.f32 %v7226_v24, %v1088_v55  ;;  %v1376_v47 = vsel %vm1312_vm1, %v1269_v28, 0.0  ;;  %v1274_v26 = vmul.f32 %v8226_v36, %v1203_v49  ;;  %v8310_v49 = vpop.permute.xlu0 %1534 }
 0x13a   : > { %1371 = vadd.xlane.f32.xlu0 %v1370_v31  ;;  %v866_v40 = vpop.f32.mrf.mxu0  ;;  %v8420_v0 = vrot.slane %v1040_v59, %v8212_v20 }
 0x13b   : > { %v1204_v46 = vmax.f32 %v1140_v38, 0.0  ;;  %v1272_v48 = vmul.f32 %v8226_v36, %v1201_v39  ;;  %v1138_v57 = vadd.f32 %v1088_v55, %v866_v40  ;;  %v8301_v39 = vpop.permute.xlu1 %1538  ;;  %v8305_v40 = vrot.slane %v8296_v7, %v8028_v18 }
 0x13c   : > { %1377 = vadd.xlane.f32.xlu1 %v1376_v47  ;;  %v7229_v54 = vpop.f32.mrf.mxu0  ;;  %v580_v47 = vld [vmem:[%s7982_s28 + $0x1c0] sm:$0xff] }
 0x13d   : > { %v1385_v61 = vsel %vm1312_vm1, %v1272_v48, 0.0  ;;  %v1275_v2 = vmul.f32 %v8226_v36, %v1204_v46  ;;  %v1202_v14 = vmax.f32 %v1138_v57, 0.0  ;;  %v1143_v15 = vadd.f32 %v7229_v54, %v1088_v55  ;;  %v581_v48 = vld [vmem:[%s7982_s28 + $0x1c8] sm:$0xff] }
 0x13e   : > { %1380 = vadd.xlane.f32.xlu0 %v1379_v21  ;;  %v879_v58 = vpop.f32.mrf.mxu0  ;;  %v1391_v46 = vsel %vm1312_vm1, %v1274_v26, 0.0 }
 0x13f   : > { %v1394_v16 = vsel %vm1312_vm1, %v1275_v2, 0.0  ;;  %v1141_v38 = vadd.f32 %v1088_v55, %v879_v58  ;;  %v1207_v54 = vmax.f32 %v1143_v15, 0.0  ;;  %v1273_v63 = vmul.f32 %v8226_v36, %v1202_v14 }
 0x140   : > { %1386 = vadd.xlane.f32.xlu1 %v1385_v61  ;;  %v7230_v5 = vpop.f32.mrf.mxu0  ;;  %v582_v61 = vld [vmem:[%s7982_s28 + $0x1d0] sm:$0xff]  ;;  %v8316_v2 = vpack.c.bf16 %v581_v48, %v580_v47  ;;  %v8333_v47 = vpop.permute.xlu0 %1556 }
 0x141   : > { %v1144_v28 = vadd.f32 %v7230_v5, %v1088_v55  ;;  %v1205_v15 = vmax.f32 %v1141_v38, 0.0  ;;  %v8331_v38 = vpop.permute.xlu1 %1545 }
 0x142   : > { %1374 = vadd.xlane.f32.xlu0 %v1373_v29  ;;  %v882_v24 = vpop.f32.mrf.mxu0  ;;  %10613 = vst [vmem:[#allocation43_spill] sm:$0xff] %v8316_v2  ;;  %7255 = vmatprep.mubr.msk.bf16.mxu0 %vm636_vm0, %v8316_v2 }
 0x143   : > { %v1208_v31 = vmax.f32 %v1144_v28, 0.0  ;;  %v1142_v1 = vadd.f32 %v1088_v55, %v882_v24  ;;  %v583_v55 = vld [vmem:[%s7982_s28 + $0x1d8] sm:$0xff] }
 0x144   : > { %1395 = vadd.xlane.f32.xlu1 %v1394_v16  ;;  %v7233_v42 = vpop.f32.mrf.mxu0  ;;  %v8318_v5 = vpack.c.bf16 %v583_v55, %v582_v61  ;;  %v1388_v16 = vsel %vm1312_vm1, %v1273_v63, 0.0  ;;  %v585_v55 = vld [vmem:[%s7982_s28 + $0x1e8] sm:$0xff] }
 0x145   : > { %v1206_v57 = vmax.f32 %v1142_v1, 0.0  ;;  %v1279_v21 = vmul.f32 %v8226_v36, %v1208_v31  ;;  %v1147_v24 = vadd.f32 %v7233_v42, %v8305_v40 }
 0x146   : > { %1392 = vadd.xlane.f32.xlu0 %v1391_v46  ;;  %v895_v58 = vpop.f32.mrf.mxu0  ;;  %10614 = vst [vmem:[#allocation44_spill] sm:$0xff] %v8318_v5  ;;  %v1278_v46 = vmul.f32 %v8226_v36, %v1207_v54  ;;  %7256 = vmatmul.mubr.msk.bf16.gmra.mxu0 %vm636_vm0, %v8318_v5  ;;  %v584_v54 = vld [vmem:[%s7982_s28 + $0x1e0] sm:$0xff] }
 0x147   : > { %v1145_v26 = vadd.f32 %v8305_v40, %v895_v58  ;;  %v1406_v28 = vsel %vm1312_vm1, %v1279_v21, 0.0  ;;  %v1277_v29 = vmul.f32 %v8226_v36, %v1206_v57  ;;  %v1211_v61 = vmax.f32 %v1147_v24, 0.0 }
 0x148   : > { %1407 = vadd.xlane.f32.xlu1 %v1406_v28  ;;  %v7234_v31 = vpop.f32.mrf.mxu0  ;;  %v1276_v28 = vmul.f32 %v8226_v36, %v1205_v15 }
 0x149   : > { %v1209_v14 = vmax.f32 %v1145_v26, 0.0  ;;  %v1148_v1 = vadd.f32 %v7234_v31, %v8305_v40  ;;  %v1400_v57 = vsel %vm1312_vm1, %v1277_v29, 0.0  ;;  %v1403_v26 = vsel %vm1312_vm1, %v1278_v46, 0.0  ;;  %v586_v31 = vld [vmem:[%s7982_s28 + $0x1f0] sm:$0xff] }
 0x14a   : > { %1389 = vadd.xlane.f32.xlu0 %v1388_v16  ;;  %v898_v42 = vpop.f32.mrf.mxu0  ;;  %v587_v16 = vld [vmem:[%s7982_s28 + $0x1f8] sm:$0xff]  ;;  %v1282_v15 = vmul.f32 %v8226_v36, %v1211_v61  ;;  %s10390_s28 = scalar_lea.vmem [#allocation5], %s7978_s21 }
 0x14b   : > { %v1212_v48 = vmax.f32 %v1148_v1, 0.0  ;;  %v1280_v21 = vmul.f32 %v8226_v36, %v1209_v14  ;;  %v1146_v58 = vadd.f32 %v8305_v40, %v898_v42  ;;  %v8344_v1 = vpack.c.bf16 %v585_v55, %v584_v54  ;;  %s6864_s20 = sshll.u32 %s10390_s28, 4  ;;  %s6865_s20 = int_to_ptr.vmem [resolvable:$true] %s6864_s20 }
 0x14c   : > { %1401 = vadd.xlane.f32.xlu1 %v1400_v57  ;;  %v7237_v63 = vpop.f32.mrf.mxu0  ;;  %v8346_v29 = vpack.c.bf16 %v587_v16, %v586_v31  ;;  %v8350_v57 = vpop.permute.xlu1 %1549 }
 0x14d   : > { %10615 = vst [vmem:[#allocation45_spill] sm:$0xff] %v8344_v1  ;;  %v1409_v24 = vsel %vm1312_vm1, %v1280_v21, 0.0  ;;  %v1283_v14 = vmul.f32 %v8226_v36, %v1212_v48  ;;  %v1151_v42 = vadd.f32 %v7237_v63, %v8305_v40  ;;  %7259 = vmatprep.mubr.msk.bf16.mxu0 %vm636_vm0, %v8344_v1  ;;  %v1210_v54 = vmax.f32 %v1146_v58, 0.0 }
 0x14e   : > { %1404 = vadd.xlane.f32.xlu0 %v1403_v26  ;;  %v911_v10 = vpop.f32.mrf.mxu0  ;;  %10616 = vst [vmem:[#allocation46_spill] sm:$0xff] %v8346_v29  ;;  %v8356_v26 = vpop.permute.xlu0 %1567  ;;  %v1397_v21 = vsel %vm1312_vm1, %v1276_v28, 0.0  ;;  %7260 = vmatmul.mubr.msk.bf16.gmra.mxu0 %vm636_vm0, %v8346_v29 }
 0x14f   : > { %v1418_v61 = vsel %vm1312_vm1, %v1283_v14, 0.0  ;;  %v1215_v16 = vmax.f32 %v1151_v42, 0.0  ;;  %v1149_v58 = vadd.f32 %v8305_v40, %v911_v10  ;;  %v1281_v28 = vmul.f32 %v8226_v36, %v1210_v54 }
 0x150   : > { %1410 = vadd.xlane.f32.xlu1 %v1409_v24  ;;  %v7238_v46 = vpop.f32.mrf.mxu0  ;;  %v1415_v24 = vsel %vm1312_vm1, %v1282_v15, 0.0  ;;  %v8368_v5 = vpop.permute.xlu1 %1560 }
 0x151   : > { %v1152_v55 = vadd.f32 %v7238_v46, %v8305_v40  ;;  %v1213_v42 = vmax.f32 %v1149_v58, 0.0  ;;  %v1412_v15 = vsel %vm1312_vm1, %v1281_v28, 0.0  ;;  %v1286_v10 = vmul.f32 %v8226_v36, %v1215_v16 }
 0x152   : > { %1398 = vadd.xlane.f32.xlu0 %v1397_v21  ;;  %v914_v48 = vpop.f32.mrf.mxu0  ;;  %v8370_v21 = vpop.permute.xlu0 %1578 }
 0x153   : > { %v1216_v63 = vmax.f32 %v1152_v55, 0.0  ;;  %v1150_v31 = vadd.f32 %v8305_v40, %v914_v48 }
 0x154   : > { %1419 = vadd.xlane.f32.xlu1 %v1418_v61  ;;  %v8377_v54 = vpop.permute.xlu1 %1571  ;;  %v7241_v29 = vpop.f32.mrf.mxu0 }
 0x155   : > { %v1214_v1 = vmax.f32 %v1150_v31, 0.0  ;;  %v1287_v46 = vmul.f32 %v8226_v36, %v1216_v63  ;;  %v1427_v63 = vsel %vm1312_vm1, %v1286_v10, 0.0  ;;  %v1284_v31 = vmul.f32 %v8226_v36, %v1213_v42 }
 0x156   : > { %1416 = vadd.xlane.f32.xlu0 %v1415_v24  ;;  %v8379_v48 = vpop.permute.xlu0 %1600  ;;  %v1509_v24 = vld [vmem:[%s8023_s16 + $0x8] sm:$0x3]  ;;  %v927_v3 = vpop.f32.mrf.mxu0 }
 0x157   : > { %v1430_v55 = vsel %vm1312_vm1, %v1287_v46, 0.0  ;;  %v1285_v14 = vmul.f32 %v8226_v36, %v1214_v1  ;;  %v1421_v1 = vsel %vm1312_vm1, %v1284_v31, 0.0  ;;  %v1517_v58 = vunpack.c.l.bf16 %v1509_v24 }
 0x158   : > { %1431 = vadd.xlane.f32.xlu1 %v1430_v55  ;;  %v8384_v61 = vpop.permute.xlu1 %1582 }
 0x159   : > { %v1424_v40 = vsel %vm1312_vm1, %v1285_v14, 0.0  ;;  %v1708_v55 = vrot.slane %v1517_v58, %v8028_v18  ;;  %v1719_v14 = vrot.slane %v1517_v58, %v8034_v22  ;;  %v1730_v10 = vrot.slane %v1517_v58, %v8043_v27 }
 0x15a   : > { %1413 = vadd.xlane.f32.xlu0 %v1412_v15  ;;  %v8387_v16 = vpop.permute.xlu0 %1611  ;;  %v1741_v31 = vrot.slane %v1517_v58, %v8053_v32 }
 0x15c   : > { %1425 = vadd.xlane.f32.xlu1 %v1424_v40  ;;  %v8389_v46 = vpop.permute.xlu1 %1589 }
 0x15e   : > { %1428 = vadd.xlane.f32.xlu0 %v1427_v63  ;;  %v8391_v28 = vpop.permute.xlu0 %1626 }
 0x160   : > { %v8395_v42 = vpop.permute.xlu1 %1593 }
 0x162   : > { %1422 = vadd.xlane.f32.xlu0 %v1421_v1  ;;  %v8397_v15 = vpop.permute.xlu0 %1637 }
 0x163   : > { %10617 = vst [vmem:[#allocation47_spill] sm:$0xff] %v8397_v15 }
 0x164   : > { %v8400_v40 = vpop.permute.xlu1 %1604 }
 0x166   : > { %v8402_v63 = vpop.permute.xlu0 %1648 }
 0x167   : > { %10618 = vst [vmem:[#allocation48_spill] sm:$0xff] %v8402_v63 }
 0x168   : > { %v8405_v1 = vpop.permute.xlu1 %1615 }
 0x16a   : > { %v8407_v24 = vpop.permute.xlu0 %1659 }
 0x16b   : > { %10619 = vst [vmem:[#allocation49_spill] sm:$0xff] %v8407_v24 }
 0x16c   : > { %v8409_v2 = vpop.permute.xlu1 %1622 }
 0x16d   : > { %1710 = vbcast.lane.b32.xlu1 %v1708_v55, 256 }
 0x16e   : > { %v8411_v8 = vpop.permute.xlu0 %1670 }
 0x16f   : > { %10620 = vst [vmem:[#allocation50_spill] sm:$0xff] %v8411_v8 }
 0x170   : > { %v8415_v52 = vpop.permute.xlu1 %1633 }
 0x171   : > { %1721 = vbcast.lane.b32.xlu1 %v1719_v14, 256 }
 0x172   : > { %v8417_v58 = vpop.permute.xlu0 %1681 }
 0x174   : > { %v8422_v45 = vpop.permute.xlu1 %1644 }
 0x175   : > { %1732 = vbcast.lane.b32.xlu1 %v1730_v10, 256 }
 0x176   : > { %v8426_v56 = vpop.permute.xlu0 %1692 }
 0x178   : > { %1714 = vbcast.lane.b32.xlu0 %v1708_v55, 264  ;;  %v7242_v55 = vpop.f32.mrf.mxu0  ;;  %v8428_v51 = vpop.permute.xlu1 %1655 }
 0x179   : > { %1743 = vbcast.lane.b32.xlu1 %v1741_v31, 256 }
 0x17a   : > { %v8430_v34 = vpop.permute.xlu0 %1703 }
 0x17c   : > { %1725 = vbcast.lane.b32.xlu0 %v1719_v14, 264  ;;  %v930_v14 = vpop.f32.mrf.mxu0  ;;  %v8434_v20 = vpop.permute.xlu1 %1666 }
 0x180   : > { %1736 = vbcast.lane.b32.xlu0 %v1730_v10, 264  ;;  %v1096_v10 = vrot.slane %v8420_v0, %v8028_v18 }
 0x182   : > { %v1155_v37 = vadd.f32 %v7241_v29, %v1096_v10  ;;  %v1153_v13 = vadd.f32 %v1096_v10, %v927_v3  ;;  %v1154_v50 = vadd.f32 %v1096_v10, %v930_v14 }
 0x184   : > { %1747 = vbcast.lane.b32.xlu0 %v1741_v31, 264  ;;  %v7245_v31 = vpop.f32.mrf.mxu0  ;;  %v1219_v44 = vmax.f32 %v1155_v37, 0.0  ;;  %v1217_v53 = vmax.f32 %v1153_v13, 0.0  ;;  %v1156_v37 = vadd.f32 %v7242_v55, %v1096_v10  ;;  %v1218_v3 = vmax.f32 %v1154_v50, 0.0 }
 0x185   : > { %v1159_v6 = vadd.f32 %v7245_v31, %v1096_v10 }
 0x186   : > { %v943_v25 = vpop.f32.mrf.mxu0  ;;  %v1290_v60 = vmul.f32 %v8226_v36, %v1219_v44  ;;  %v1288_v19 = vmul.f32 %v8226_v36, %v1217_v53  ;;  %v1220_v14 = vmax.f32 %v1156_v37, 0.0 }
 0x187   : > { %v1157_v23 = vadd.f32 %v1096_v10, %v943_v25  ;;  %v1223_v41 = vmax.f32 %v1159_v6, 0.0  ;;  %v8439_v25 = vpop.permute.xlu1 %1677 }
 0x188   : > { %v7246_v43 = vpop.f32.mrf.mxu0  ;;  %v1439_v33 = vsel %vm1312_vm1, %v1290_v60, 0.0  ;;  %v1433_v60 = vsel %vm1312_vm1, %v1288_v19, 0.0 }
 0x189   : > { %v1221_v62 = vmax.f32 %v1157_v23, 0.0  ;;  %v1294_v13 = vmul.f32 %v8226_v36, %v1223_v41  ;;  %v1160_v53 = vadd.f32 %v7246_v43, %v1096_v10  ;;  %v1291_v41 = vmul.f32 %v8226_v36, %v1220_v14 }
 0x18a   : > { %v946_v31 = vpop.f32.mrf.mxu0 }
 0x18b   : > { %v1292_v30 = vmul.f32 %v8226_v36, %v1221_v62  ;;  %v1158_v6 = vadd.f32 %v1096_v10, %v946_v31  ;;  %v1289_v62 = vmul.f32 %v8226_v36, %v1218_v3  ;;  %v1451_v50 = vsel %vm1312_vm1, %v1294_v13, 0.0 }
 0x18c   : > { %v1224_v31 = vmax.f32 %v1160_v53, 0.0  ;;  %v1442_v3 = vsel %vm1312_vm1, %v1291_v41, 0.0 }
 0x18d   : > { %v1445_v44 = vsel %vm1312_vm1, %v1292_v30, 0.0  ;;  %v1222_v17 = vmax.f32 %v1158_v6, 0.0  ;;  %v1436_v30 = vsel %vm1312_vm1, %v1289_v62, 0.0 }
 0x18e   : > { %v1295_v43 = vmul.f32 %v8226_v36, %v1224_v31 }
 0x190   : > { %v1454_v14 = vsel %vm1312_vm1, %v1295_v43, 0.0 }
 0x197   : > { %v8432_v59 = vpop.xlane.xlu0 %1314 }
 0x19b   : > { %v1318_v29 = vpop.xlane.xlu0 %1317 }
 0x19d   : > { %1440 = vadd.xlane.f32.xlu1 %v1439_v33  ;;  %v8446_v33 = vpop.permute.xlu1 %1688 }
 0x19e   : > { %10621 = vst [vmem:[#allocation51_spill] sm:$0xff] %v8446_v33 }
 0x19f   : > { %v1333_v23 = vpop.xlane.xlu0 %1332 }
 0x1a1   : > { %1446 = vadd.xlane.f32.xlu1 %v1445_v44  ;;  %v8451_v37 = vpop.permute.xlu1 %1699  ;;  %v1293_v44 = vmul.f32 %v8226_v36, %v1222_v17 }
 0x1a2   : > { %10622 = vst [vmem:[#allocation52_spill] sm:$0xff] %v8451_v37 }
 0x1a3   : > { %1434 = vadd.xlane.f32.xlu0 %v1433_v60  ;;  %v1327_v55 = vpop.xlane.xlu0 %1326  ;;  %v1448_v13 = vsel %vm1312_vm1, %v1293_v44, 0.0 }
 0x1a5   : > { %1452 = vadd.xlane.f32.xlu1 %v1451_v50  ;;  %v1321_v60 = vpop.xlane.xlu1 %1320 }
 0x1a6   : > { %v8461_v6 = vadd.f32 %v8331_v38, %v1321_v60  ;;  %v8477_v38 = vadd.f32 %v8356_v26, %v1333_v23  ;;  %v8482_v60 = vadd.f32 %v8333_v47, %v1327_v55 }
 0x1a7   : > { %1437 = vadd.xlane.f32.xlu0 %v1436_v30  ;;  %v1345_v19 = vpop.xlane.xlu0 %1344  ;;  %v8471_v30 = vadd.f32 %v8301_v39, %v1318_v29  ;;  %v8489_v39 = vadd.f32 %v8310_v49, %v8432_v59 }
 0x1a8   : > { %10623 = vst [vmem:[#allocation53_spill] sm:$0xff] %v8461_v6  ;;  %10626 = vst [vmem:[#allocation56_spill] sm:$0xff] %v8477_v38 }
 0x1a9   : > { %v1324_v62 = vpop.xlane.xlu1 %1323  ;;  %10625 = vst [vmem:[#allocation55_spill] sm:$0xff] %v8471_v30  ;;  %10627 = vst [vmem:[#allocation57_spill] sm:$0xff] %v8482_v60 }
 0x1aa   : > { %v8467_v17 = vadd.f32 %v8350_v57, %v1324_v62  ;;  %v1510_v57 = vld [vmem:[%s8023_s16 + $0xa] sm:$0x3]  ;;  %10628 = vst [vmem:[#allocation58_spill] sm:$0xff] %v8489_v39 }
 0x1ab   : > { %1443 = vadd.xlane.f32.xlu0 %v1442_v3  ;;  %v8457_v10 = vpop.xlane.xlu0 %1338 }
 0x1ac   : > { %10624 = vst [vmem:[#allocation54_spill] sm:$0xff] %v8467_v17 }
 0x1ad   : > { %v1336_v53 = vpop.xlane.xlu1 %1335 }
 0x1ae   : > { %v8492_v26 = vadd.f32 %v8377_v54, %v1336_v53  ;;  %v7249_v53 = vpop.f32.mrf.mxu0 }
 0x1af   : > { %1449 = vadd.xlane.f32.xlu0 %v1448_v13  ;;  %v8463_v50 = vpop.xlane.xlu0 %1347  ;;  %v1518_v13 = vunpack.c.l.bf16 %v1510_v57 }
 0x1b0   : > { %10629 = vst [vmem:[#allocation59_spill] sm:$0xff] %v8492_v26  ;;  %v959_v11 = vpop.f32.mrf.mxu0 }
 0x1b1   : > { %v1330_v31 = vpop.xlane.xlu1 %1329  ;;  %v1752_v23 = vrot.slane %v1518_v13, %v8028_v18  ;;  %v1774_v49 = vrot.slane %v1518_v13, %v8043_v27  ;;  %v1785_v62 = vrot.slane %v1518_v13, %v8053_v32  ;;  %v1763_v4 = vrot.slane %v1518_v13, %v8034_v22 }
 0x1b2   : > { %v8500_v47 = vadd.f32 %v8368_v5, %v1330_v31  ;;  %v8516_v5 = vadd.f32 %v8389_v46, %v1345_v19  ;;  %v1070_v46 = vcombine.high %v8296_v7, %v8296_v7 }
 0x1b3   : > { %1455 = vadd.xlane.f32.xlu0 %v1454_v14  ;;  %v8473_v41 = vpop.xlane.xlu0 %1356 }
 0x1b4   : > { %10630 = vst [vmem:[#allocation60_spill] sm:$0xff] %v8500_v47  ;;  %10632 = vst [vmem:[#allocation62_spill] sm:$0xff] %v8516_v5 }
 0x1b5   : > { %v1342_v3 = vpop.xlane.xlu1 %1341 }
 0x1b6   : > { %2080 = vperm.xlu1 %7531, %v8461_v6   ;;  %v8509_v54 = vadd.f32 %v8384_v61, %v1342_v3  ;;  %v7250_v3 = vpop.f32.mrf.mxu0 }
 0x1b7   : > { %v1351_v44 = vpop.xlane.xlu0 %1350 }
 0x1b8   : > { %10631 = vst [vmem:[#allocation61_spill] sm:$0xff] %v8509_v54  ;;  %v8524_v61 = vadd.f32 %v8379_v48, %v1351_v44  ;;  %v962_v19 = vpop.f32.mrf.mxu0  ;;  %v1100_v48 = vrot.slane %v1070_v46, %v8028_v18 }
 0x1b9   : > { %v8484_v43 = vpop.xlane.xlu1 %1359 }
 0x1ba   : > { %2083 = vperm.xlu1 %7531, %v8467_v17   ;;  %10634 = vst [vmem:[#allocation64_spill] sm:$0xff] %v8524_v61  ;;  %v7253_v44 = vpop.f32.mrf.mxu0  ;;  %v1163_v7 = vadd.f32 %v7249_v53, %v1100_v48 }
 0x1bb   : > { %v8494_v29 = vpop.xlane.xlu0 %1368 }
 0x1bc   : > { %v975_v6 = vpop.f32.mrf.mxu0  ;;  %v1227_v17 = vmax.f32 %v1163_v7, 0.0 }
 0x1bd   : > { %v8502_v55 = vpop.xlane.xlu1 %1353 }
 0x1be   : > { %2077 = vperm.xlu1 %7531, %v8471_v30   ;;  %v1164_v30 = vadd.f32 %v7250_v3, %v1100_v48 }
 0x1bf   : > { %v8505_v59 = vpop.xlane.xlu0 %1362 }
 0x1c0   : > { %v1228_v37 = vmax.f32 %v1164_v30, 0.0 }
 0x1c1   : > { %v8511_v14 = vpop.xlane.xlu1 %1365 }
 0x1c2   : > { %2092 = vperm.xlu1 %7531, %v8477_v38  }
 0x1c3   : > { %v8520_v57 = vpop.xlane.xlu0 %1371 }
 0x1c5   : > { %v8518_v31 = vpop.xlane.xlu1 %1383 }
 0x1c6   : > { %2086 = vperm.xlu1 %7531, %v8482_v60   ;;  %10633 = vst [vmem:[#allocation63_spill] sm:$0xff] %v8518_v31  ;;  %v1161_v60 = vadd.f32 %v1100_v48, %v959_v11 }
 0x1c7   : > { %v8528_v35 = vpop.xlane.xlu0 %1380 }
 0x1c9   : > { %2074 = vperm.xlu0 %7532, %v8489_v39   ;;  %v8526_v9 = vpop.xlane.xlu1 %1377  ;;  %v1298_v39 = vmul.f32 %v8226_v36, %v1227_v17 }
 0x1ca   : > { %2095 = vperm.xlu1 %7531, %v8492_v26   ;;  %10635 = vst [vmem:[#allocation65_spill] sm:$0xff] %v8526_v9  ;;  %v1225_v26 = vmax.f32 %v1161_v60, 0.0 }
 0x1cb   : > { %v8536_v38 = vpop.xlane.xlu0 %1374  ;;  %v1463_v7 = vsel %vm1312_vm1, %v1298_v39, 0.0 }
 0x1cc   : > { %v1296_v46 = vmul.f32 %v8226_v36, %v1225_v26 }
 0x1cd   : > { %1758 = vbcast.lane.b32.xlu0 %v1752_v23, 264 }
 0x1ce   : > { %2089 = vperm.xlu1 %7531, %v8500_v47   ;;  %v1457_v33 = vsel %vm1312_vm1, %v1296_v46, 0.0 }
 0x1d1   : > { %1776 = vbcast.lane.b32.xlu0 %v1774_v49, 256 }
 0x1d2   : > { %2101 = vperm.xlu1 %7531, %v8509_v54   ;;  %v8534_v54 = vpop.xlane.xlu1 %1386 }
 0x1d5   : > { %1787 = vbcast.lane.b32.xlu0 %v1785_v62, 256 }
 0x1d6   : > { %2104 = vperm.xlu1 %7531, %v8516_v5   ;;  %v8539_v5 = vpop.xlane.xlu1 %1395 }
 0x1da   : > { %2110 = vperm.xlu1 %7531, %v8524_v61   ;;  %v8541_v61 = vpop.xlane.xlu0 %1392  ;;  %v8543_v13 = vpop.xlane.xlu1 %1407 }
 0x1de   : > { %1754 = vbcast.lane.b32.xlu1 %v1752_v23, 256  ;;  %v7254_v23 = vpop.f32.mrf.mxu0  ;;  %v8545_v47 = vpop.xlane.xlu0 %1389 }
 0x1df   : > { %10636 = vst [vmem:[#allocation66_spill] sm:$0xff] %v8545_v47  ;;  %v8550_v53 = vpop.xlane.xlu1 %1401  ;;  %v1168_v8 = vadd.f32 %v7254_v23, %v1100_v48 }
 0x1e0   : > { %v978_v11 = vpop.f32.mrf.mxu0 }
 0x1e1   : > { %v1232_v17 = vmax.f32 %v1168_v8, 0.0 }
 0x1e2   : > { %1765 = vbcast.lane.b32.xlu1 %v1763_v4, 256  ;;  %v8552_v60 = vpop.xlane.xlu0 %1404 }
 0x1e3   : > { %10637 = vst [vmem:[#allocation67_spill] sm:$0xff] %v8552_v60  ;;  %v8556_v3 = vpop.xlane.xlu1 %1410 }
 0x1e6   : > { %1769 = vbcast.lane.b32.xlu1 %v1763_v4, 264  ;;  %v1166_v4 = vadd.f32 %v1100_v48, %v978_v11  ;;  %v1303_v11 = vmul.f32 %v8226_v36, %v1232_v17 }
 0x1e8   : > { %v1230_v26 = vmax.f32 %v1166_v4, 0.0  ;;  %v1478_v39 = vsel %vm1312_vm1, %v1303_v11, 0.0  ;;  %v1162_v4 = vadd.f32 %v1100_v48, %v962_v19 }
 0x1ea   : > { %1780 = vbcast.lane.b32.xlu1 %v1774_v49, 264  ;;  %v1299_v49 = vmul.f32 %v8226_v36, %v1228_v37  ;;  %v1301_v30 = vmul.f32 %v8226_v36, %v1230_v26  ;;  %v8564_v37 = vpop.xlane.xlu1 %1419  ;;  %v1165_v26 = vadd.f32 %v1100_v48, %v975_v6 }
 0x1eb   : > { %10639 = vst [vmem:[#allocation69_spill] sm:$0xff] %v8564_v37 }
 0x1ec   : > { %v1466_v46 = vsel %vm1312_vm1, %v1299_v49, 0.0  ;;  %v1072_v49 = vcombine.high %v8420_v0, %v8420_v0 }
 0x1ee   : > { %1791 = vbcast.lane.b32.xlu1 %v1785_v62, 264  ;;  %v8558_v62 = vpop.xlane.xlu0 %1398  ;;  %v8569_v60 = vpop.xlane.xlu1 %1431  ;;  %v8576_v17 = vrot.slane %v1072_v49, %v8028_v18 }
 0x1ef   : > { %10638 = vst [vmem:[#allocation68_spill] sm:$0xff] %v8558_v62  ;;  %10640 = vst [vmem:[#allocation70_spill] sm:$0xff] %v8569_v60  ;;  %v1167_v60 = vadd.f32 %v7253_v44, %v1100_v48 }
 0x1f1   : > { %v1231_v6 = vmax.f32 %v1167_v60, 0.0 }
 0x1f2   : > { %v8566_v23 = vpop.xlane.xlu0 %1416 }
 0x1f3   : > { %v1302_v44 = vmul.f32 %v8226_v36, %v1231_v6 }
 0x1f4   : > { %1458 = vadd.xlane.f32.xlu0 %v1457_v33  ;;  %v1472_v33 = vsel %vm1312_vm1, %v1301_v30, 0.0 }
 0x1f6   : > { %v8571_v8 = vpop.xlane.xlu0 %1413 }
 0x1f7   : > { %10641 = vst [vmem:[#allocation71_spill] sm:$0xff] %v8571_v8 }
 0x1f8   : > { %1464 = vadd.xlane.f32.xlu0 %v1463_v7  ;;  %v1226_v7 = vmax.f32 %v1162_v4, 0.0 }
 0x1fa   : > { %v1297_v11 = vmul.f32 %v8226_v36, %v1226_v7 }
 0x1fc   : > { %1467 = vadd.xlane.f32.xlu0 %v1466_v46  ;;  %v8578_v46 = vpop.xlane.xlu1 %1425  ;;  %v1460_v49 = vsel %vm1312_vm1, %v1297_v11, 0.0 }
 0x1fd   : > { %10642 = vst [vmem:[#allocation72_spill] sm:$0xff] %v8578_v46 }
 0x200   : > { %1473 = vadd.xlane.f32.xlu0 %v1472_v33  ;;  %v8580_v33 = vpop.xlane.xlu0 %1428  ;;  %v8592_v46 = vpop.permute.xlu1 %1710 }
 0x204   : > { %1479 = vadd.xlane.f32.xlu0 %v1478_v39  ;;  %v1229_v39 = vmax.f32 %v1165_v26, 0.0  ;;  %v8594_v62 = vpop.xlane.xlu0 %1422 }
 0x206   : > { %v7257_v30 = vpop.f32.mrf.mxu0  ;;  %v1300_v4 = vmul.f32 %v8226_v36, %v1229_v39  ;;  %v8607_v39 = vpop.permute.xlu1 %1721  ;;  %v8619_v36 = vadd.f32 %v8395_v42, %v8463_v50  ;;  %v8638_v42 = vadd.f32 %v8405_v1, %v8484_v43 }
 0x207   : > { %v8583_v19 = vadd.f32 %v7257_v30, %v8576_v17 }
 0x208   : > { %v8586_v37 = vpop.f32.mrf.mxu0  ;;  %v1469_v60 = vsel %vm1312_vm1, %v1300_v4, 0.0  ;;  %v8609_v47 = vpop.permute.xlu0 %1714  ;;  %10645 = vst [vmem:[#allocation75_spill] sm:$0xff] %v8619_v36  ;;  %10649 = vst [vmem:[#allocation79_spill] sm:$0xff] %v8638_v42 }
 0x209   : > { %10643 = vst [vmem:[#allocation73_spill] sm:$0xff] %v8609_v47 }
 0x20a   : > { %v8588_v0 = vpop.f32.mrf.mxu0  ;;  %v8621_v6 = vpop.permute.xlu1 %1732 }
 0x20c   : > { %v994_v8 = vpop.f32.mrf.mxu0  ;;  %v8623_v4 = vpop.permute.xlu0 %1725 }
 0x20d   : > { %v8597_v30 = vadd.f32 %v8576_v17, %v994_v8  ;;  %v1475_v8 = vsel %vm1312_vm1, %v1302_v44, 0.0  ;;  %10646 = vst [vmem:[#allocation76_spill] sm:$0xff] %v8623_v4  ;;  %v8629_v44 = vadd.f32 %v8400_v40, %v8502_v55 }
 0x20e   : > { %v7261_v7 = vpop.f32.mrf.mxu0 }
 0x20f   : > { %v8600_v48 = vadd.f32 %v7261_v7, %v8576_v17  ;;  %v1511_v7 = vld [vmem:[%s8023_s16 + $0xc] sm:$0x3]  ;;  %10647 = vst [vmem:[#allocation77_spill] sm:$0xff] %v8629_v44 }
 0x210   : > { %v1007_v26 = vpop.f32.mrf.mxu0 }
 0x211   : > { %v8605_v11 = vadd.f32 %v8576_v17, %v1007_v26 }
 0x212   : > { %1461 = vadd.xlane.f32.xlu1 %v1460_v49  ;;  %v8614_v49 = vadd.f32 %v8370_v21, %v8457_v10  ;;  %v8631_v21 = vpop.permute.xlu1 %1743  ;;  %v8633_v10 = vpop.permute.xlu0 %1736 }
 0x213   : > { %10648 = vst [vmem:[#allocation78_spill] sm:$0xff] %v8633_v10  ;;  %v10658_v10 = vlaneseq }
 0x214   : > { %10644 = vst [vmem:[#allocation74_spill] sm:$0xff] %v8614_v49 }
 0x216   : > { %1470 = vadd.xlane.f32.xlu1 %v1469_v60  ;;  %v1519_v60 = vunpack.c.l.bf16 %v1511_v7 }
 0x218   : > { %v1796_v26 = vrot.slane %v1519_v60, %v8028_v18  ;;  %v1807_v55 = vrot.slane %v1519_v60, %v8034_v22  ;;  %v1818_v1 = vrot.slane %v1519_v60, %v8043_v27 }
 0x21a   : > { %2098 = vperm.xlu0 %7532, %v8614_v49   ;;  %1476 = vadd.xlane.f32.xlu1 %v1475_v8  ;;  %v8644_v8 = vpop.permute.xlu0 %1747 }
 0x21b   : > { %10651 = vst [vmem:[#allocation81_spill] sm:$0xff] %v8644_v8 }
 0x21e   : > { %2107 = vperm.xlu0 %7532, %v8619_v36  }
 0x222   : > { %2113 = vperm.xlu0 %7532, %v8629_v44  }
 0x226   : > { %v8640_v50 = vpop.xlane.xlu1 %1440  ;;  %2119 = vperm.xlu0 %7532, %v8638_v42   ;;  %v1829_v42 = vrot.slane %v1519_v60, %v8053_v32 }
 0x227   : > { %10650 = vst [vmem:[#allocation80_spill] sm:$0xff] %v8640_v50 }
 0x22a   : > { %v8646_v40 = vpop.xlane.xlu1 %1446  ;;  %1798 = vbcast.lane.b32.xlu0 %v1796_v26, 256 }
 0x22b   : > { %10652 = vst [vmem:[#allocation82_spill] sm:$0xff] %v8646_v40 }
 0x22c   : > { %v8649_v36 = vpop.xlane.xlu0 %1434 }
 0x22d   : > { %10653 = vst [vmem:[#allocation83_spill] sm:$0xff] %v8649_v36  ;;  %v2266_v36 = vand.u32 127, %v10658_v10 }
 0x22e   : > { %v8651_v7 = vpop.xlane.xlu1 %1452  ;;  %1809 = vbcast.lane.b32.xlu0 %v1807_v55, 256 }
 0x22f   : > { %10654 = vst [vmem:[#allocation84_spill] sm:$0xff] %v8651_v7  ;;  %v2271_v7 = vadd.s32 4294967288, %v2266_v36 }
 0x230   : > { %v8654_v43 = vpop.xlane.xlu0 %1437 }
 0x231   : > { %10655 = vst [vmem:[#allocation85_spill] sm:$0xff] %v8654_v43  ;;  %v8665_v43 = vsub.s32 %v2266_v36, %v8012_v12  ;;  %v8668_v31 = vsub.s32 %v2271_v7, %v8012_v12 }
 0x232   : > { %v2081_v44 = vpop.permute.xlu1 %2080  ;;  %1820 = vbcast.lane.b32.xlu0 %v1818_v1, 256 }
 0x233   : > { %v2281_v10 = vrot.slane %v2081_v44, %v8665_v43 }
 0x234   : > { %v8657_v49 = vpop.xlane.xlu0 %1443 }
 0x235   : > { %10656 = vst [vmem:[#allocation86_spill] sm:$0xff] %v8657_v49 }
 0x236   : > { %v2084_v50 = vpop.permute.xlu1 %2083  ;;  %1831 = vbcast.lane.b32.xlu0 %v1829_v42, 256 }
 0x238   : > { %v8659_v40 = vpop.xlane.xlu0 %1449 }
 0x239   : > { %10657 = vst [vmem:[#allocation87_spill] sm:$0xff] %v8659_v40  ;;  %v2285_v40 = vrot.slane %v2084_v50, %v8668_v31 }
 0x23a   : > { %v2078_v8 = vpop.permute.xlu1 %2077 }
 0x23b   : > { %v2275_v9 = vrot.slane %v2078_v8, %v8668_v31 }
 0x23c   : > { %v8662_v47 = vpop.xlane.xlu0 %1455 }
 0x23d   : > { %10659 = vst [vmem:[#allocation88_spill] sm:$0xff] %v8662_v47 }
 0x23e   : > { %v2093_v4 = vpop.permute.xlu1 %2092 }
 0x23f   : > { %v2299_v50 = vrot.slane %v2093_v4, %v8665_v43  ;;  %v1172_v4 = vadd.f32 %v8588_v0, %v8576_v17 }
 0x242   : > { %v2087_v24 = vpop.permute.xlu1 %2086 }
 0x243   : > { %v2290_v7 = vrot.slane %v2087_v24, %v8665_v43 }
 0x244   : > { %v2075_v60 = vpop.permute.xlu0 %2074 }
 0x245   : > { %v2270_v49 = vrot.slane %v2075_v60, %v8665_v43  ;;  %v2286_v60 = vsel %vm2276_vm2, %v2285_v40, %v2281_v10  ;;  %v8688_v40 = vadd.f32 %v8387_v16, %v8473_v41  ;;  %v8698_v16 = vld [vmem:[%s10449_s7] ss:$0 sm:$0xff] }
 0x246   : > { %v2096_v63 = vpop.permute.xlu1 %2095 }
 0x247   : > { %v2277_v47 = vsel %vm2276_vm2, %v2275_v9, %v2270_v49  ;;  %v2303_v15 = vrot.slane %v2096_v63, %v8668_v31 }
 0x248   : > { %v2558_v44 = vsel %vm2557_vm3, %v2286_v60, %v2277_v47 }
 0x249   : > { %v2304_v9 = vsel %vm2276_vm2, %v2303_v15, %v2299_v50  ;;  %v7262_v15 = vpop.f32.mrf.mxu0 }
 0x24a   : > { %v2090_v36 = vpop.permute.xlu1 %2089 }
 0x24b   : > { %v2294_v12 = vrot.slane %v2090_v36, %v8668_v31  ;;  %v1010_v10 = vpop.f32.mrf.mxu0 }
 0x24d   : > { %v2295_v8 = vsel %vm2276_vm2, %v2294_v12, %v2290_v7  ;;  %v1169_v12 = vadd.f32 %v8576_v17, %v8586_v37  ;;  %v1176_v37 = vadd.f32 %v7262_v15, %v8576_v17 }
 0x24e   : > { %v2560_v63 = vsel %vm2559_vm4, %v2295_v8, %v2558_v44  ;;  %v8709_v44 = vpop.permute.xlu0 %1758 }
 0x24f   : > { %v2562_v49 = vsel %vm2561_vm5, %v2304_v9, %v2560_v63  ;;  %v1233_v47 = vmax.f32 %v1169_v12, 0.0  ;;  %v1240_v0 = vmax.f32 %v1176_v37, 0.0  ;;  %v8711_v9 = vpop.permute.xlu1 %2101 }
 0x250   : > { %v2593_v24 = vsel %vm2592_vm6, %v2562_v49, -inf }
 0x251   : > { %2594 = vmax.xlane.f32.xlu1 %v2593_v24  ;;  %v1304_v41 = vmul.f32 %v8698_v16, %v1233_v47  ;;  %v1311_v50 = vmul.f32 %v8698_v16, %v1240_v0 }
 0x252   : > { %v8714_v63 = vpop.permute.xlu0 %1776 }
 0x253   : > { %v2105_v49 = vpop.permute.xlu1 %2104 }
 0x256   : > { %v8716_v24 = vpop.permute.xlu0 %1787 }
 0x257   : > { %v2111_v12 = vpop.permute.xlu1 %2110 }
 0x25b   : > { %v8720_v47 = vpop.permute.xlu1 %1754 }
 0x262   : > { %2116 = vperm.xlu1 %7531, %v8688_v40  }
 0x266   : > { %1802 = vbcast.lane.b32.xlu1 %v1796_v26, 264  ;;  %v1236_v26 = vmax.f32 %v1172_v4, 0.0  ;;  %v8724_v4 = vadd.f32 %v8391_v28, %v8511_v14  ;;  %v8747_v14 = vadd.f32 %v8428_v51, %v8528_v35  ;;  %v8770_v51 = vadd.f32 %v8417_v58, %v8539_v5 }
 0x267   : > { %v8785_v58 = vadd.f32 %v8430_v34, %v8543_v13  ;;  %v2317_v34 = vrot.slane %v2105_v49, %v8665_v43 }
 0x268   : > { %10662 = vst [vmem:[#allocation91_spill] sm:$0xff] %v8770_v51 }
 0x269   : > { %10664 = vst [vmem:[#allocation93_spill] sm:$0xff] %v8785_v58 }
 0x26a   : > { %1813 = vbcast.lane.b32.xlu1 %v1807_v55, 264  ;;  %v1174_v55 = vadd.f32 %v8576_v17, %v1010_v10  ;;  %v1502_v17 = vsel %vm1312_vm1, %v1311_v50, 0.0 }
 0x26c   : > { %v1238_v36 = vmax.f32 %v1174_v55, 0.0 }
 0x26e   : > { %1824 = vbcast.lane.b32.xlu1 %v1818_v1, 264  ;;  %v1481_v1 = vsel %vm1312_vm1, %v1304_v41, 0.0  ;;  %v1309_v7 = vmul.f32 %v8698_v16, %v1238_v36  ;;  %v8729_v41 = vpop.permute.xlu1 %1765 }
 0x270   : > { %v1496_v8 = vsel %vm1312_vm1, %v1309_v7, 0.0 }
 0x272   : > { %1835 = vbcast.lane.b32.xlu1 %v1829_v42, 264  ;;  %v1307_v42 = vmul.f32 %v8698_v16, %v1236_v26  ;;  %v8733_v26 = vadd.f32 %v8415_v52, %v8494_v29  ;;  %v8742_v28 = vpop.permute.xlu1 %1769  ;;  %v8756_v29 = vadd.f32 %v8434_v20, %v8534_v54  ;;  %v1512_v20 = vld [vmem:[%s8023_s16 + $0xe] sm:$0x3]  ;;  %v8778_v54 = vadd.f32 %v8426_v56, %v8550_v53  ;;  %s7085_s16 = sshll.u32 %s7902_s25, 4 }
 0x273   : > { %s10404_s27 = scalar_lea.hbm %s10454_s12, %s7085_s16 }
 0x274   : > { %v1490_v60 = vsel %vm1312_vm1, %v1307_v42, 0.0  ;;  %v8740_v42 = vadd.f32 %v8422_v45, %v8536_v38  ;;  %10660 = vst [vmem:[#allocation89_spill] sm:$0xff] %v8756_v29  ;;  %v8763_v38 = vadd.f32 %v8439_v25, %v8541_v61  ;;  %10663 = vst [vmem:[#allocation92_spill] sm:$0xff] %v8778_v54  ;;  %v1520_v25 = vunpack.c.l.bf16 %v1512_v20 }
 0x276   : > { %v8752_v52 = vpop.permute.xlu1 %1780  ;;  %10661 = vst [vmem:[#allocation90_spill] sm:$0xff] %v8763_v38  ;;  %v8789_v5 = vrot.slane %v1520_v25, %v8028_v18  ;;  %v8795_v56 = vrot.slane %v1520_v25, %v8034_v22 }
 0x27a   : > { %v8765_v35 = vpop.permute.xlu1 %1791 }
 0x27d   : > { %v8718_v15 = vpop.xlane.xlu0 %1458 }
 0x281   : > { %v8726_v10 = vpop.xlane.xlu0 %1464 }
 0x285   : > { %v8736_v55 = vpop.xlane.xlu0 %1467 }
 0x289   : > { %v8749_v37 = vpop.xlane.xlu0 %1473 }
 0x28d   : > { %v8759_v45 = vpop.xlane.xlu0 %1479 }
 0x296   : > { %1482 = vadd.xlane.f32.xlu1 %v1481_v1  ;;  %v2099_v1 = vpop.permute.xlu0 %2098 }
 0x297   : > { %v2308_v13 = vrot.slane %v2099_v1, %v8665_v43 }
 0x29a   : > { %1491 = vadd.xlane.f32.xlu1 %v1490_v60  ;;  %v2108_v61 = vpop.permute.xlu0 %2107 }
 0x29b   : > { %v8772_v36 = vpop.xlane.xlu1 %1461  ;;  %v2321_v53 = vrot.slane %v2108_v61, %v8668_v31  ;;  %v1862_v61 = vrot.slane %v1520_v25, %v8043_v27 }
 0x29e   : > { %1497 = vadd.xlane.f32.xlu1 %v1496_v8  ;;  %v2114_v7 = vpop.permute.xlu0 %2113 }
 0x29f   : > { %v8781_v0 = vpop.xlane.xlu1 %1470  ;;  %v2330_v50 = vrot.slane %v2114_v7, %v8668_v31 }
 0x2a2   : > { %1503 = vadd.xlane.f32.xlu1 %v1502_v17  ;;  %v2326_v17 = vrot.slane %v2111_v12, %v8665_v43  ;;  %v2120_v20 = vpop.permute.xlu0 %2119 }
 0x2a3   : > { %v8791_v60 = vpop.xlane.xlu1 %1476  ;;  %v2339_v1 = vrot.slane %v2120_v20, %v8668_v31 }
 0x2a4   : > { %v2331_v7 = vsel %vm2276_vm2, %v2330_v50, %v2326_v17  ;;  %v1235_v17 = vmax.f32 %v8583_v19, 0.0  ;;  %v8832_v19 = vadd.f32 %v8607_v39, %v8566_v23  ;;  %v8847_v23 = vadd.f32 %v8631_v21, %v8580_v33  ;;  %v10669_v39 = vld [vmem:[#allocation47_spill] sm:$0xff]  ;;  %v10671_v33 = vld [vmem:[#allocation48_spill] sm:$0xff] }
 0x2a6   : > { %10666 = vst [vmem:[#allocation95_spill] sm:$0xff] %v8832_v19  ;;  %10668 = vst [vmem:[#allocation97_spill] sm:$0xff] %v8847_v23 }
 0x2b3   : > { %2125 = vperm.xlu1 %7531, %v8724_v4  }
 0x2b7   : > { %2128 = vperm.xlu1 %7531, %v8733_v26  }
 0x2bb   : > { %2134 = vperm.xlu1 %7531, %v8740_v42  }
 0x2bf   : > { %2140 = vperm.xlu1 %7531, %v8747_v14  }
 0x2c3   : > { %2146 = vperm.xlu1 %7531, %v8756_v29  }
 0x2c7   : > { %2152 = vperm.xlu1 %7531, %v8763_v38   ;;  %v1234_v38 = vmax.f32 %v8597_v30, 0.0 }
 0x2c9   : > { %v1305_v30 = vmul.f32 %v8698_v16, %v1234_v38  ;;  %v1239_v38 = vmax.f32 %v8600_v48, 0.0 }
 0x2cb   : > { %2155 = vperm.xlu1 %7531, %v8770_v51  }
 0x2cf   : > { %2161 = vperm.xlu1 %7531, %v8778_v54   ;;  %v2322_v54 = vsel %vm2276_vm2, %v2321_v53, %v2317_v34 }
 0x2d3   : > { %2167 = vperm.xlu1 %7531, %v8785_v58   ;;  %v2312_v58 = vrot.slane %v8711_v9, %v8668_v31  ;;  %v1873_v9 = vrot.slane %v1520_v25, %v8053_v32  ;;  %v1484_v25 = vsel %vm1312_vm1, %v1305_v30, 0.0 }
 0x2d5   : > { %v2313_v49 = vsel %vm2276_vm2, %v2312_v58, %v2308_v13 }
 0x2d6   : > { %v2563_v12 = vsel %vm2557_vm3, %v2322_v54, %v2313_v49  ;;  %v1306_v54 = vmul.f32 %v8698_v16, %v1235_v17  ;;  %v10673_v49 = vld [vmem:[#allocation49_spill] sm:$0xff]  ;;  %v10680_v17 = vld [vmem:[#allocation52_spill] sm:$0xff] }
 0x2d7   : > { %1846 = vbcast.lane.b32.xlu1 %v8789_v5, 264  ;;  %v2564_v34 = vsel %vm2559_vm4, %v2331_v7, %v2563_v12  ;;  %v10672_v7 = vld [vmem:[#allocation63_spill] sm:$0xff] }
 0x2da   : > { %v8799_v8 = vpop.xlane.xlu1 %2594 }
 0x2db   : > { %1853 = vbcast.lane.b32.xlu1 %v8795_v56, 256 }
 0x2de   : > { %v2117_v51 = vpop.permute.xlu1 %2116 }
 0x2df   : > { %v2335_v29 = vrot.slane %v2117_v51, %v8665_v43  ;;  %1864 = vbcast.lane.b32.xlu1 %v1862_v61, 256  ;;  %v8824_v51 = vadd.f32 %v8592_v46, %v8556_v3  ;;  %v1487_v3 = vsel %vm1312_vm1, %v1306_v54, 0.0  ;;  %v8840_v46 = vadd.f32 %v8621_v6, %v8594_v62 }
 0x2e0   : > { %v8853_v62 = vadd.f32 %v8409_v2, %v8505_v59  ;;  %v8858_v6 = vadd.f32 %v10669_v39, %v8520_v57  ;;  %v10674_v2 = vld [vmem:[#allocation66_spill] sm:$0xff]  ;;  %v10677_v57 = vld [vmem:[#allocation68_spill] sm:$0xff]  ;;  %v10691_v39 = vld [vmem:[#allocation81_spill] sm:$0xff] }
 0x2e1   : > { %v2340_v53 = vsel %vm2276_vm2, %v2339_v1, %v2335_v29  ;;  %10665 = vst [vmem:[#allocation94_spill] sm:$0xff] %v8824_v51  ;;  %v1237_v29 = vmax.f32 %v8605_v11, 0.0  ;;  %10667 = vst [vmem:[#allocation96_spill] sm:$0xff] %v8840_v46  ;;  %v1310_v11 = vmul.f32 %v8698_v16, %v1239_v38  ;;  %v8868_v1 = vadd.f32 %v10673_v49, %v10672_v7  ;;  %v10675_v59 = vld [vmem:[#allocation50_spill] sm:$0xff]  ;;  %v10692_v7 = vld [vmem:[#allocation83_spill] sm:$0xff] }
 0x2e2   : > { %v2565_v50 = vsel %vm2561_vm5, %v2340_v53, %v2564_v34  ;;  %v8873_v12 = vadd.f32 %v10675_v59, %v10674_v2  ;;  %v10678_v53 = vld [vmem:[#allocation51_spill] sm:$0xff]  ;;  %v8918_v49 = vadd.f32 %v8720_v47, %v10692_v7  ;;  %v10693_v2 = vld [vmem:[#allocation85_spill] sm:$0xff]  ;;  %v10695_v47 = vld [vmem:[#allocation86_spill] sm:$0xff] }
 0x2e3   : > { %v2596_v58 = vsel %vm2592_vm6, %v2565_v50, -inf  ;;  %1875 = vbcast.lane.b32.xlu1 %v1873_v9, 256  ;;  %v1308_v13 = vmul.f32 %v8698_v16, %v1237_v29  ;;  %v1499_v48 = vsel %vm1312_vm1, %v1310_v11, 0.0  ;;  %v10670_v16 = vld [vmem:[#allocation65_spill] sm:$0xff]  ;;  %v8878_v34 = vadd.f32 %v10678_v53, %v10677_v57  ;;  %v10679_v50 = vld [vmem:[#allocation67_spill] sm:$0xff]  ;;  %v10694_v53 = vld [vmem:[#allocation80_spill] sm:$0xff] }
 0x2e4   : > { %2597 = vmax.xlane.f32.xlu0 %v2596_v58  ;;  %v8863_v21 = vadd.f32 %v10671_v33, %v10670_v16  ;;  %10676 = vst [vmem:[#allocation47_spill] sm:$0xff] %v8873_v12  ;;  %v8883_v30 = vadd.f32 %v10680_v17, %v10679_v50  ;;  %v8888_v58 = vpop.permute.xlu1 %1802  ;;  %v10681_v29 = vld [vmem:[#allocation71_spill] sm:$0xff]  ;;  %v8923_v59 = vadd.f32 %v8709_v44, %v10693_v2  ;;  %v10697_v44 = vld [vmem:[#allocation82_spill] sm:$0xff] }
 0x2e5   : > { %v1493_v20 = vsel %vm1312_vm1, %v1308_v13, 0.0  ;;  %v10684_v13 = vld [vmem:[#allocation69_spill] sm:$0xff]  ;;  %v8930_v50 = vadd.f32 %v8729_v41, %v10694_v53  ;;  %v1799_v41 = vpop.permute.xlu0 %1798  ;;  %v10704_v53 = vld [vmem:[#allocation88_spill] sm:$0xff] }
 0x2e7   : > { %2170 = vperm.xlu1 %7531, %v8824_v51  }
 0x2e8   : > { %1485 = vadd.xlane.f32.xlu0 %v1484_v25  ;;  %v1814_v54 = vpop.permute.xlu1 %1813  ;;  %v10682_v25 = vld [vmem:[#allocation73_spill] sm:$0xff] }
 0x2e9   : > { %v8892_v38 = vadd.f32 %v10682_v25, %v10681_v29  ;;  %v8937_v29 = vadd.f32 %v8742_v28, %v10695_v47  ;;  %v8942_v25 = vadd.f32 %v8714_v63, %v10697_v44  ;;  %v1810_v2 = vpop.permute.xlu0 %1809  ;;  %v8968_v47 = vrot.slane %v8799_v8, %v8034_v22  ;;  %v10706_v44 = vld [vmem:[#allocation55_spill] sm:$0xff] }
 0x2eb   : > { %2176 = vperm.xlu1 %7531, %v8832_v19   ;;  %10683 = vst [vmem:[#allocation65_spill] sm:$0xff] %v8892_v38  ;;  %10696 = vst [vmem:[#allocation49_spill] sm:$0xff] %v8937_v29 }
 0x2ec   : > { %1488 = vadd.xlane.f32.xlu0 %v1487_v3  ;;  %v10685_v3 = vld [vmem:[#allocation76_spill] sm:$0xff]  ;;  %10698 = vst [vmem:[#allocation66_spill] sm:$0xff] %v8942_v25 }
 0x2ed   : > { %v8897_v11 = vadd.f32 %v10685_v3, %v10684_v13  ;;  %v10699_v3 = vld [vmem:[#allocation87_spill] sm:$0xff] }
 0x2ef   : > { %2182 = vperm.xlu1 %7531, %v8840_v46   ;;  %10686 = vst [vmem:[#allocation48_spill] sm:$0xff] %v8897_v11  ;;  %v8981_v46 = vadd.f32 %v1810_v2, %v8726_v10  ;;  %v9000_v2 = vrot.slane %v8799_v8, %v8053_v32 }
 0x2f0   : > { %1494 = vadd.xlane.f32.xlu0 %v1493_v20  ;;  %v8899_v20 = vpop.permute.xlu1 %1824 }
 0x2f1   : > { %10709 = vst [vmem:[#allocation52_spill] sm:$0xff] %v8981_v46 }
 0x2f3   : > { %2188 = vperm.xlu1 %7531, %v8847_v23  }
 0x2f4   : > { %1500 = vadd.xlane.f32.xlu0 %v1499_v48 }
 0x30a   : > { %2122 = vperm.xlu0 %7532, %v8853_v62  }
 0x30e   : > { %2131 = vperm.xlu0 %7532, %v8858_v6  }
 0x312   : > { %2137 = vperm.xlu0 %7532, %v8863_v21  }
 0x316   : > { %2143 = vperm.xlu0 %7532, %v8868_v1  }
 0x31a   : > { %2149 = vperm.xlu0 %7532, %v8873_v12  }
 0x31e   : > { %2158 = vperm.xlu0 %7532, %v8878_v34  }
 0x322   : > { %2164 = vperm.xlu0 %7532, %v8883_v30  }
 0x326   : > { %1842 = vbcast.lane.b32.xlu0 %v8789_v5, 256  ;;  %v10687_v5 = vld [vmem:[#allocation72_spill] sm:$0xff] }
 0x32a   : > { %1857 = vbcast.lane.b32.xlu0 %v8795_v56, 264  ;;  %v10688_v56 = vld [vmem:[#allocation78_spill] sm:$0xff] }
 0x32b   : > { %v8904_v48 = vadd.f32 %v10688_v56, %v10687_v5  ;;  %v8949_v5 = vadd.f32 %v8752_v52, %v10699_v3  ;;  %v2628_v56 = vrot.slane %v8799_v8, %v8028_v18  ;;  %v8964_v52 = vadd.f32 %v8765_v35, %v10704_v53 }
 0x32d   : > { %10689 = vst [vmem:[#allocation63_spill] sm:$0xff] %v8904_v48  ;;  %10700 = vst [vmem:[#allocation50_spill] sm:$0xff] %v8949_v5  ;;  %v2786_v3 = vsub.f32 %v10706_v44, %v2628_v56 }
 0x32e   : > { %1868 = vbcast.lane.b32.xlu0 %v1862_v61, 264  ;;  %v8906_v61 = vpop.permute.xlu1 %1835  ;;  %10705 = vst [vmem:[#allocation51_spill] sm:$0xff] %v8964_v52 }
 0x32f   : > { %v2851_v35 = vmul.f32 1.442695, %v2786_v3 }
 0x332   : > { %1879 = vbcast.lane.b32.xlu0 %v1873_v9, 264  ;;  %v10690_v9 = vld [vmem:[#allocation70_spill] sm:$0xff]  ;;  %v8913_v33 = vpop.xlane.xlu1 %1482 }
 0x333   : > { %v8911_v16 = vadd.f32 %v10691_v39, %v10690_v9  ;;  %v10701_v9 = vld [vmem:[#allocation84_spill] sm:$0xff]  ;;  %v10703_v39 = vld [vmem:[#allocation58_spill] sm:$0xff] }
 0x334   : > { %v8958_v63 = vadd.f32 %v8716_v24, %v10701_v9  ;;  %v2785_v7 = vsub.f32 %v10703_v39, %v2628_v56  ;;  %v8972_v24 = vpop.permute.xlu0 %1820  ;;  %v8975_v9 = vadd.f32 %v1799_v41, %v8718_v15  ;;  %v10708_v39 = vld [vmem:[#allocation54_spill] sm:$0xff]  ;;  %v8985_v56 = vrot.slane %v8799_v8, %v8043_v27  ;;  %v10710_v15 = vld [vmem:[#allocation60_spill] sm:$0xff] }
 0x335   : > { %v8993_v41 = vadd.f32 %v1814_v54, %v8736_v55  ;;  %v10713_v55 = vld [vmem:[#allocation59_spill] sm:$0xff] }
 0x336   : > { %2173 = vperm.xlu0 %7532, %v8892_v38   ;;  %v8925_v57 = vpop.xlane.xlu1 %1491  ;;  %10702 = vst [vmem:[#allocation68_spill] sm:$0xff] %v8958_v63  ;;  %10707 = vst [vmem:[#allocation67_spill] sm:$0xff] %v8975_v9  ;;  %v2792_v54 = vsub.f32 %v10713_v55, %v9000_v2  ;;  %v9021_v38 = vadd.f32 %v8899_v20, %v8749_v37 }
 0x337   : > { %10711 = vst [vmem:[#allocation71_spill] sm:$0xff] %v8993_v41 }
 0x338   : > { %v8987_v44 = vpop.permute.xlu0 %1831  ;;  %v2863_v8 = vmul.f32 1.442695, %v2792_v54  ;;  %10716 = vst [vmem:[#allocation72_spill] sm:$0xff] %v9021_v38  ;;  %v9031_v54 = vadd.f32 %v8906_v61, %v8759_v45 }
 0x33a   : > { %2179 = vperm.xlu0 %7532, %v8897_v11   ;;  %v8932_v17 = vpop.xlane.xlu1 %1497  ;;  %10718 = vst [vmem:[#allocation70_spill] sm:$0xff] %v9031_v54 }
 0x33e   : > { %2185 = vperm.xlu0 %7532, %v8904_v48   ;;  %v8944_v13 = vpop.xlane.xlu1 %1503  ;;  %v2788_v48 = vsub.f32 %v10708_v39, %v8968_v47 }
 0x342   : > { %2191 = vperm.xlu0 %7532, %v8911_v16   ;;  %v8953_v28 = vpop.permute.xlu1 %2125 }
 0x346   : > { %2194 = vperm.xlu0 %7532, %v8918_v49   ;;  %v2129_v23 = vpop.permute.xlu1 %2128 }
 0x34a   : > { %2197 = vperm.xlu0 %7532, %v8923_v59   ;;  %v2135_v53 = vpop.permute.xlu1 %2134 }
 0x34b   : > { %v2362_v61 = vrot.slane %v2135_v53, %v8665_v43 }
 0x34e   : > { %2200 = vperm.xlu0 %7532, %v8930_v50   ;;  %v2141_v3 = vpop.permute.xlu1 %2140 }
 0x352   : > { %2203 = vperm.xlu0 %7532, %v8937_v29   ;;  %v2147_v11 = vpop.permute.xlu1 %2146 }
 0x356   : > { %2206 = vperm.xlu0 %7532, %v8942_v25   ;;  %v2849_v25 = vmul.f32 1.442695, %v2785_v7  ;;  %v2855_v7 = vmul.f32 1.442695, %v2788_v48 }
 0x358   : > { %7541 = vpow2.f32 %v2849_v25  ;;  %v2790_v25 = vsub.f32 %v10710_v15, %v8985_v56 }
 0x359   : > { %7543 = vpow2.f32 %v2851_v35 }
 0x35a   : > { %2209 = vperm.xlu0 %7532, %v8949_v5   ;;  %7545 = vpow2.f32 %v2855_v7  ;;  %v2859_v48 = vmul.f32 1.442695, %v2790_v25 }
 0x35c   : > { %7547 = vpow2.f32 %v2859_v48 }
 0x35d   : > { %7549 = vpow2.f32 %v2863_v8 }
 0x35e   : > { %2212 = vperm.xlu0 %7532, %v8958_v63  }
 0x362   : > { %2215 = vperm.xlu0 %7532, %v8964_v52  }
 0x365   : > { %v9002_v39 = vpop.eup %7541 }
 0x366   : > { %2218 = vperm.xlu0 %7532, %v8975_v9   ;;  %10712 = vst [vmem:[#allocation73_spill] sm:$0xff] %v9002_v39  ;;  %v9009_v7 = vpop.eup %7543 }
 0x367   : > { %10714 = vst [vmem:[#allocation69_spill] sm:$0xff] %v9009_v7  ;;  %v9014_v25 = vpop.eup %7545 }
 0x368   : > { %10715 = vst [vmem:[#allocation76_spill] sm:$0xff] %v9014_v25 }
 0x369   : > { %v9024_v55 = vpop.eup %7547 }
 0x36a   : > { %2224 = vperm.xlu0 %7532, %v8981_v46   ;;  %10717 = vst [vmem:[#allocation78_spill] sm:$0xff] %v9024_v55  ;;  %v9034_v8 = vpop.eup %7549 }
 0x36b   : > { %10719 = vst [vmem:[#allocation81_spill] sm:$0xff] %v9034_v8 }
 0x36d   : > { %v8995_v10 = vpop.xlane.xlu0 %2597 }
 0x36e   : > { %2227 = vperm.xlu0 %7532, %v8993_v41   ;;  %v2153_v41 = vpop.permute.xlu1 %2152 }
 0x371   : > { %v9004_v35 = vpop.xlane.xlu0 %1485 }
 0x372   : > { %3042 = vperm.xlu0 %7532, %v9002_v39   ;;  %v2156_v48 = vpop.permute.xlu1 %2155  ;;  %v2353_v39 = vrot.slane %v2129_v23, %v8665_v43 }
 0x375   : > { %v9011_v15 = vpop.xlane.xlu0 %1488 }
 0x376   : > { %3045 = vperm.xlu0 %7532, %v9009_v7  }
 0x379   : > { %v9017_v19 = vpop.xlane.xlu0 %1494 }
 0x37a   : > { %3051 = vperm.xlu0 %7532, %v9014_v25   ;;  %v2162_v25 = vpop.permute.xlu1 %2161 }
 0x37d   : > { %v9026_v51 = vpop.xlane.xlu0 %1500 }
 0x37e   : > { %2233 = vperm.xlu0 %7532, %v9021_v38   ;;  %v2168_v20 = vpop.permute.xlu1 %2167 }
 0x382   : > { %3057 = vperm.xlu0 %7532, %v9024_v55   ;;  %v1847_v46 = vpop.permute.xlu1 %1846 }
 0x385   : > { %v2123_v12 = vpop.permute.xlu0 %2122 }
 0x386   : > { %2239 = vperm.xlu0 %7532, %v9031_v54   ;;  %v2344_v55 = vrot.slane %v2123_v12, %v8665_v43  ;;  %v2348_v54 = vrot.slane %v8953_v28, %v8668_v31  ;;  %v1854_v29 = vpop.permute.xlu1 %1853 }
 0x388   : > { %v2349_v63 = vsel %vm2276_vm2, %v2348_v54, %v2344_v55  ;;  %v2380_v55 = vrot.slane %v2147_v11, %v8665_v43  ;;  %v2393_v54 = vrot.slane %v2156_v48, %v8668_v31 }
 0x389   : > { %v2132_v37 = vpop.permute.xlu0 %2131 }
 0x38a   : > { %3063 = vperm.xlu0 %7532, %v9034_v8   ;;  %v2357_v38 = vrot.slane %v2132_v37, %v8668_v31  ;;  %v2371_v37 = vrot.slane %v2141_v3, %v8665_v43 }
 0x38c   : > { %v2358_v9 = vsel %vm2276_vm2, %v2357_v38, %v2353_v39 }
 0x38d   : > { %v2138_v7 = vpop.permute.xlu0 %2137  ;;  %v2566_v12 = vsel %vm2557_vm3, %v2358_v9, %v2349_v63  ;;  %v2402_v9 = vrot.slane %v2162_v25, %v8668_v31 }
 0x38e   : > { %v2366_v45 = vrot.slane %v2138_v7, %v8668_v31 }
 0x390   : > { %v2367_v52 = vsel %vm2276_vm2, %v2366_v45, %v2362_v61 }
 0x391   : > { %v2144_v8 = vpop.permute.xlu0 %2143  ;;  %v2567_v53 = vsel %vm2559_vm4, %v2367_v52, %v2566_v12  ;;  %v2389_v52 = vrot.slane %v2153_v41, %v8665_v43 }
 0x392   : > { %v2375_v23 = vrot.slane %v2144_v8, %v8668_v31  ;;  %v1865_v8 = vpop.permute.xlu1 %1864 }
 0x394   : > { %v2376_v7 = vsel %vm2276_vm2, %v2375_v23, %v2371_v37  ;;  %v2394_v23 = vsel %vm2276_vm2, %v2393_v54, %v2389_v52  ;;  %v9080_v54 = vrot.slane %v8995_v10, %v8028_v18  ;;  %v2648_v52 = vrot.slane %v8995_v10, %v8034_v22 }
 0x395   : > { %v2150_v5 = vpop.permute.xlu0 %2149  ;;  %v2568_v28 = vsel %vm2561_vm5, %v2376_v7, %v2567_v53 }
 0x396   : > { %v2599_v38 = vsel %vm2592_vm6, %v2568_v28, -inf  ;;  %v2384_v39 = vrot.slane %v2150_v5, %v8668_v31  ;;  %v2411_v5 = vrot.slane %v2168_v20, %v8668_v31  ;;  %v1876_v53 = vpop.permute.xlu1 %1875 }
 0x397   : > { %2600 = vmax.xlane.f32.xlu1 %v2599_v38 }
 0x398   : > { %v2385_v45 = vsel %vm2276_vm2, %v2384_v39, %v2380_v55  ;;  %v9075_v39 = vadd.f32 %v1847_v46, %v9004_v35  ;;  %v10723_v46 = vld [vmem:[#allocation74_spill] sm:$0xff] }
 0x399   : > { %v2159_v3 = vpop.permute.xlu0 %2158  ;;  %v2569_v48 = vsel %vm2557_vm3, %v2394_v23, %v2385_v45  ;;  %v2793_v35 = vsub.f32 %v10723_v46, %v9080_v54 }
 0x39a   : > { %v2398_v63 = vrot.slane %v2159_v3, %v8665_v43  ;;  %10721 = vst [vmem:[#allocation85_spill] sm:$0xff] %v9075_v39  ;;  %v2171_v3 = vpop.permute.xlu1 %2170 }
 0x39c   : > { %v2403_v61 = vsel %vm2276_vm2, %v2402_v9, %v2398_v63 }
 0x39d   : > { %v2165_v37 = vpop.permute.xlu0 %2164  ;;  %v2570_v25 = vsel %vm2559_vm4, %v2403_v61, %v2569_v48  ;;  %v10727_v48 = vld [vmem:[#allocation75_spill] sm:$0xff] }
 0x39e   : > { %v2407_v11 = vrot.slane %v2165_v37, %v8665_v43  ;;  %v2177_v9 = vpop.permute.xlu1 %2176  ;;  %v10725_v37 = vld [vmem:[#allocation62_spill] sm:$0xff] }
 0x39f   : > { %v2795_v23 = vsub.f32 %v10725_v37, %v2648_v52 }
 0x3a0   : > { %v2412_v12 = vsel %vm2276_vm2, %v2411_v5, %v2407_v11  ;;  %v2652_v11 = vrot.slane %v8995_v10, %v8043_v27 }
 0x3a1   : > { %v1843_v7 = vpop.permute.xlu0 %1842  ;;  %v2571_v41 = vsel %vm2561_vm5, %v2412_v12, %v2570_v25  ;;  %v2796_v12 = vsub.f32 %v10727_v48, %v2648_v52  ;;  %v9110_v52 = vadd.f32 %v1876_v53, %v9026_v51  ;;  %v10730_v48 = vld [vmem:[#allocation77_spill] sm:$0xff] }
 0x3a2   : > { %v9070_v28 = vadd.f32 %v1843_v7, %v8913_v33  ;;  %v2602_v38 = vsel %vm2592_vm6, %v2571_v41, -inf  ;;  %v9083_v33 = vadd.f32 %v1854_v29, %v9011_v15  ;;  %v2865_v29 = vmul.f32 1.442695, %v2793_v35  ;;  %v2183_v5 = vpop.permute.xlu1 %2182 }
 0x3a3   : > { %2603 = vmax.xlane.f32.xlu1 %v2602_v38  ;;  %v9096_v15 = vadd.f32 %v1865_v8, %v9017_v19  ;;  %v2425_v19 = vrot.slane %v2177_v9, %v8665_v43  ;;  %v10728_v8 = vld [vmem:[#allocation64_spill] sm:$0xff]  ;;  %10729 = vst [vmem:[#allocation87_spill] sm:$0xff] %v9110_v52  ;;  %v9118_v9 = vrot.slane %v8995_v10, %v8053_v32 }
 0x3a4   : > { %10720 = vst [vmem:[#allocation83_spill] sm:$0xff] %v9070_v28  ;;  %2242 = vperm.xlu0 %7532, %v9070_v28   ;;  %10722 = vst [vmem:[#allocation80_spill] sm:$0xff] %v9083_v33  ;;  %7551 = vpow2.f32 %v2865_v29  ;;  %v2797_v38 = vsub.f32 %v10728_v8, %v2652_v11 }
 0x3a5   : > { %v1858_v20 = vpop.permute.xlu0 %1857  ;;  %10726 = vst [vmem:[#allocation82_spill] sm:$0xff] %v9096_v15 }
 0x3a6   : > { %v9091_v45 = vadd.f32 %v1858_v20, %v8925_v57  ;;  %v2869_v57 = vmul.f32 1.442695, %v2795_v23  ;;  %v2871_v20 = vmul.f32 1.442695, %v2796_v12  ;;  %v2189_v35 = vpop.permute.xlu1 %2188  ;;  %v2416_v23 = vrot.slane %v2171_v3, %v8665_v43 }
 0x3a7   : > { %v2798_v12 = vsub.f32 %v10730_v48, %v2652_v11  ;;  %v2873_v51 = vmul.f32 1.442695, %v2797_v38  ;;  %v2443_v53 = vrot.slane %v2189_v35, %v8665_v43  ;;  %v10735_v48 = vld [vmem:[#allocation57_spill] sm:$0xff] }
 0x3a8   : > { %2245 = vperm.xlu0 %7532, %v9075_v39   ;;  %10724 = vst [vmem:[#allocation86_spill] sm:$0xff] %v9091_v45  ;;  %7553 = vpow2.f32 %v2869_v57 }
 0x3a9   : > { %v1869_v55 = vpop.permute.xlu0 %1868  ;;  %7555 = vpow2.f32 %v2871_v20 }
 0x3aa   : > { %v9103_v7 = vadd.f32 %v1869_v55, %v8932_v17  ;;  %v2434_v55 = vrot.slane %v2183_v5, %v8665_v43  ;;  %7557 = vpow2.f32 %v2873_v51 }
 0x3ac   : > { %2248 = vperm.xlu0 %7532, %v9083_v33  }
 0x3ad   : > { %v1880_v63 = vpop.permute.xlu0 %1879 }
 0x3ae   : > { %v9126_v5 = vadd.f32 %v1880_v63, %v8944_v13  ;;  %v10733_v63 = vld [vmem:[#allocation79_spill] sm:$0xff] }
 0x3af   : > { %v2800_v20 = vsub.f32 %v10733_v63, %v9118_v9 }
 0x3b0   : > { %2251 = vperm.xlu0 %7532, %v9091_v45   ;;  %10731 = vst [vmem:[#allocation84_spill] sm:$0xff] %v9126_v5 }
 0x3b1   : > { %v2174_v61 = vpop.permute.xlu0 %2173 }
 0x3b2   : > { %v2420_v37 = vrot.slane %v2174_v61, %v8668_v31 }
 0x3b4   : > { %2254 = vperm.xlu0 %7532, %v9096_v15   ;;  %v2421_v3 = vsel %vm2276_vm2, %v2420_v37, %v2416_v23  ;;  %v9142_v37 = vpop.eup %7551 }
 0x3b5   : > { %v2180_v25 = vpop.permute.xlu0 %2179  ;;  %v9145_v23 = vpop.eup %7553 }
 0x3b6   : > { %v2429_v41 = vrot.slane %v2180_v25, %v8668_v31  ;;  %10734 = vst [vmem:[#allocation58_spill] sm:$0xff] %v9145_v23  ;;  %v9150_v51 = vpop.eup %7555 }
 0x3b7   : > { %10736 = vst [vmem:[#allocation88_spill] sm:$0xff] %v9150_v51 }
 0x3b8   : > { %2257 = vperm.xlu0 %7532, %v9103_v7   ;;  %v2430_v29 = vsel %vm2276_vm2, %v2429_v41, %v2425_v19  ;;  %v10732_v19 = vld [vmem:[#allocation53_spill] sm:$0xff] }
 0x3b9   : > { %v2186_v46 = vpop.permute.xlu0 %2185  ;;  %v2572_v57 = vsel %vm2557_vm3, %v2430_v29, %v2421_v3  ;;  %v2787_v8 = vsub.f32 %v10732_v19, %v8968_v47  ;;  %v2879_v47 = vmul.f32 1.442695, %v2800_v20 }
 0x3ba   : > { %v2438_v17 = vrot.slane %v2186_v46, %v8668_v31  ;;  %v2875_v46 = vmul.f32 1.442695, %v2798_v12  ;;  %v2789_v12 = vsub.f32 %v10735_v48, %v8985_v56 }
 0x3bc   : > { %2260 = vperm.xlu0 %7532, %v9110_v52   ;;  %v2439_v61 = vsel %vm2276_vm2, %v2438_v17, %v2434_v55  ;;  %v2853_v17 = vmul.f32 1.442695, %v2787_v8  ;;  %7559 = vpow2.f32 %v2875_v46 }
 0x3bd   : > { %v2192_v25 = vpop.permute.xlu0 %2191  ;;  %v2573_v41 = vsel %vm2559_vm4, %v2439_v61, %v2572_v57  ;;  %v2857_v61 = vmul.f32 1.442695, %v2789_v12 }
 0x3be   : > { %v2447_v10 = vrot.slane %v2192_v25, %v8668_v31  ;;  %7561 = vpow2.f32 %v2853_v17  ;;  %v9153_v25 = vpop.eup %7557 }
 0x3bf   : > { %7563 = vpow2.f32 %v2879_v47  ;;  %10737 = vst [vmem:[#allocation55_spill] sm:$0xff] %v9153_v25  ;;  %v9186_v47 = vadd.f32 %v8987_v44, %v8791_v60 }
 0x3c0   : > { %2263 = vperm.xlu0 %7532, %v9126_v5   ;;  %v2448_v11 = vsel %vm2276_vm2, %v2447_v10, %v2443_v53  ;;  %v10738_v10 = vld [vmem:[#allocation56_spill] sm:$0xff]  ;;  %7565 = vpow2.f32 %v2857_v61 }
 0x3c1   : > { %v9136_v38 = vpop.permute.xlu0 %2194  ;;  %v2574_v13 = vsel %vm2561_vm5, %v2448_v11, %v2573_v41  ;;  %v2791_v57 = vsub.f32 %v10738_v10, %v9000_v2  ;;  %v9160_v11 = vadd.f32 %v8888_v58, %v8772_v36  ;;  %v9176_v58 = vadd.f32 %v8972_v24, %v8781_v0 }
 0x3c2   : > { %v2605_v35 = vsel %vm2592_vm6, %v2574_v13, -inf  ;;  %v10741_v13 = vld [vmem:[#allocation61_spill] sm:$0xff]  ;;  %v2799_v2 = vsub.f32 %v8688_v40, %v9118_v9 }
 0x3c3   : > { %2606 = vmax.xlane.f32.xlu1 %v2605_v35  ;;  %v2861_v8 = vmul.f32 1.442695, %v2791_v57  ;;  %v2794_v63 = vsub.f32 %v10741_v13, %v9080_v54  ;;  %v2452_v57 = vrot.slane %v9136_v38, %v8665_v43 }
 0x3c4   : > { %3066 = vperm.xlu0 %7532, %v9142_v37   ;;  %v2877_v54 = vmul.f32 1.442695, %v2799_v2 }
 0x3c5   : > { %v2198_v55 = vpop.permute.xlu0 %2197  ;;  %7567 = vpow2.f32 %v2861_v8  ;;  %v2867_v46 = vmul.f32 1.442695, %v2794_v63 }
 0x3c6   : > { %v2456_v60 = vrot.slane %v2198_v55, %v8668_v31 }
 0x3c7   : > { %7569 = vpow2.f32 %v2867_v46 }
 0x3c8   : > { %3072 = vperm.xlu0 %7532, %v9145_v23   ;;  %7571 = vpow2.f32 %v2877_v54  ;;  %v2457_v55 = vsel %vm2276_vm2, %v2456_v60, %v2452_v57 }
 0x3c9   : > { %v2201_v29 = vpop.permute.xlu0 %2200  ;;  %v9162_v56 = vpop.eup %7559 }
 0x3ca   : > { %10739 = vst [vmem:[#allocation54_spill] sm:$0xff] %v9162_v56  ;;  %v2461_v44 = vrot.slane %v2201_v29, %v8665_v43 }
 0x3cb   : > { %v9166_v19 = vpop.eup %7561 }
 0x3cc   : > { %3075 = vperm.xlu0 %7532, %v9150_v51   ;;  %10740 = vst [vmem:[#allocation60_spill] sm:$0xff] %v9166_v19  ;;  %v9170_v20 = vpop.eup %7563 }
 0x3cd   : > { %v2204_v53 = vpop.permute.xlu0 %2203  ;;  %v9181_v35 = vpop.eup %7565 }
 0x3ce   : > { %10742 = vst [vmem:[#allocation59_spill] sm:$0xff] %v9181_v35  ;;  %v2465_v24 = vrot.slane %v2204_v53, %v8668_v31 }
 0x3d0   : > { %3078 = vperm.xlu0 %7532, %v9153_v25   ;;  %v2466_v53 = vsel %vm2276_vm2, %v2465_v24, %v2461_v44 }
 0x3d1   : > { %v2207_v3 = vpop.permute.xlu0 %2206 }
 0x3d2   : > { %v9191_v40 = vpop.eup %7567  ;;  %v2470_v10 = vrot.slane %v2207_v3, %v8665_v43  ;;  %v2575_v3 = vsel %vm2557_vm3, %v2466_v53, %v2457_v55 }
 0x3d3   : > { %10743 = vst [vmem:[#allocation74_spill] sm:$0xff] %v9191_v40 }
 0x3d4   : > { %3081 = vperm.xlu0 %7532, %v9162_v56   ;;  %2221 = vperm.xlu1 %7531, %v9160_v11   ;;  %v9195_v9 = vpop.eup %7569 }
 0x3d5   : > { %v2210_v41 = vpop.permute.xlu0 %2209 }
 0x3d6   : > { %v2474_v48 = vrot.slane %v2210_v41, %v8668_v31  ;;  %v9209_v41 = vpop.eup %7571 }
 0x3d8   : > { %3087 = vperm.xlu0 %7532, %v9170_v20   ;;  %3048 = vperm.xlu1 %7531, %v9166_v19   ;;  %v2475_v13 = vsel %vm2276_vm2, %v2474_v48, %v2470_v10 }
 0x3d9   : > { %v2213_v36 = vpop.permute.xlu0 %2212  ;;  %v2576_v38 = vsel %vm2559_vm4, %v2475_v13, %v2575_v3 }
 0x3da   : > { %v2479_v8 = vrot.slane %v2213_v36, %v8665_v43 }
 0x3dc   : > { %2230 = vperm.xlu1 %7531, %v9176_v58  }
 0x3dd   : > { %v2216_v17 = vpop.permute.xlu0 %2215 }
 0x3de   : > { %v2483_v61 = vrot.slane %v2216_v17, %v8668_v31 }
 0x3e0   : > { %3054 = vperm.xlu1 %7531, %v9181_v35   ;;  %v2484_v29 = vsel %vm2276_vm2, %v2483_v61, %v2479_v8 }
 0x3e1   : > { %v9189_v0 = vpop.permute.xlu0 %2218  ;;  %v2577_v2 = vsel %vm2561_vm5, %v2484_v29, %v2576_v38 }
 0x3e2   : > { %v2608_v36 = vsel %vm2592_vm6, %v2577_v2, -inf  ;;  %v2488_v19 = vrot.slane %v9189_v0, %v8665_v43 }
 0x3e4   : > { %2236 = vperm.xlu1 %7531, %v9186_v47  }
 0x3e5   : > { %v9198_v12 = vpop.permute.xlu0 %2224 }
 0x3e6   : > { %v2497_v15 = vrot.slane %v9198_v12, %v8665_v43 }
 0x3e8   : > { %3060 = vperm.xlu1 %7531, %v9191_v40  }
 0x3e9   : > { %v9215_v63 = vpop.permute.xlu0 %2227 }
 0x3ea   : > { %v2501_v5 = vrot.slane %v9215_v63, %v8668_v31 }
 0x3ec   : > { %3069 = vperm.xlu1 %7531, %v9195_v9  }
 0x3ed   : > { %v9221_v46 = vpop.permute.xlu0 %3042 }
 0x3ee   : > { %v3236_v39 = vrot.slane %v9221_v46, %v8665_v43 }
 0x3f0   : > { %3084 = vperm.xlu1 %7531, %v9209_v41  }
 0x3f1   : > { %v3046_v54 = vpop.permute.xlu0 %3045 }
 0x3f2   : > { %v3240_v52 = vrot.slane %v3046_v54, %v8668_v31 }
 0x3f4   : > { %v3241_v28 = vsel %vm2276_vm2, %v3240_v52, %v3236_v39 }
 0x3f5   : > { %v9223_v17 = vpop.permute.xlu0 %3051 }
 0x3f6   : > { %v3249_v12 = vrot.slane %v9223_v17, %v8668_v31 }
 0x3f7   : > { %2609 = vmax.xlane.f32.xlu0 %v2608_v36 }
 0x3f9   : > { %v9225_v24 = vpop.permute.xlu0 %2233 }
 0x3fa   : > { %v2510_v63 = vrot.slane %v9225_v24, %v8668_v31 }
 0x3fd   : > { %v9227_v48 = vpop.permute.xlu0 %3057 }
 0x3fe   : > { %v3258_v39 = vrot.slane %v9227_v48, %v8668_v31 }
 0x401   : > { %v9229_v60 = vpop.permute.xlu0 %2239 }
 0x402   : > { %v2519_v52 = vrot.slane %v9229_v60, %v8668_v31 }
 0x405   : > { %v9231_v44 = vpop.permute.xlu0 %3063 }
 0x41f   : > { %v9233_v61 = vpop.permute.xlu0 %2242 }
 0x420   : > { %v2601_v10 = vpop.xlane.xlu1 %2600 }
 0x421   : > { %v9236_v57 = vrot.slane %v2601_v10, %v8028_v18  ;;  %v9239_v53 = vrot.slane %v2601_v10, %v8034_v22  ;;  %v9246_v55 = vrot.slane %v2601_v10, %v8043_v27  ;;  %v9251_v38 = vrot.slane %v2601_v10, %v8053_v32 }
 0x423   : > { %v2802_v8 = vsub.f32 %v8724_v4, %v9236_v57  ;;  %v9243_v13 = vpop.permute.xlu0 %2245  ;;  %v2803_v29 = vsub.f32 %v8733_v26, %v9239_v53  ;;  %v2805_v2 = vsub.f32 %v8740_v42, %v9246_v55  ;;  %v2807_v4 = vsub.f32 %v8747_v14, %v9251_v38 }
 0x424   : > { %v2528_v46 = vrot.slane %v9243_v13, %v8668_v31  ;;  %v2524_v13 = vrot.slane %v9233_v61, %v8665_v43 }
 0x425   : > { %v2883_v3 = vmul.f32 1.442695, %v2802_v8  ;;  %v2885_v36 = vmul.f32 1.442695, %v2803_v29  ;;  %v2889_v25 = vmul.f32 1.442695, %v2805_v2 }
 0x426   : > { %v2893_v23 = vmul.f32 1.442695, %v2807_v4 }
 0x427   : > { %7573 = vpow2.f32 %v2883_v3  ;;  %v2249_v56 = vpop.permute.xlu0 %2248 }
 0x428   : > { %7575 = vpow2.f32 %v2885_v36 }
 0x429   : > { %7577 = vpow2.f32 %v2889_v25 }
 0x42a   : > { %7579 = vpow2.f32 %v2893_v23 }
 0x42b   : > { %v2252_v51 = vpop.permute.xlu0 %2251 }
 0x42c   : > { %v9271_v25 = vpop.xlane.xlu1 %2603  ;;  %v2537_v54 = vrot.slane %v2252_v51, %v8668_v31 }
 0x42f   : > { %v2255_v26 = vpop.permute.xlu0 %2254 }
 0x433   : > { %v2258_v42 = vpop.permute.xlu0 %2257 }
 0x434   : > { %v9257_v8 = vpop.eup %7573 }
 0x435   : > { %10744 = vst [vmem:[#allocation62_spill] sm:$0xff] %v9257_v8  ;;  %3093 = vperm.xlu1 %7531, %v9257_v8   ;;  %v9260_v10 = vpop.eup %7575  ;;  %v2502_v8 = vsel %vm2276_vm2, %v2501_v5, %v2497_v15  ;;  %v2533_v15 = vrot.slane %v2249_v56, %v8665_v43 }
 0x436   : > { %10745 = vst [vmem:[#allocation75_spill] sm:$0xff] %v9260_v10  ;;  %v9263_v29 = vpop.eup %7577 }
 0x437   : > { %10746 = vst [vmem:[#allocation64_spill] sm:$0xff] %v9263_v29  ;;  %v9266_v14 = vpop.permute.xlu0 %2260  ;;  %v9268_v3 = vpop.eup %7579  ;;  %v2538_v56 = vsel %vm2276_vm2, %v2537_v54, %v2533_v15 }
 0x438   : > { %10747 = vst [vmem:[#allocation77_spill] sm:$0xff] %v9268_v3 }
 0x439   : > { %3096 = vperm.xlu1 %7531, %v9260_v10  }
 0x43b   : > { %v2264_v23 = vpop.permute.xlu0 %2263 }
 0x43d   : > { %3102 = vperm.xlu1 %7531, %v9263_v29  }
 0x43f   : > { %v9273_v2 = vpop.permute.xlu0 %3066 }
 0x441   : > { %3108 = vperm.xlu1 %7531, %v9268_v3  }
 0x443   : > { %v9277_v40 = vpop.permute.xlu0 %3072 }
 0x447   : > { %v9279_v35 = vpop.permute.xlu0 %3075 }
 0x44c   : > { %v9275_v36 = vpop.xlane.xlu1 %2606 }
 0x450   : > { %v2222_v4 = vpop.permute.xlu1 %2221 }
 0x451   : > { %v2492_v3 = vrot.slane %v2222_v4, %v8668_v31  ;;  %v3079_v4 = vpop.permute.xlu0 %3078 }
 0x454   : > { %v3049_v10 = vpop.permute.xlu1 %3048 }
 0x455   : > { %v3245_v0 = vrot.slane %v3049_v10, %v8665_v43  ;;  %v2555_v10 = vrot.slane %v2264_v23, %v8668_v31  ;;  %v3082_v61 = vpop.permute.xlu0 %3081  ;;  %v2551_v23 = vrot.slane %v9266_v14, %v8665_v43 }
 0x457   : > { %v3250_v48 = vsel %vm2276_vm2, %v3249_v12, %v3245_v0 }
 0x458   : > { %v2231_v29 = vpop.permute.xlu1 %2230 }
 0x459   : > { %v2506_v45 = vrot.slane %v2231_v29, %v8665_v43  ;;  %v2493_v29 = vsel %vm2276_vm2, %v2492_v3, %v2488_v19  ;;  %v2546_v19 = vrot.slane %v2258_v42, %v8668_v31  ;;  %v3267_v42 = vrot.slane %v9231_v44, %v8668_v31 }
 0x45a   : > { %v3521_v44 = vsel %vm2557_vm3, %v3250_v48, %v3241_v28  ;;  %v3281_v28 = vrot.slane %v9277_v40, %v8665_v43  ;;  %v3290_v48 = vrot.slane %v3079_v4, %v8665_v43 }
 0x45b   : > { %v2511_v5 = vsel %vm2276_vm2, %v2510_v63, %v2506_v45  ;;  %v2542_v45 = vrot.slane %v2255_v26, %v8665_v43  ;;  %v2529_v63 = vsel %vm2276_vm2, %v2528_v46, %v2524_v13  ;;  %v3285_v46 = vrot.slane %v9279_v35, %v8668_v31 }
 0x45c   : > { %v3055_v33 = vpop.permute.xlu1 %3054  ;;  %v2581_v0 = vsel %vm2557_vm3, %v2538_v56, %v2529_v63  ;;  %v3294_v13 = vrot.slane %v3082_v61, %v8668_v31  ;;  %v3088_v56 = vpop.permute.xlu0 %3087 }
 0x45d   : > { %v3254_v24 = vrot.slane %v3055_v33, %v8665_v43  ;;  %v2578_v33 = vsel %vm2557_vm3, %v2502_v8, %v2493_v29  ;;  %v2547_v8 = vsel %vm2276_vm2, %v2546_v19, %v2542_v45  ;;  %v3272_v19 = vrot.slane %v9273_v2, %v8665_v43 }
 0x45e   : > { %v2579_v60 = vsel %vm2559_vm4, %v2511_v5, %v2578_v33  ;;  %v3286_v33 = vsel %vm2276_vm2, %v3285_v46, %v3281_v28  ;;  %v3303_v40 = vrot.slane %v3088_v56, %v8668_v31  ;;  %v3295_v63 = vsel %vm2276_vm2, %v3294_v13, %v3290_v48 }
 0x45f   : > { %v3259_v54 = vsel %vm2276_vm2, %v3258_v39, %v3254_v24  ;;  %v9370_v46 = vrot.slane %v9271_v25, %v8028_v18 }
 0x460   : > { %v2237_v51 = vpop.permute.xlu1 %2236  ;;  %v3522_v24 = vsel %vm2559_vm4, %v3259_v54, %v3521_v44  ;;  %v2808_v44 = vsub.f32 %v8868_v1, %v9251_v38 }
 0x461   : > { %v2515_v17 = vrot.slane %v2237_v51, %v8665_v43  ;;  %v2556_v51 = vsel %vm2276_vm2, %v2555_v10, %v2551_v23 }
 0x463   : > { %v2520_v3 = vsel %vm2276_vm2, %v2519_v52, %v2515_v17  ;;  %v2582_v52 = vsel %vm2559_vm4, %v2547_v8, %v2581_v0  ;;  %v2804_v8 = vsub.f32 %v8858_v6, %v9239_v53  ;;  %v9374_v6 = vrot.slane %v9271_v25, %v8043_v27 }
 0x464   : > { %v3061_v15 = vpop.permute.xlu1 %3060  ;;  %v2580_v26 = vsel %vm2561_vm5, %v2520_v3, %v2579_v60  ;;  %v2583_v45 = vsel %vm2561_vm5, %v2556_v51, %v2582_v52  ;;  %v9380_v53 = vrot.slane %v9271_v25, %v8053_v32  ;;  %v9391_v51 = vrot.slane %v9275_v36, %v8053_v32 }
 0x465   : > { %v3263_v12 = vrot.slane %v3061_v15, %v8665_v43  ;;  %v2611_v29 = vsel %vm2592_vm6, %v2580_v26, -inf  ;;  %v2801_v26 = vsub.f32 %v8853_v62, %v9236_v57  ;;  %v2895_v62 = vmul.f32 1.442695, %v2808_v44  ;;  %v10748_v57 = vld [vmem:[#allocation89_spill] sm:$0xff] }
 0x466   : > { %2612 = vmax.xlane.f32.xlu1 %v2611_v29  ;;  %v2887_v29 = vmul.f32 1.442695, %v2804_v8  ;;  %v2813_v1 = vsub.f32 %v8878_v34, %v9374_v6  ;;  %v2824_v52 = vsub.f32 %v8911_v16, %v9391_v51  ;;  %v10753_v8 = vld [vmem:[#allocation51_spill] sm:$0xff] }
 0x467   : > { %v3268_v5 = vsel %vm2276_vm2, %v3267_v42, %v3263_v12  ;;  %v2614_v42 = vsel %vm2592_vm6, %v2583_v45, -inf  ;;  %v2881_v23 = vmul.f32 1.442695, %v2801_v26  ;;  %v2806_v12 = vsub.f32 %v8863_v21, %v9246_v55 }
 0x468   : > { %v3070_v39 = vpop.permute.xlu1 %3069  ;;  %v3523_v14 = vsel %vm2561_vm5, %v3268_v5, %v3522_v24  ;;  %v2809_v21 = vsub.f32 %v10748_v57, %v9370_v46  ;;  %v2815_v5 = vsub.f32 %v8883_v30, %v9380_v53  ;;  %v2905_v24 = vmul.f32 1.442695, %v2813_v1 }
 0x469   : > { %v3276_v17 = vrot.slane %v3070_v39, %v8668_v31  ;;  %v3553_v35 = vsel %vm2592_vm6, %v3523_v14, 0.0  ;;  %7581 = vpow2.f32 %v2881_v23  ;;  %v2891_v0 = vmul.f32 1.442695, %v2806_v12 }
 0x46a   : > { %3554 = vadd.xlane.f32.xlu0 %v3553_v35  ;;  %7583 = vpow2.f32 %v2887_v29  ;;  %v2897_v55 = vmul.f32 1.442695, %v2809_v21  ;;  %v2909_v34 = vmul.f32 1.442695, %v2815_v5  ;;  %v2927_v30 = vmul.f32 1.442695, %v2824_v52 }
 0x46b   : > { %v3277_v10 = vsel %vm2276_vm2, %v3276_v17, %v3272_v19  ;;  %7585 = vpow2.f32 %v2891_v0 }
 0x46c   : > { %v3085_v2 = vpop.permute.xlu1 %3084  ;;  %v3524_v3 = vsel %vm2557_vm3, %v3286_v33, %v3277_v10  ;;  %7587 = vpow2.f32 %v2895_v62 }
 0x46d   : > { %v3299_v60 = vrot.slane %v3085_v2, %v8665_v43  ;;  %v3525_v54 = vsel %vm2559_vm4, %v3295_v63, %v3524_v3  ;;  %7589 = vpow2.f32 %v2897_v55  ;;  %v10749_v2 = vld [vmem:[#allocation49_spill] sm:$0xff] }
 0x46e   : > { %2615 = vmax.xlane.f32.xlu0 %v2614_v42  ;;  %7591 = vpow2.f32 %v2905_v24 }
 0x46f   : > { %v3304_v61 = vsel %vm2276_vm2, %v3303_v40, %v3299_v60  ;;  %7593 = vpow2.f32 %v2909_v34 }
 0x470   : > { %v3526_v15 = vsel %vm2561_vm5, %v3304_v61, %v3525_v54  ;;  %7595 = vpow2.f32 %v2927_v30  ;;  %v10751_v54 = vld [vmem:[#allocation68_spill] sm:$0xff] }
 0x471   : > { %v3556_v4 = vsel %vm2592_vm6, %v3526_v15, 0.0 }
 0x472   : > { %3557 = vadd.xlane.f32.xlu0 %v3556_v4 }
 0x476   : > { %v9384_v38 = vpop.eup %7581 }
 0x477   : > { %v9393_v39 = vpop.eup %7583 }
 0x478   : > { %v9399_v28 = vpop.eup %7585 }
 0x479   : > { %v9403_v35 = vpop.eup %7587 }
 0x47a   : > { %v9408_v45 = vpop.eup %7589 }
 0x47b   : > { %v9412_v48 = vpop.eup %7591 }
 0x47c   : > { %v9419_v40 = vpop.eup %7593 }
 0x47d   : > { %v9425_v61 = vpop.eup %7595 }
 0x480   : > { %v2610_v14 = vpop.xlane.xlu0 %2609 }
 0x481   : > { %v2708_v19 = vrot.slane %v2610_v14, %v8028_v18  ;;  %v2712_v13 = vrot.slane %v2610_v14, %v8034_v22  ;;  %v2720_v60 = vrot.slane %v2610_v14, %v8053_v32 }
 0x483   : > { %v2825_v17 = vsub.f32 %v8918_v49, %v2708_v19  ;;  %v2826_v56 = vsub.f32 %v8923_v59, %v2708_v19  ;;  %v2827_v33 = vsub.f32 %v8930_v50, %v2712_v13  ;;  %v9416_v49 = vrot.slane %v2610_v14, %v8043_v27  ;;  %v10750_v50 = vld [vmem:[#allocation50_spill] sm:$0xff] }
 0x484   : > { %v2828_v3 = vsub.f32 %v10749_v2, %v2712_v13  ;;  %v2831_v15 = vsub.f32 %v10751_v54, %v2720_v60  ;;  %v2832_v23 = vsub.f32 %v10753_v8, %v2720_v60 }
 0x485   : > { %v2929_v16 = vmul.f32 1.442695, %v2825_v17  ;;  %v2931_v10 = vmul.f32 1.442695, %v2826_v56  ;;  %v2933_v59 = vmul.f32 1.442695, %v2827_v33  ;;  %v2830_v42 = vsub.f32 %v10750_v50, %v9416_v49 }
 0x486   : > { %v2935_v63 = vmul.f32 1.442695, %v2828_v3  ;;  %v2941_v12 = vmul.f32 1.442695, %v2831_v15  ;;  %v2943_v44 = vmul.f32 1.442695, %v2832_v23 }
 0x487   : > { %7597 = vpow2.f32 %v2929_v16  ;;  %v2939_v4 = vmul.f32 1.442695, %v2830_v42  ;;  %v10760_v17 = vld [vmem:[#allocation67_spill] sm:$0xff]  ;;  %v10761_v56 = vld [vmem:[#allocation52_spill] sm:$0xff] }
 0x488   : > { %3090 = vperm.xlu0 %7532, %v9384_v38   ;;  %7599 = vpow2.f32 %v2931_v10 }
 0x489   : > { %7601 = vpow2.f32 %v2933_v59 }
 0x48a   : > { %7603 = vpow2.f32 %v2935_v63 }
 0x48b   : > { %7605 = vpow2.f32 %v2939_v4 }
 0x48c   : > { %3099 = vperm.xlu0 %7532, %v9393_v39   ;;  %7607 = vpow2.f32 %v2941_v12 }
 0x48d   : > { %7609 = vpow2.f32 %v2943_v44  ;;  %v10764_v44 = vld [vmem:[#allocation73_spill] sm:$0xff] }
 0x490   : > { %3105 = vperm.xlu0 %7532, %v9399_v28  }
 0x494   : > { %3111 = vperm.xlu0 %7532, %v9403_v35   ;;  %v9429_v26 = vpop.eup %7597 }
 0x495   : > { %10752 = vst [vmem:[#allocation53_spill] sm:$0xff] %v9429_v26  ;;  %v9433_v29 = vpop.eup %7599 }
 0x496   : > { %10754 = vst [vmem:[#allocation79_spill] sm:$0xff] %v9433_v29  ;;  %v9436_v0 = vpop.eup %7601 }
 0x497   : > { %10755 = vst [vmem:[#allocation57_spill] sm:$0xff] %v9436_v0  ;;  %v9439_v62 = vpop.eup %7603 }
 0x498   : > { %3114 = vperm.xlu0 %7532, %v9408_v45   ;;  %10756 = vst [vmem:[#allocation56_spill] sm:$0xff] %v9439_v62  ;;  %v9442_v57 = vpop.eup %7605 }
 0x499   : > { %10757 = vst [vmem:[#allocation61_spill] sm:$0xff] %v9442_v57  ;;  %v9445_v21 = vpop.eup %7607 }
 0x49a   : > { %10758 = vst [vmem:[#allocation89_spill] sm:$0xff] %v9445_v21  ;;  %v9448_v1 = vpop.eup %7609 }
 0x49b   : > { %10759 = vst [vmem:[#allocation49_spill] sm:$0xff] %v9448_v1 }
 0x49c   : > { %3126 = vperm.xlu0 %7532, %v9412_v48  }
 0x4a0   : > { %3132 = vperm.xlu0 %7532, %v9419_v40  }
 0x4a4   : > { %3159 = vperm.xlu0 %7532, %v9425_v61  }
 0x4a8   : > { %3162 = vperm.xlu0 %7532, %v9429_v26  }
 0x4ac   : > { %3165 = vperm.xlu0 %7532, %v9433_v29  }
 0x4b0   : > { %3168 = vperm.xlu0 %7532, %v9436_v0   ;;  %v3094_v55 = vpop.permute.xlu1 %3093 }
 0x4b4   : > { %3171 = vperm.xlu0 %7532, %v9439_v62   ;;  %v3097_v5 = vpop.permute.xlu1 %3096 }
 0x4b8   : > { %3177 = vperm.xlu0 %7532, %v9442_v57   ;;  %v3103_v24 = vpop.permute.xlu1 %3102 }
 0x4bc   : > { %3180 = vperm.xlu0 %7532, %v9445_v21   ;;  %v3109_v14 = vpop.permute.xlu1 %3108 }
 0x4c0   : > { %3183 = vperm.xlu0 %7532, %v9448_v1  }
 0x4ef   : > { %v2613_v34 = vpop.xlane.xlu1 %2612 }
 0x4f0   : > { %v9452_v52 = vrot.slane %v2613_v34, %v8028_v18  ;;  %v9455_v19 = vrot.slane %v2613_v34, %v8034_v22  ;;  %v9458_v30 = vrot.slane %v2613_v34, %v8043_v27  ;;  %v9465_v2 = vrot.slane %v2613_v34, %v8053_v32 }
 0x4f2   : > { %v2833_v13 = vsub.f32 %v10760_v17, %v9452_v52  ;;  %v2835_v16 = vsub.f32 %v10761_v56, %v9455_v19  ;;  %v2837_v3 = vsub.f32 %v9176_v58, %v9458_v30  ;;  %v2839_v50 = vsub.f32 %v9186_v47, %v9465_v2  ;;  %v10765_v17 = vld [vmem:[#allocation69_spill] sm:$0xff] }
 0x4f3   : > { %v3555_v33 = vpop.xlane.xlu0 %3554 }
 0x4f4   : > { %v2945_v10 = vmul.f32 1.442695, %v2833_v13  ;;  %7611 = vrcp.f32 %v3555_v33  ;;  %v2949_v59 = vmul.f32 1.442695, %v2835_v16  ;;  %v2953_v42 = vmul.f32 1.442695, %v2837_v3 }
 0x4f5   : > { %v2957_v63 = vmul.f32 1.442695, %v2839_v50  ;;  %v3317_v33 = vrot.slane %v3097_v5, %v8665_v43  ;;  %v3312_v50 = vrot.slane %v3094_v55, %v8668_v31 }
 0x4f6   : > { %7613 = vpow2.f32 %v2945_v10 }
 0x4f7   : > { %v9469_v60 = vpop.xlane.xlu0 %2615  ;;  %7615 = vpow2.f32 %v2949_v59  ;;  %v3326_v59 = vrot.slane %v3103_v24, %v8665_v43 }
 0x4f8   : > { %7617 = vpow2.f32 %v2953_v42 }
 0x4f9   : > { %7619 = vpow2.f32 %v2957_v63 }
 0x4fb   : > { %v9473_v54 = vpop.xlane.xlu0 %3557 }
 0x501   : > { %v9475_v15 = vpop.eup %7611 }
 0x502   : > { %v3596_v58 = vrot.slane %v9475_v15, %v8028_v18 }
 0x503   : > { %v9477_v4 = vpop.eup %7613  ;;  %v3091_v8 = vpop.permute.xlu0 %3090 }
 0x504   : > { %10762 = vst [vmem:[#allocation50_spill] sm:$0xff] %v9477_v4  ;;  %3186 = vperm.xlu0 %7532, %v9477_v4   ;;  %v9482_v23 = vpop.eup %7615  ;;  %v3753_v34 = vmul.f32 %v10764_v44, %v3596_v58  ;;  %v3754_v13 = vmul.f32 %v10765_v17, %v3596_v58  ;;  %v3308_v10 = vrot.slane %v3091_v8, %v8665_v43  ;;  %v10768_v44 = vld [vmem:[#allocation47_spill] sm:$0xff] }
 0x505   : > { %10763 = vst [vmem:[#allocation68_spill] sm:$0xff] %v9482_v23  ;;  %v9488_v56 = vpop.eup %7617  ;;  %v2810_v17 = vsub.f32 %v10768_v44, %v9370_v46 }
 0x506   : > { %10766 = vst [vmem:[#allocation51_spill] sm:$0xff] %v9488_v56  ;;  %v9497_v63 = vpack.c.bf16 %v3754_v13, %v3753_v34  ;;  %v9499_v58 = vpop.eup %7619  ;;  %v3313_v24 = vsel %vm2276_vm2, %v3312_v50, %v3308_v10  ;;  %v10770_v10 = vld [vmem:[#allocation91_spill] sm:$0xff] }
 0x507   : > { %v3100_v47 = vpop.permute.xlu0 %3099  ;;  %10767 = vst [vmem:[#allocation67_spill] sm:$0xff] %v9499_v58 }
 0x508   : > { %3192 = vperm.xlu0 %7532, %v9482_v23   ;;  %v3321_v12 = vrot.slane %v3100_v47, %v8668_v31  ;;  %v2680_v47 = vrot.slane %v9271_v25, %v8034_v22  ;;  %v3850_v34 = vunpack.c.l.b16 %v9497_v63 }
 0x50a   : > { %v3322_v42 = vsel %vm2276_vm2, %v3321_v12, %v3317_v33  ;;  %v2812_v50 = vsub.f32 %v10770_v10, %v2680_v47 }
 0x50b   : > { %v3106_v16 = vpop.permute.xlu0 %3105  ;;  %v3527_v12 = vsel %vm2557_vm3, %v3322_v42, %v3313_v24  ;;  %v10771_v42 = vld [vmem:[#allocation92_spill] sm:$0xff] }
 0x50c   : > { %v3330_v3 = vrot.slane %v3106_v16, %v8668_v31  ;;  %3198 = vperm.xlu0 %7532, %v9488_v56   ;;  %v3335_v16 = vrot.slane %v3109_v14, %v8665_v43  ;;  %v2814_v44 = vsub.f32 %v10771_v42, %v9374_v6  ;;  %v2696_v6 = vrot.slane %v9275_v36, %v8034_v22 }
 0x50e   : > { %v3331_v5 = vsel %vm2276_vm2, %v3330_v3, %v3326_v59  ;;  %v10769_v3 = vld [vmem:[#allocation90_spill] sm:$0xff]  ;;  %v2899_v59 = vmul.f32 1.442695, %v2810_v17  ;;  %v2692_v17 = vrot.slane %v9275_v36, %v8028_v18 }
 0x50f   : > { %v3112_v8 = vpop.permute.xlu0 %3111  ;;  %v3528_v13 = vsel %vm2559_vm4, %v3331_v5, %v3527_v12  ;;  %v2811_v46 = vsub.f32 %v10769_v3, %v2680_v47  ;;  %v10772_v5 = vld [vmem:[#allocation93_spill] sm:$0xff] }
 0x510   : > { %v3339_v55 = vrot.slane %v3112_v8, %v8668_v31  ;;  %3204 = vperm.xlu0 %7532, %v9499_v58   ;;  %7621 = vpow2.f32 %v2899_v59  ;;  %v2816_v24 = vsub.f32 %v10772_v5, %v9380_v53  ;;  %v10777_v5 = vld [vmem:[#allocation96_spill] sm:$0xff] }
 0x511   : > { %v2901_v8 = vmul.f32 1.442695, %v2811_v46  ;;  %v10775_v46 = vld [vmem:[#allocation95_spill] sm:$0xff] }
 0x512   : > { %v3340_v25 = vsel %vm2276_vm2, %v3339_v55, %v3335_v16  ;;  %v2903_v16 = vmul.f32 1.442695, %v2812_v50  ;;  %v2907_v55 = vmul.f32 1.442695, %v2814_v44  ;;  %v2911_v12 = vmul.f32 1.442695, %v2816_v24 }
 0x513   : > { %v3529_v33 = vsel %vm2561_vm5, %v3340_v25, %v3528_v13  ;;  %7623 = vpow2.f32 %v2901_v8  ;;  %v10774_v13 = vld [vmem:[#allocation65_spill] sm:$0xff]  ;;  %v2819_v59 = vsub.f32 %v10775_v46, %v2696_v6  ;;  %v2700_v50 = vrot.slane %v9275_v36, %v8043_v27  ;;  %v10776_v8 = vld [vmem:[#allocation48_spill] sm:$0xff] }
 0x514   : > { %3853 = vperm.xlu0 %7532, %v3850_v34   ;;  %v3559_v14 = vsel %vm2592_vm6, %v3529_v33, 0.0  ;;  %7625 = vpow2.f32 %v2903_v16  ;;  %v10773_v34 = vld [vmem:[#allocation94_spill] sm:$0xff]  ;;  %v2818_v33 = vsub.f32 %v10774_v13, %v2692_v17  ;;  %v2820_v42 = vsub.f32 %v10776_v8, %v2696_v6  ;;  %v10779_v6 = vld [vmem:[#allocation97_spill] sm:$0xff] }
 0x515   : > { %3560 = vadd.xlane.f32.xlu1 %v3559_v14  ;;  %7627 = vpow2.f32 %v2907_v55  ;;  %v2817_v25 = vsub.f32 %v10773_v34, %v2692_v17  ;;  %v2917_v44 = vmul.f32 1.442695, %v2819_v59  ;;  %v2821_v24 = vsub.f32 %v10777_v5, %v2700_v50  ;;  %v10780_v59 = vld [vmem:[#allocation66_spill] sm:$0xff] }
 0x516   : > { %7629 = vpow2.f32 %v2911_v12  ;;  %v2915_v14 = vmul.f32 1.442695, %v2818_v33  ;;  %v2919_v55 = vmul.f32 1.442695, %v2820_v42  ;;  %v10778_v12 = vld [vmem:[#allocation63_spill] sm:$0xff]  ;;  %v2823_v13 = vsub.f32 %v10779_v6, %v9391_v51 }
 0x517   : > { %v2913_v53 = vmul.f32 1.442695, %v2817_v25  ;;  %v2822_v34 = vsub.f32 %v10778_v12, %v2700_v50  ;;  %v2921_v36 = vmul.f32 1.442695, %v2821_v24  ;;  %v3115_v24 = vpop.permute.xlu0 %3114 }
 0x518   : > { %v2925_v46 = vmul.f32 1.442695, %v2823_v13  ;;  %v3344_v4 = vrot.slane %v3115_v24, %v8665_v43 }
 0x519   : > { %7631 = vpow2.f32 %v2913_v53  ;;  %v2923_v33 = vmul.f32 1.442695, %v2822_v34 }
 0x51a   : > { %7633 = vpow2.f32 %v2915_v14  ;;  %v2829_v14 = vsub.f32 %v10780_v59, %v9416_v49 }
 0x51b   : > { %7635 = vpow2.f32 %v2917_v44 }
 0x51c   : > { %7637 = vpow2.f32 %v2919_v55  ;;  %v2937_v8 = vmul.f32 1.442695, %v2829_v14  ;;  %v3127_v55 = vpop.permute.xlu0 %3126 }
 0x51d   : > { %v9525_v47 = vpop.eup %7621  ;;  %7639 = vpow2.f32 %v2921_v36  ;;  %v3362_v23 = vrot.slane %v3127_v55, %v8665_v43 }
 0x51e   : > { %7641 = vpow2.f32 %v2923_v33 }
 0x51f   : > { %7643 = vpow2.f32 %v2925_v46 }
 0x520   : > { %v9531_v3 = vpop.eup %7623  ;;  %7645 = vpow2.f32 %v2937_v8  ;;  %v3133_v34 = vpop.permute.xlu0 %3132 }
 0x521   : > { %v9535_v10 = vpop.eup %7625  ;;  %v3371_v62 = vrot.slane %v3133_v34, %v8665_v43  ;;  %7647 = vrcp.f32 %v9473_v54 }
 0x522   : > { %v9541_v16 = vpop.eup %7627 }
 0x523   : > { %v9545_v17 = vpop.eup %7629 }
 0x524   : > { %v3160_v6 = vpop.permute.xlu0 %3159 }
 0x526   : > { %3117 = vperm.xlu1 %7531, %v9525_v47   ;;  %v9549_v25 = vpop.eup %7631 }
 0x527   : > { %v9554_v53 = vpop.eup %7633 }
 0x528   : > { %v9559_v50 = vpop.eup %7635  ;;  %v9579_v46 = vpop.permute.xlu0 %3162 }
 0x529   : > { %v9562_v42 = vpop.eup %7637 }
 0x52a   : > { %3120 = vperm.xlu1 %7531, %v9531_v3   ;;  %v9565_v51 = vpop.eup %7639 }
 0x52b   : > { %v9568_v44 = vpop.eup %7641 }
 0x52c   : > { %v9571_v49 = vpop.eup %7643  ;;  %v3166_v1 = vpop.permute.xlu0 %3165 }
 0x52d   : > { %v9574_v5 = vpop.eup %7645 }
 0x52e   : > { %3123 = vperm.xlu1 %7531, %v9535_v10   ;;  %10781 = vst [vmem:[#allocation52_spill] sm:$0xff] %v9574_v5 }
 0x530   : > { %v3169_v29 = vpop.permute.xlu0 %3168 }
 0x532   : > { %3129 = vperm.xlu1 %7531, %v9541_v16  }
 0x536   : > { %3135 = vperm.xlu1 %7531, %v9545_v17  }
 0x53a   : > { %3138 = vperm.xlu1 %7531, %v9549_v25  }
 0x53e   : > { %3141 = vperm.xlu1 %7531, %v9554_v53  }
 0x542   : > { %3144 = vperm.xlu1 %7531, %v9559_v50  }
 0x546   : > { %3147 = vperm.xlu1 %7531, %v9562_v42  }
 0x54a   : > { %3150 = vperm.xlu1 %7531, %v9565_v51  }
 0x54e   : > { %3153 = vperm.xlu1 %7531, %v9568_v44  }
 0x552   : > { %3156 = vperm.xlu1 %7531, %v9571_v49  }
 0x556   : > { %3174 = vperm.xlu1 %7531, %v9574_v5  }
 0x59e   : > { %v9577_v12 = vpop.xlane.xlu1 %3560 }
 0x5a2   : > { %v3118_v36 = vpop.permute.xlu1 %3117 }
 0x5a3   : > { %v3348_v8 = vrot.slane %v3118_v36, %v8668_v31 }
 0x5a6   : > { %v3121_v13 = vpop.permute.xlu1 %3120 }
 0x5a7   : > { %v3353_v58 = vrot.slane %v3121_v13, %v8665_v43 }
 0x5aa   : > { %v3124_v33 = vpop.permute.xlu1 %3123 }
 0x5ab   : > { %v3357_v59 = vrot.slane %v3124_v33, %v8668_v31  ;;  %v3349_v33 = vsel %vm2276_vm2, %v3348_v8, %v3344_v4 }
 0x5ad   : > { %v3358_v21 = vsel %vm2276_vm2, %v3357_v59, %v3353_v58 }
 0x5ae   : > { %v3130_v14 = vpop.permute.xlu1 %3129  ;;  %v3530_v13 = vsel %vm2557_vm3, %v3358_v21, %v3349_v33 }
 0x5af   : > { %v3366_v56 = vrot.slane %v3130_v14, %v8668_v31 }
 0x5b1   : > { %v3367_v57 = vsel %vm2276_vm2, %v3366_v56, %v3362_v23  ;;  %v3172_v56 = vpop.permute.xlu0 %3171 }
 0x5b2   : > { %v3136_v5 = vpop.permute.xlu1 %3135  ;;  %v3531_v55 = vsel %vm2559_vm4, %v3367_v57, %v3530_v13 }
 0x5b3   : > { %v3375_v36 = vrot.slane %v3136_v5, %v8668_v31 }
 0x5b5   : > { %v3376_v14 = vsel %vm2276_vm2, %v3375_v36, %v3371_v62  ;;  %v3178_v4 = vpop.permute.xlu0 %3177 }
 0x5b6   : > { %v3139_v0 = vpop.permute.xlu1 %3138  ;;  %v3532_v24 = vsel %vm2561_vm5, %v3376_v14, %v3531_v55 }
 0x5b7   : > { %v3562_v58 = vsel %vm2592_vm6, %v3532_v24, 0.0  ;;  %v3380_v14 = vrot.slane %v3139_v0, %v8665_v43  ;;  %v3429_v24 = vrot.slane %v3172_v56, %v8668_v31  ;;  %v3420_v0 = vrot.slane %v3166_v1, %v8668_v31 }
 0x5b8   : > { %3563 = vadd.xlane.f32.xlu0 %v3562_v58  ;;  %v3425_v56 = vrot.slane %v3169_v29, %v8665_v43 }
 0x5b9   : > { %v3181_v5 = vpop.permute.xlu0 %3180 }
 0x5ba   : > { %v3142_v23 = vpop.permute.xlu1 %3141 }
 0x5bb   : > { %v3384_v62 = vrot.slane %v3142_v23, %v8668_v31  ;;  %v3411_v23 = vrot.slane %v3160_v6, %v8668_v31 }
 0x5be   : > { %v3145_v34 = vpop.permute.xlu1 %3144 }
 0x5bf   : > { %v3389_v57 = vrot.slane %v3145_v34, %v8665_v43  ;;  %v3184_v34 = vpop.permute.xlu0 %3183 }
 0x5c0   : > { %v3447_v54 = vrot.slane %v3184_v34, %v8668_v31 }
 0x5c2   : > { %v3148_v59 = vpop.permute.xlu1 %3147 }
 0x5c3   : > { %v3393_v21 = vrot.slane %v3148_v59, %v8668_v31  ;;  %v9608_v59 = vrot.slane %v9469_v60, %v8043_v27 }
 0x5c5   : > { %v3394_v55 = vsel %vm2276_vm2, %v3393_v21, %v3389_v57  ;;  %v2834_v57 = vsub.f32 %v9160_v11, %v9452_v52  ;;  %v2846_v29 = vsub.f32 %v9103_v7, %v9608_v59 }
 0x5c6   : > { %v3151_v8 = vpop.permute.xlu1 %3150 }
 0x5c7   : > { %v3398_v13 = vrot.slane %v3151_v8, %v8665_v43 }
 0x5ca   : > { %v3154_v33 = vpop.permute.xlu1 %3153 }
 0x5cb   : > { %v3402_v36 = vrot.slane %v3154_v33, %v8668_v31  ;;  %v3385_v33 = vsel %vm2276_vm2, %v3384_v62, %v3380_v14  ;;  %v3416_v62 = vrot.slane %v9579_v46, %v8665_v43  ;;  %v3438_v14 = vrot.slane %v3178_v4, %v8668_v31 }
 0x5cc   : > { %v3533_v21 = vsel %vm2557_vm3, %v3394_v55, %v3385_v33  ;;  %v3443_v46 = vrot.slane %v3181_v5, %v8665_v43  ;;  %v2971_v33 = vmul.f32 1.442695, %v2846_v29  ;;  %v10783_v5 = vld [vmem:[#allocation72_spill] sm:$0xff] }
 0x5cd   : > { %v3403_v58 = vsel %vm2276_vm2, %v3402_v36, %v3398_v13  ;;  %v3421_v55 = vsel %vm2276_vm2, %v3420_v0, %v3416_v62 }
 0x5ce   : > { %v3157_v26 = vpop.permute.xlu1 %3156  ;;  %v3534_v6 = vsel %vm2559_vm4, %v3403_v58, %v3533_v21  ;;  %v3448_v34 = vsel %vm2276_vm2, %v3447_v54, %v3443_v46  ;;  %v2838_v21 = vsub.f32 %v10783_v5, %v9458_v30 }
 0x5cf   : > { %v3407_v8 = vrot.slane %v3157_v26, %v8665_v43  ;;  %v3430_v26 = vsel %vm2276_vm2, %v3429_v24, %v3425_v56 }
 0x5d0   : > { %v3536_v58 = vsel %vm2557_vm3, %v3430_v26, %v3421_v55  ;;  %v2955_v26 = vmul.f32 1.442695, %v2838_v21 }
 0x5d1   : > { %v3412_v36 = vsel %vm2276_vm2, %v3411_v23, %v3407_v8  ;;  %v2947_v23 = vmul.f32 1.442695, %v2834_v57  ;;  %v10782_v8 = vld [vmem:[#allocation71_spill] sm:$0xff]  ;;  %v9644_v57 = vpop.eup %7647 }
 0x5d2   : > { %v3175_v13 = vpop.permute.xlu1 %3174  ;;  %v3535_v1 = vsel %vm2561_vm5, %v3412_v36, %v3534_v6  ;;  %v2836_v56 = vsub.f32 %v10782_v8, %v9455_v19  ;;  %v10784_v6 = vld [vmem:[#allocation70_spill] sm:$0xff]  ;;  %v3612_v19 = vrot.slane %v9644_v57, %v8028_v18  ;;  %v3624_v30 = vrot.slane %v9644_v57, %v8053_v32 }
 0x5d3   : > { %v3434_v11 = vrot.slane %v3175_v13, %v8665_v43  ;;  %v3565_v52 = vsel %vm2592_vm6, %v3535_v1, 0.0  ;;  %7649 = vpow2.f32 %v2947_v23  ;;  %v2840_v62 = vsub.f32 %v10784_v6, %v9465_v2 }
 0x5d4   : > { %3566 = vadd.xlane.f32.xlu0 %v3565_v52  ;;  %7651 = vpow2.f32 %v2971_v33  ;;  %v2951_v36 = vmul.f32 1.442695, %v2836_v56  ;;  %v3761_v13 = vmul.f32 %v9142_v37, %v3612_v19  ;;  %v3762_v1 = vmul.f32 %v9195_v9, %v3612_v19  ;;  %v10787_v56 = vld [vmem:[#allocation85_spill] sm:$0xff] }
 0x5d5   : > { %v3439_v24 = vsel %vm2276_vm2, %v3438_v14, %v3434_v11  ;;  %7653 = vrcp.f32 %v9577_v12  ;;  %v2959_v54 = vmul.f32 1.442695, %v2840_v62  ;;  %v3767_v14 = vmul.f32 %v9209_v41, %v3624_v30  ;;  %v10789_v62 = vld [vmem:[#allocation76_spill] sm:$0xff] }
 0x5d6   : > { %v3537_v7 = vsel %vm2559_vm4, %v3439_v24, %v3536_v58  ;;  %7655 = vpow2.f32 %v2951_v36  ;;  %v9658_v2 = vpack.c.bf16 %v3762_v1, %v3761_v13  ;;  %v3768_v11 = vmul.f32 %v9170_v20, %v3624_v30  ;;  %v10785_v20 = vld [vmem:[#allocation83_spill] sm:$0xff] }
 0x5d7   : > { %v3538_v4 = vsel %vm2561_vm5, %v3448_v34, %v3537_v7  ;;  %7657 = vpow2.f32 %v2955_v26  ;;  %v2740_v37 = vrot.slane %v9469_v60, %v8028_v18  ;;  %v10786_v34 = vld [vmem:[#allocation62_spill] sm:$0xff]  ;;  %v3600_v33 = vrot.slane %v9475_v15, %v8034_v22 }
 0x5d8   : > { %v3568_v0 = vsel %vm2592_vm6, %v3538_v4, 0.0  ;;  %7659 = vpow2.f32 %v2959_v54  ;;  %v4098_v9 = vunpack.c.l.b16 %v9658_v2  ;;  %v3824_v55 = vpack.c.bf16 %v3768_v11, %v3767_v14  ;;  %v10790_v54 = vld [vmem:[#allocation80_spill] sm:$0xff] }
 0x5d9   : > { %3569 = vadd.xlane.f32.xlu1 %v3568_v0  ;;  %v2841_v41 = vsub.f32 %v10785_v20, %v2740_v37  ;;  %v2744_v8 = vrot.slane %v9469_v60, %v8034_v22  ;;  %v2842_v0 = vsub.f32 %v10787_v56, %v2740_v37  ;;  %v3756_v26 = vmul.f32 %v10789_v62, %v3600_v33 }
 0x5da   : > { %v4284_v58 = vunpack.c.l.b16 %v3824_v55  ;;  %v4285_v21 = vunpack.c.h.b16 %v3824_v55  ;;  %v3851_v14 = vunpack.c.h.b16 %v9497_v63  ;;  %v7805_v37 = vmov 0.0   ;;  %v10793_v63 = vld [vmem:[#allocation31_spill] sm:$0xff] }
 0x5db   : > { %v2961_v5 = vmul.f32 1.442695, %v2841_v41  ;;  %v2843_v13 = vsub.f32 %v10790_v54, %v2744_v8  ;;  %v2963_v1 = vmul.f32 1.442695, %v2842_v0  ;;  %7263 = vmatprep.subr.bf16.mxu1 %v7805_v37  ;;  %7365 = vmatprep.subr.bf16.mxu0 %v7805_v37  ;;  %v10792_v41 = vld [vmem:[#allocation13_spill] sm:$0xff]  ;;  %v3604_v54 = vrot.slane %v9475_v15, %v8043_v27 }
 0x5dc   : > { %7264 = vmatpush3.bf16.msra.mxu1 %v10792_v41  ;;  %7265 = vmatprep.mubr.msk.bf16.mxu1 %vm7806_vm7, %v7805_v37 }
 0x5dd   : > { %7661 = vpow2.f32 %v2961_v5  ;;  %7269 = vmatprep.subr.bf16.mxu1 %v7805_v37  ;;  %7366 = vmatpush3.bf16.msra.mxu0 %v10793_v63  ;;  %v10799_v63 = vld [vmem:[#allocation74_spill] sm:$0xff] }
 0x5de   : > { %7663 = vpow2.f32 %v2963_v1  ;;  %7367 = vmatprep.mubr.msk.bf16.mxu0 %vm7806_vm7, %v7805_v37  ;;  %7377 = vmatprep.subr.bf16.mxu0 %v7805_v37  ;;  %v10797_v1 = vld [vmem:[#allocation59_spill] sm:$0xff] }
 0x5e0   : > { %v9654_v12 = vpop.eup %7649 }
 0x5e1   : > { %v9656_v29 = vpop.eup %7651 }
 0x5e2   : > { %v9662_v52 = vpop.eup %7653 }
 0x5e3   : > { %v3628_v46 = vrot.slane %v9662_v52, %v8028_v18  ;;  %v9671_v24 = vpop.eup %7655 }
 0x5e4   : > { %v9679_v4 = vpop.eup %7657 }
 0x5e5   : > { %v3769_v23 = vmul.f32 %v9384_v38, %v3628_v46  ;;  %v3770_v7 = vmul.f32 %v10786_v34, %v3628_v46  ;;  %v10788_v38 = vld [vmem:[#allocation60_spill] sm:$0xff]  ;;  %v9689_v19 = vpop.eup %7659  ;;  %v2965_v46 = vmul.f32 1.442695, %v2843_v13 }
 0x5e6   : > { %v3755_v6 = vmul.f32 %v10788_v38, %v3600_v33 }
 0x5e7   : > { %v9685_v36 = vpack.c.bf16 %v3770_v7, %v3769_v23  ;;  %v10794_v23 = vld [vmem:[#allocation82_spill] sm:$0xff]  ;;  %7665 = vpow2.f32 %v2965_v46  ;;  %v3608_v46 = vrot.slane %v9475_v15, %v8053_v32 }
 0x5e8   : > { %v3818_v11 = vpack.c.bf16 %v3756_v26, %v3755_v6  ;;  %v2845_v34 = vsub.f32 %v10794_v23, %v9608_v59  ;;  %v10800_v23 = vld [vmem:[#allocation81_spill] sm:$0xff]  ;;  %v10801_v15 = vld [vmem:[#allocation58_spill] sm:$0xff] }
 0x5e9   : > { %v4347_v30 = vunpack.c.h.b16 %v9685_v36 }
 0x5ea   : > { %3225 = vperm.xlu0 %7532, %v9656_v29   ;;  %3189 = vperm.xlu1 %7531, %v9654_v12   ;;  %v3912_v20 = vunpack.c.l.b16 %v3818_v11  ;;  %v3913_v33 = vunpack.c.h.b16 %v3818_v11  ;;  %v2969_v0 = vmul.f32 1.442695, %v2845_v34  ;;  %v9711_v5 = vpop.eup %7661  ;;  %v3760_v34 = vmul.f32 %v10800_v23, %v3608_v46 }
 0x5eb   : > { %v9715_v6 = vpop.eup %7663  ;;  %v3632_v23 = vrot.slane %v9662_v52, %v8034_v22 }
 0x5ee   : > { %4101 = vperm.xlu0 %7532, %v4098_v9   ;;  %3195 = vperm.xlu1 %7531, %v9671_v24   ;;  %v10791_v9 = vld [vmem:[#allocation86_spill] sm:$0xff] }
 0x5ef   : > { %v2844_v55 = vsub.f32 %v10791_v9, %v2744_v8  ;;  %v10795_v8 = vld [vmem:[#allocation87_spill] sm:$0xff] }
 0x5f1   : > { %v2967_v7 = vmul.f32 1.442695, %v2844_v55 }
 0x5f2   : > { %4287 = vperm.xlu0 %7532, %v4284_v58   ;;  %3201 = vperm.xlu1 %7531, %v9679_v4   ;;  %v2752_v58 = vrot.slane %v9469_v60, %v8053_v32 }
 0x5f3   : > { %7667 = vpow2.f32 %v2967_v7 }
 0x5f4   : > { %v2847_v56 = vsub.f32 %v10795_v8, %v2752_v58  ;;  %7669 = vpow2.f32 %v2969_v0  ;;  %v9718_v62 = vpop.eup %7665 }
 0x5f6   : > { %4290 = vperm.xlu0 %7532, %v4285_v21   ;;  %3207 = vperm.xlu1 %7531, %v9689_v19   ;;  %v10796_v21 = vld [vmem:[#allocation84_spill] sm:$0xff]  ;;  %v2973_v60 = vmul.f32 1.442695, %v2847_v56  ;;  %v3616_v56 = vrot.slane %v9644_v57, %v8034_v22 }
 0x5f7   : > { %v2848_v38 = vsub.f32 %v10796_v21, %v2752_v58  ;;  %v3759_v58 = vmul.f32 %v10799_v63, %v3608_v46 }
 0x5f8   : > { %7671 = vpow2.f32 %v2973_v60  ;;  %v3763_v21 = vmul.f32 %v10801_v15, %v3616_v56  ;;  %v10806_v15 = vld [vmem:[#allocation64_spill] sm:$0xff] }
 0x5f9   : > { %v2975_v59 = vmul.f32 1.442695, %v2848_v38  ;;  %v10802_v38 = vld [vmem:[#allocation88_spill] sm:$0xff] }
 0x5fa   : > { %4352 = vperm.xlu0 %7532, %v4347_v30   ;;  %3856 = vperm.xlu1 %7531, %v3851_v14   ;;  %v3757_v30 = vmul.f32 %v10797_v1, %v3604_v54  ;;  %v10798_v14 = vld [vmem:[#allocation78_spill] sm:$0xff]  ;;  %v3764_v60 = vmul.f32 %v10802_v38, %v3616_v56  ;;  %v3620_v1 = vrot.slane %v9644_v57, %v8043_v27 }
 0x5fb   : > { %7673 = vpow2.f32 %v2975_v59  ;;  %v3758_v11 = vmul.f32 %v10798_v14, %v3604_v54  ;;  %v4099_v59 = vunpack.c.h.b16 %v9658_v2  ;;  %v10803_v14 = vld [vmem:[#allocation55_spill] sm:$0xff]  ;;  %v3772_v57 = vmul.f32 %v9393_v39, %v3632_v23 }
 0x5fc   : > { %v3822_v54 = vpack.c.bf16 %v3764_v60, %v3763_v21  ;;  %v3636_v56 = vrot.slane %v9662_v52, %v8043_v27 }
 0x5fd   : > { %v3819_v55 = vpack.c.bf16 %v3758_v11, %v3757_v30  ;;  %v3765_v11 = vmul.f32 %v10803_v14, %v3620_v1 }
 0x5fe   : > { %3915 = vperm.xlu1 %7531, %v3912_v20   ;;  %v4160_v30 = vunpack.c.l.b16 %v3822_v54  ;;  %v3773_v21 = vmul.f32 %v10806_v15, %v3636_v56  ;;  %v3774_v38 = vmul.f32 %v9399_v28, %v3636_v56 }
 0x5ff   : > { %v3974_v41 = vunpack.c.l.b16 %v3819_v55  ;;  %v3975_v7 = vunpack.c.h.b16 %v3819_v55  ;;  %v10804_v55 = vld [vmem:[#allocation54_spill] sm:$0xff] }
 0x600   : > { %v9721_v26 = vpop.eup %7667  ;;  %v3766_v46 = vmul.f32 %v10804_v55, %v3620_v1  ;;  %v3187_v1 = vpop.permute.xlu0 %3186 }
 0x601   : > { %v9726_v13 = vpop.eup %7669 }
 0x602   : > { %3918 = vperm.xlu1 %7531, %v3913_v33   ;;  %v3820_v33 = vpack.c.bf16 %v3760_v34, %v3759_v58  ;;  %v3823_v63 = vpack.c.bf16 %v3766_v46, %v3765_v11  ;;  %v10805_v34 = vld [vmem:[#allocation75_spill] sm:$0xff] }
 0x604   : > { %v4036_v8 = vunpack.c.l.b16 %v3820_v33  ;;  %v4037_v0 = vunpack.c.h.b16 %v3820_v33  ;;  %v4222_v58 = vunpack.c.l.b16 %v3823_v63  ;;  %v4223_v2 = vunpack.c.h.b16 %v3823_v63 }
 0x605   : > { %v9731_v9 = vpop.eup %7671  ;;  %v4346_v33 = vunpack.c.l.b16 %v9685_v36  ;;  %v3193_v36 = vpop.permute.xlu0 %3192 }
 0x606   : > { %3210 = vperm.xlu1 %7531, %v9711_v5   ;;  %v3461_v28 = vrot.slane %v3193_v36, %v8665_v43 }
 0x608   : > { %v9736_v20 = vpop.eup %7673 }
 0x609   : > { %v3199_v14 = vpop.permute.xlu0 %3198 }
 0x60a   : > { %3213 = vperm.xlu1 %7531, %v9715_v6  }
 0x60d   : > { %v3205_v46 = vpop.permute.xlu0 %3204 }
 0x60e   : > { %3216 = vperm.xlu1 %7531, %v9718_v62   ;;  %v3479_v56 = vrot.slane %v3205_v46, %v8665_v43 }
 0x612   : > { %3219 = vperm.xlu1 %7531, %v9721_v26  }
 0x616   : > { %3222 = vperm.xlu1 %7531, %v9726_v13  }
 0x61a   : > { %3228 = vperm.xlu1 %7531, %v9731_v9  }
 0x61e   : > { %3231 = vperm.xlu1 %7531, %v9736_v20  }
 0x622   : > { %3977 = vperm.xlu1 %7531, %v3974_v41   ;;  %v4161_v41 = vunpack.c.h.b16 %v3822_v54 }
 0x626   : > { %3980 = vperm.xlu1 %7531, %v3975_v7   ;;  %v3771_v7 = vmul.f32 %v10805_v34, %v3632_v23  ;;  %v3452_v34 = vrot.slane %v3187_v1, %v8665_v43 }
 0x62a   : > { %4039 = vperm.xlu1 %7531, %v4036_v8   ;;  %v3826_v8 = vpack.c.bf16 %v3772_v57, %v3771_v7  ;;  %v3854_v7 = vpop.permute.xlu0 %3853 }
 0x62b   : > { %v3861_v1 = vrot.slane %v3854_v7, %v8665_v43 }
 0x62c   : > { %v4409_v60 = vunpack.c.h.b16 %v3826_v8 }
 0x62e   : > { %4042 = vperm.xlu1 %7531, %v4037_v0   ;;  %v4408_v0 = vunpack.c.l.b16 %v3826_v8 }
 0x632   : > { %4104 = vperm.xlu1 %7531, %v4099_v59   ;;  %v3827_v59 = vpack.c.bf16 %v3774_v38, %v3773_v21 }
 0x634   : > { %v4470_v54 = vunpack.c.l.b16 %v3827_v59  ;;  %v4471_v39 = vunpack.c.h.b16 %v3827_v59 }
 0x636   : > { %4163 = vperm.xlu1 %7531, %v4160_v30  }
 0x63a   : > { %4166 = vperm.xlu1 %7531, %v4161_v41  }
 0x63e   : > { %4225 = vperm.xlu1 %7531, %v4222_v58  }
 0x641   : > { %v3564_v38 = vpop.xlane.xlu0 %3563 }
 0x642   : > { %4228 = vperm.xlu1 %7531, %v4223_v2   ;;  %v3470_v2 = vrot.slane %v3199_v14, %v8665_v43  ;;  %7675 = vrcp.f32 %v3564_v38 }
 0x646   : > { %4349 = vperm.xlu1 %7531, %v4346_v33  }
 0x64a   : > { %4411 = vperm.xlu1 %7531, %v4408_v0  }
 0x64e   : > { %4414 = vperm.xlu1 %7531, %v4409_v60  }
 0x652   : > { %4473 = vperm.xlu1 %7531, %v4470_v54  }
 0x656   : > { %4476 = vperm.xlu1 %7531, %v4471_v39  }
 0x662   : > { %v9759_v30 = vpop.xlane.xlu1 %3569 }
 0x666   : > { %v3190_v11 = vpop.permute.xlu1 %3189 }
 0x667   : > { %v3456_v58 = vrot.slane %v3190_v11, %v8668_v31 }
 0x669   : > { %v3457_v0 = vsel %vm2276_vm2, %v3456_v58, %v3452_v34 }
 0x66a   : > { %v3196_v55 = vpop.permute.xlu1 %3195 }
 0x66b   : > { %v3465_v41 = vrot.slane %v3196_v55, %v8668_v31 }
 0x66d   : > { %v3466_v57 = vsel %vm2276_vm2, %v3465_v41, %v3461_v28  ;;  %v10807_v41 = vld [vmem:[#allocation14_spill] sm:$0xff] }
 0x66e   : > { %v3202_v63 = vpop.permute.xlu1 %3201  ;;  %v3539_v21 = vsel %vm2557_vm3, %v3466_v57, %v3457_v0  ;;  %v10808_v57 = vld [vmem:[#allocation77_spill] sm:$0xff]  ;;  %v10809_v0 = vld [vmem:[#allocation15_spill] sm:$0xff] }
 0x66f   : > { %v3474_v23 = vrot.slane %v3202_v63, %v8668_v31 }
 0x671   : > { %v3475_v33 = vsel %vm2276_vm2, %v3474_v23, %v3470_v2  ;;  %v3640_v23 = vrot.slane %v9662_v52, %v8053_v32 }
 0x672   : > { %v3208_v8 = vpop.permute.xlu1 %3207  ;;  %v3540_v59 = vsel %vm2559_vm4, %v3475_v33, %v3539_v21 }
 0x673   : > { %v3483_v15 = vrot.slane %v3208_v8, %v8668_v31  ;;  %v3775_v33 = vmul.f32 %v10808_v57, %v3640_v23  ;;  %v3776_v8 = vmul.f32 %v9403_v35, %v3640_v23 }
 0x675   : > { %v3484_v60 = vsel %vm2276_vm2, %v3483_v15, %v3479_v56  ;;  %v7676_v56 = vpop.eup %7675  ;;  %v3828_v52 = vpack.c.bf16 %v3776_v8, %v3775_v33 }
 0x676   : > { %v3857_v54 = vpop.permute.xlu1 %3856  ;;  %v3541_v39 = vsel %vm2561_vm5, %v3484_v60, %v3540_v59  ;;  %v3644_v21 = vrot.slane %v7676_v56, %v8028_v18 }
 0x677   : > { %v3865_v36 = vrot.slane %v3857_v54, %v8668_v31  ;;  %v3571_v14 = vsel %vm2592_vm6, %v3541_v39, 0.0  ;;  %v4532_v60 = vunpack.c.l.b16 %v3828_v52  ;;  %v3567_v39 = vpop.xlane.xlu0 %3566 }
 0x678   : > { %3572 = vadd.xlane.f32.xlu0 %v3571_v14  ;;  %v3777_v59 = vmul.f32 %v9408_v45, %v3644_v21  ;;  %v3778_v54 = vmul.f32 %v9525_v47, %v3644_v21  ;;  %7677 = vrcp.f32 %v3567_v39  ;;  %v3648_v14 = vrot.slane %v7676_v56, %v8034_v22 }
 0x679   : > { %v3866_v11 = vsel %vm2276_vm2, %v3865_v36, %v3861_v1  ;;  %v4533_v1 = vunpack.c.h.b16 %v3828_v52  ;;  %7679 = vrcp.f32 %v9759_v30 }
 0x67a   : > { %v3867_v55 = vpack.c.b16 %v3866_v11, %v3866_v11  ;;  %v3916_v46 = vpop.permute.xlu1 %3915  ;;  %v3829_v36 = vpack.c.bf16 %v3778_v54, %v3777_v59 }
 0x67b   : > { %v3923_v28 = vrot.slane %v3916_v46, %v8665_v43  ;;  %v3226_v45 = vpop.permute.xlu0 %3225 }
 0x67c   : > { %7266 = vmatmul.mubr.msk.bf16.vlgmr.msra.gmra.mxu1 %vm1312_vm1, %v3867_v55  ;;  %v3652_v55 = vrot.slane %v7676_v56, %v8043_v27  ;;  %v4594_v46 = vunpack.c.l.b16 %v3829_v36  ;;  %v3510_v57 = vrot.slane %v3226_v45, %v8668_v31  ;;  %v4595_v33 = vunpack.c.h.b16 %v3829_v36 }
 0x67d   : > { %7270 = vmatpush3.bf16.msra.mxu1 %v10807_v41  ;;  %7271 = vmatprep.mubr.msk.bf16.mxu1 %vm7806_vm7, %v7805_v37  ;;  %v3779_v41 = vmul.f32 %v9531_v3, %v3648_v14 }
 0x67e   : > { %v3919_v63 = vpop.permute.xlu1 %3918  ;;  %7275 = vmatprep.subr.bf16.mxu1 %v7805_v37  ;;  %v3782_v3 = vmul.f32 %v9541_v16, %v3652_v55 }
 0x67f   : > { %v3927_v58 = vrot.slane %v3919_v63, %v8668_v31  ;;  %v3780_v63 = vmul.f32 %v9535_v10, %v3648_v14 }
 0x681   : > { %v3928_v2 = vsel %vm2276_vm2, %v3927_v58, %v3923_v28  ;;  %v9810_v8 = vpack.c.bf16 %v3780_v63, %v3779_v41 }
 0x682   : > { %v3929_v34 = vpack.c.b16 %v3928_v2, %v3928_v2  ;;  %v3211_v7 = vpop.permute.xlu1 %3210 }
 0x683   : > { %v3488_v10 = vrot.slane %v3211_v7, %v8665_v43  ;;  %v4657_v59 = vunpack.c.h.b16 %v9810_v8 }
 0x684   : > { %7272 = vmatmul.mubr.msk.bf16.vlgmr.msra.gmra.mxu1 %vm1312_vm1, %v3929_v34  ;;  %v3781_v34 = vmul.f32 %v9412_v48, %v3652_v55 }
 0x685   : > { %7276 = vmatpush3.bf16.msra.mxu1 %v10809_v0  ;;  %7277 = vmatprep.mubr.msk.bf16.mxu1 %vm7806_vm7, %v7805_v37  ;;  %v7678_v7 = vpop.eup %7677 }
 0x686   : > { %v3214_v15 = vpop.permute.xlu1 %3213  ;;  %7281 = vmatprep.subr.bf16.mxu1 %v7805_v37  ;;  %v3831_v54 = vpack.c.bf16 %v3782_v3, %v3781_v34 }
 0x687   : > { %v3492_v23 = vrot.slane %v3214_v15, %v8668_v31 }
 0x688   : > { %v4718_v55 = vunpack.c.l.b16 %v3831_v54 }
 0x689   : > { %v3493_v15 = vsel %vm2276_vm2, %v3492_v23, %v3488_v10  ;;  %v3668_v10 = vrot.slane %v7678_v7, %v8043_v27 }
 0x68a   : > { %v3217_v38 = vpop.permute.xlu1 %3216 }
 0x68b   : > { %v3497_v2 = vrot.slane %v3217_v38, %v8665_v43 }
 0x68e   : > { %4535 = vperm.xlu0 %7532, %v4532_v60   ;;  %v3220_v35 = vpop.permute.xlu1 %3219  ;;  %v3656_v60 = vrot.slane %v7676_v56, %v8053_v32 }
 0x68f   : > { %v3501_v47 = vrot.slane %v3220_v35, %v8668_v31 }
 0x690   : > { %v3784_v56 = vmul.f32 %v9545_v17, %v3656_v60  ;;  %v3664_v17 = vrot.slane %v7678_v7, %v8034_v22 }
 0x691   : > { %v3502_v0 = vsel %vm2276_vm2, %v3501_v47, %v3497_v2 }
 0x692   : > { %4538 = vperm.xlu0 %7532, %v4533_v1   ;;  %v3223_v11 = vpop.permute.xlu1 %3222  ;;  %v3542_v16 = vsel %vm2557_vm3, %v3502_v0, %v3493_v15  ;;  %v3788_v3 = vmul.f32 %v9562_v42, %v3664_v17  ;;  %v3789_v42 = vmul.f32 %v9565_v51, %v3668_v10 }
 0x693   : > { %v3506_v28 = vrot.slane %v3223_v11, %v8665_v43  ;;  %v3783_v11 = vmul.f32 %v9419_v40, %v3656_v60 }
 0x695   : > { %v3511_v52 = vsel %vm2276_vm2, %v3510_v57, %v3506_v28  ;;  %v3832_v47 = vpack.c.bf16 %v3784_v56, %v3783_v11  ;;  %v4719_v28 = vunpack.c.h.b16 %v3831_v54  ;;  %v10811_v11 = vld [vmem:[#allocation18_spill] sm:$0xff] }
 0x696   : > { %4597 = vperm.xlu0 %7532, %v4594_v46   ;;  %v3229_v58 = vpop.permute.xlu1 %3228  ;;  %v3543_v35 = vsel %vm2559_vm4, %v3511_v52, %v3542_v16  ;;  %v3660_v46 = vrot.slane %v7678_v7, %v8028_v18 }
 0x697   : > { %v3515_v38 = vrot.slane %v3229_v58, %v8665_v43  ;;  %v4780_v34 = vunpack.c.l.b16 %v3832_v47 }
 0x698   : > { %v3785_v58 = vmul.f32 %v9549_v25, %v3660_v46  ;;  %v3786_v40 = vmul.f32 %v9554_v53, %v3660_v46  ;;  %v10810_v25 = vld [vmem:[#allocation17_spill] sm:$0xff] }
 0x699   : > { %v10812_v46 = vld [vmem:[#allocation53_spill] sm:$0xff] }
 0x69a   : > { %4600 = vperm.xlu0 %7532, %v4595_v33   ;;  %v3232_v21 = vpop.permute.xlu1 %3231  ;;  %v3833_v57 = vpack.c.bf16 %v3786_v40, %v3785_v58  ;;  %v3787_v33 = vmul.f32 %v9559_v50, %v3664_v17 }
 0x69b   : > { %v3519_v48 = vrot.slane %v3232_v21, %v8668_v31  ;;  %v3672_v21 = vrot.slane %v7678_v7, %v8053_v32 }
 0x69c   : > { %v4842_v50 = vunpack.c.l.b16 %v3833_v57  ;;  %v3834_v15 = vpack.c.bf16 %v3788_v3, %v3787_v33  ;;  %v10815_v33 = vld [vmem:[#allocation56_spill] sm:$0xff] }
 0x69d   : > { %v3520_v39 = vsel %vm2276_vm2, %v3519_v48, %v3515_v38  ;;  %v3790_v38 = vmul.f32 %v9568_v44, %v3668_v10  ;;  %v7680_v48 = vpop.eup %7679  ;;  %v3792_v7 = vmul.f32 %v9425_v61, %v3672_v21 }
 0x69e   : > { %4662 = vperm.xlu0 %7532, %v4657_v59   ;;  %v3978_v1 = vpop.permute.xlu1 %3977  ;;  %v3544_v36 = vsel %vm2561_vm5, %v3520_v39, %v3543_v35  ;;  %v4102_v59 = vpop.permute.xlu0 %4101  ;;  %v4656_v35 = vunpack.c.l.b16 %v9810_v8  ;;  %v4904_v51 = vunpack.c.l.b16 %v3834_v15  ;;  %v3676_v44 = vrot.slane %v7680_v48, %v8028_v18 }
 0x69f   : > { %v3574_v14 = vsel %vm2592_vm6, %v3544_v36, 0.0  ;;  %v3985_v63 = vrot.slane %v3978_v1, %v8665_v43  ;;  %v3791_v1 = vmul.f32 %v9571_v49, %v3672_v21  ;;  %v3835_v36 = vpack.c.bf16 %v3790_v38, %v3789_v42  ;;  %v10817_v38 = vld [vmem:[#allocation52_spill] sm:$0xff] }
 0x6a0   : > { %3575 = vadd.xlane.f32.xlu1 %v3574_v14  ;;  %v4109_v14 = vrot.slane %v4102_v59, %v8665_v43  ;;  %v4781_v8 = vunpack.c.h.b16 %v3832_v47  ;;  %v3684_v10 = vrot.slane %v7680_v48, %v8043_v27  ;;  %v3688_v21 = vrot.slane %v7680_v48, %v8053_v32  ;;  %v10818_v59 = vld [vmem:[#allocation61_spill] sm:$0xff] }
 0x6a1   : > { %v3836_v61 = vpack.c.bf16 %v3792_v7, %v3791_v1  ;;  %v4967_v7 = vunpack.c.h.b16 %v3835_v36 }
 0x6a2   : > { %4721 = vperm.xlu0 %7532, %v4718_v55   ;;  %v3981_v41 = vpop.permute.xlu1 %3980  ;;  %v4966_v55 = vunpack.c.l.b16 %v3835_v36 }
 0x6a3   : > { %v3989_v45 = vrot.slane %v3981_v41, %v8668_v31  ;;  %v3793_v41 = vmul.f32 %v10812_v46, %v3676_v44  ;;  %v5029_v36 = vunpack.c.h.b16 %v3836_v61 }
 0x6a5   : > { %v3990_v30 = vsel %vm2276_vm2, %v3989_v45, %v3985_v63  ;;  %v10813_v63 = vld [vmem:[#allocation79_spill] sm:$0xff] }
 0x6a6   : > { %v3991_v23 = vpack.c.b16 %v3990_v30, %v3990_v30  ;;  %4724 = vperm.xlu0 %7532, %v4719_v28   ;;  %v4040_v2 = vpop.permute.xlu1 %4039  ;;  %v3794_v45 = vmul.f32 %v10813_v63, %v3676_v44  ;;  %v3680_v28 = vrot.slane %v7680_v48, %v8034_v22  ;;  %v4843_v30 = vunpack.c.h.b16 %v3833_v57  ;;  %v10819_v44 = vld [vmem:[#allocation89_spill] sm:$0xff] }
 0x6a7   : > { %v4047_v0 = vrot.slane %v4040_v2, %v8665_v43  ;;  %v10814_v2 = vld [vmem:[#allocation57_spill] sm:$0xff]  ;;  %v3799_v48 = vmul.f32 %v10819_v44, %v3688_v21 }
 0x6a8   : > { %7278 = vmatmul.mubr.msk.bf16.vlgmr.msra.gmra.mxu1 %vm1312_vm1, %v3991_v23  ;;  %v5028_v23 = vunpack.c.l.b16 %v3836_v61  ;;  %v3837_v47 = vpack.c.bf16 %v3794_v45, %v3793_v41  ;;  %v3796_v3 = vmul.f32 %v10815_v33, %v3680_v28 }
 0x6a9   : > { %7282 = vmatpush3.bf16.msra.mxu1 %v10810_v25  ;;  %7283 = vmatprep.mubr.msk.bf16.mxu1 %vm7806_vm7, %v7805_v37 }
 0x6aa   : > { %4783 = vperm.xlu0 %7532, %v4780_v34   ;;  %v4043_v53 = vpop.permute.xlu1 %4042  ;;  %7287 = vmatprep.subr.bf16.mxu1 %v7805_v37  ;;  %v3795_v34 = vmul.f32 %v10814_v2, %v3680_v28 }
 0x6ab   : > { %v4051_v52 = vrot.slane %v4043_v53, %v8668_v31  ;;  %v10816_v53 = vld [vmem:[#allocation19_spill] sm:$0xff] }
 0x6ac   : > { %v3838_v42 = vpack.c.bf16 %v3796_v3, %v3795_v34 }
 0x6ad   : > { %v4052_v60 = vsel %vm2276_vm2, %v4051_v52, %v4047_v0  ;;  %v4905_v52 = vunpack.c.h.b16 %v3834_v15 }
 0x6ae   : > { %v4053_v16 = vpack.c.b16 %v4052_v60, %v4052_v60  ;;  %4845 = vperm.xlu0 %7532, %v4842_v50   ;;  %v4105_v54 = vpop.permute.xlu1 %4104  ;;  %v5090_v50 = vunpack.c.l.b16 %v3837_v47  ;;  %v3797_v60 = vmul.f32 %v10817_v38, %v3684_v10  ;;  %v5152_v15 = vunpack.c.l.b16 %v3838_v42  ;;  %v10824_v38 = vld [vmem:[#allocation23_spill] sm:$0xff] }
 0x6af   : > { %v4113_v39 = vrot.slane %v4105_v54, %v8668_v31  ;;  %v4288_v54 = vpop.permute.xlu0 %4287  ;;  %v5153_v2 = vunpack.c.h.b16 %v3838_v42 }
 0x6b0   : > { %7284 = vmatmul.mubr.msk.bf16.vlgmr.msra.gmra.mxu1 %vm1312_vm1, %v4053_v16  ;;  %v3798_v16 = vmul.f32 %v10818_v59, %v3684_v10 }
 0x6b1   : > { %4659 = vperm.xlu1 %7531, %v4656_v35   ;;  %7288 = vmatpush3.bf16.msra.mxu1 %v10811_v11  ;;  %v4114_v49 = vsel %vm2276_vm2, %v4113_v39, %v4109_v14  ;;  %v10820_v14 = vld [vmem:[#allocation49_spill] sm:$0xff] }
 0x6b2   : > { %4907 = vperm.xlu0 %7532, %v4904_v51   ;;  %v4164_v56 = vpop.permute.xlu1 %4163  ;;  %7289 = vmatprep.mubr.msk.bf16.mxu1 %vm7806_vm7, %v7805_v37  ;;  %v4115_v58 = vpack.c.b16 %v4114_v49, %v4114_v49  ;;  %v3839_v51 = vpack.c.bf16 %v3798_v16, %v3797_v60  ;;  %v3800_v11 = vmul.f32 %v10820_v14, %v3688_v21  ;;  %v10821_v49 = vld [vmem:[#allocation20_spill] sm:$0xff] }
 0x6b3   : > { %7293 = vmatprep.subr.bf16.mxu1 %v7805_v37  ;;  %v4171_v25 = vrot.slane %v4164_v56, %v8665_v43 }
 0x6b4   : > { %v5214_v41 = vunpack.c.l.b16 %v3839_v51  ;;  %v3840_v63 = vpack.c.bf16 %v3800_v11, %v3799_v48  ;;  %v5215_v3 = vunpack.c.h.b16 %v3839_v51 }
 0x6b5   : > { %4786 = vperm.xlu1 %7531, %v4781_v8  }
 0x6b6   : > { %4969 = vperm.xlu0 %7532, %v4966_v55   ;;  %v4167_v40 = vpop.permute.xlu1 %4166  ;;  %v4291_v55 = vpop.permute.xlu0 %4290 }
 0x6b7   : > { %v4175_v17 = vrot.slane %v4167_v40, %v8668_v31  ;;  %v4299_v28 = vrot.slane %v4291_v55, %v8668_v31  ;;  %v5276_v40 = vunpack.c.l.b16 %v3840_v63 }
 0x6b8   : > { %7290 = vmatmul.mubr.msk.bf16.vlgmr.msra.gmra.mxu1 %vm1312_vm1, %v4115_v58  ;;  %v5091_v58 = vunpack.c.h.b16 %v3837_v47 }
 0x6b9   : > { %4848 = vperm.xlu1 %7531, %v4843_v30   ;;  %7294 = vmatpush3.bf16.msra.mxu1 %v10816_v53  ;;  %v4176_v57 = vsel %vm2276_vm2, %v4175_v17, %v4171_v25  ;;  %v4295_v17 = vrot.slane %v4288_v54, %v8665_v43  ;;  %v10822_v30 = vld [vmem:[#allocation21_spill] sm:$0xff]  ;;  %v10823_v53 = vld [vmem:[#allocation22_spill] sm:$0xff] }
 0x6ba   : > { %5031 = vperm.xlu0 %7532, %v5028_v23   ;;  %v4226_v0 = vpop.permute.xlu1 %4225  ;;  %7295 = vmatprep.mubr.msk.bf16.mxu1 %vm7806_vm7, %v7805_v37  ;;  %v4177_v39 = vpack.c.b16 %v4176_v57, %v4176_v57  ;;  %v4353_v34 = vpop.permute.xlu0 %4352  ;;  %v5277_v57 = vunpack.c.h.b16 %v3840_v63  ;;  %v10827_v63 = vld [vmem:[#allocation50_spill] sm:$0xff] }
 0x6bb   : > { %7299 = vmatprep.subr.bf16.mxu1 %v7805_v37  ;;  %v4233_v56 = vrot.slane %v4226_v0, %v8665_v43  ;;  %v4300_v23 = vsel %vm2276_vm2, %v4299_v28, %v4295_v17  ;;  %v4361_v25 = vrot.slane %v4353_v34, %v8668_v31 }
 0x6bc   : > { %v4301_v47 = vpack.c.b16 %v4300_v23, %v4300_v23 }
 0x6bd   : > { %4910 = vperm.xlu1 %7531, %v4905_v52  }
 0x6be   : > { %5093 = vperm.xlu0 %7532, %v5090_v50   ;;  %v4229_v35 = vpop.permute.xlu1 %4228 }
 0x6bf   : > { %v4237_v1 = vrot.slane %v4229_v35, %v8668_v31  ;;  %v10825_v35 = vld [vmem:[#allocation24_spill] sm:$0xff] }
 0x6c0   : > { %7296 = vmatmul.mubr.msk.bf16.vlgmr.msra.gmra.mxu1 %vm1312_vm1, %v4177_v39 }
 0x6c1   : > { %4972 = vperm.xlu1 %7531, %v4967_v7   ;;  %7300 = vmatpush3.bf16.msra.mxu1 %v10821_v49  ;;  %v4238_v8 = vsel %vm2276_vm2, %v4237_v1, %v4233_v56 }
 0x6c2   : > { %5155 = vperm.xlu0 %7532, %v5152_v15   ;;  %7301 = vmatprep.mubr.msk.bf16.mxu1 %vm7806_vm7, %v7805_v37  ;;  %v4350_v46 = vpop.permute.xlu1 %4349  ;;  %v4239_v45 = vpack.c.b16 %v4238_v8, %v4238_v8  ;;  %v10826_v15 = vld [vmem:[#allocation25_spill] sm:$0xff] }
 0x6c3   : > { %7305 = vmatprep.subr.bf16.mxu1 %v7805_v37  ;;  %v4357_v33 = vrot.slane %v4350_v46, %v8665_v43 }
 0x6c5   : > { %5034 = vperm.xlu1 %7531, %v5029_v36   ;;  %v4362_v0 = vsel %vm2276_vm2, %v4361_v25, %v4357_v33 }
 0x6c6   : > { %5217 = vperm.xlu0 %7532, %v5214_v41   ;;  %v4412_v61 = vpop.permute.xlu1 %4411  ;;  %v4363_v52 = vpack.c.b16 %v4362_v0, %v4362_v0 }
 0x6c7   : > { %v4419_v42 = vrot.slane %v4412_v61, %v8665_v43  ;;  %v10829_v61 = vld [vmem:[#allocation26_spill] sm:$0xff] }
 0x6c8   : > { %7302 = vmatmul.mubr.msk.bf16.vlgmr.msra.gmra.mxu1 %vm1312_vm1, %v4239_v45 }
 0x6c9   : > { %5096 = vperm.xlu1 %7531, %v5091_v58   ;;  %7306 = vmatpush3.bf16.msra.mxu1 %v10822_v30  ;;  %v10828_v58 = vld [vmem:[#allocation68_spill] sm:$0xff] }
 0x6ca   : > { %5279 = vperm.xlu0 %7532, %v5276_v40   ;;  %7307 = vmatprep.mubr.msk.bf16.mxu1 %vm7806_vm7, %v7805_v37  ;;  %v4415_v10 = vpop.permute.xlu1 %4414 }
 0x6cb   : > { %7311 = vmatprep.subr.bf16.mxu1 %v7805_v37  ;;  %v4423_v50 = vrot.slane %v4415_v10, %v8668_v31 }
 0x6cd   : > { %5158 = vperm.xlu1 %7531, %v5153_v2   ;;  %v4424_v60 = vsel %vm2276_vm2, %v4423_v50, %v4419_v42 }
 0x6ce   : > { %v4474_v21 = vpop.permute.xlu1 %4473  ;;  %v4425_v16 = vpack.c.b16 %v4424_v60, %v4424_v60 }
 0x6cf   : > { %v4481_v39 = vrot.slane %v4474_v21, %v8665_v43 }
 0x6d0   : > { %7308 = vmatmul.mubr.msk.bf16.vlgmr.msra.gmra.mxu1 %vm1312_vm1, %v4301_v47  ;;  %v10830_v47 = vld [vmem:[#allocation51_spill] sm:$0xff] }
 0x6d1   : > { %5220 = vperm.xlu1 %7531, %v5215_v3   ;;  %7312 = vmatpush3.bf16.msra.mxu1 %v10823_v53 }
 0x6d2   : > { %7313 = vmatprep.mubr.msk.bf16.mxu1 %vm7806_vm7, %v7805_v37  ;;  %7317 = vmatprep.subr.bf16.mxu1 %v7805_v37  ;;  %v4477_v59 = vpop.permute.xlu1 %4476 }
 0x6d3   : > { %v4485_v54 = vrot.slane %v4477_v59, %v8668_v31  ;;  %v10832_v59 = vld [vmem:[#allocation27_spill] sm:$0xff] }
 0x6d5   : > { %5282 = vperm.xlu1 %7531, %v5277_v57   ;;  %v4486_v1 = vsel %vm2276_vm2, %v4485_v54, %v4481_v39 }
 0x6d6   : > { %v4487_v7 = vpack.c.b16 %v4486_v1, %v4486_v1 }
 0x6d8   : > { %7314 = vmatmul.mubr.msk.bf16.vlgmr.msra.gmra.mxu1 %vm1312_vm1, %v4363_v52  ;;  %v10831_v52 = vld [vmem:[#allocation67_spill] sm:$0xff] }
 0x6d9   : > { %7318 = vmatpush3.bf16.msra.mxu1 %v10824_v38  ;;  %7319 = vmatprep.mubr.msk.bf16.mxu1 %vm7806_vm7, %v7805_v37 }
 0x6da   : > { %7323 = vmatprep.subr.bf16.mxu1 %v7805_v37 }
 0x6e0   : > { %7320 = vmatmul.mubr.msk.bf16.vlgmr.msra.gmra.mxu1 %vm1312_vm1, %v4425_v16 }
 0x6e1   : > { %7324 = vmatpush3.bf16.msra.mxu1 %v10825_v35  ;;  %7325 = vmatprep.mubr.msk.bf16.mxu1 %vm7806_vm7, %v7805_v37 }
 0x6e2   : > { %7329 = vmatprep.subr.bf16.mxu1 %v7805_v37 }
 0x6e8   : > { %7326 = vmatmul.mubr.msk.bf16.vlgmr.msra.gmra.mxu1 %vm1312_vm1, %v4487_v7 }
 0x6e9   : > { %7330 = vmatpush3.bf16.msra.mxu1 %v10826_v15  ;;  %7331 = vmatprep.mubr.msk.bf16.mxu1 %vm7806_vm7, %v7805_v37 }
 0x6ea   : > { %7335 = vmatprep.subr.bf16.mxu1 %v7805_v37 }
 0x701   : > { %v3573_v51 = vpop.xlane.xlu0 %3572 }
 0x702   : > { %7681 = vrcp.f32 %v3573_v51 }
 0x709   : > { %v4536_v44 = vpop.permute.xlu0 %4535 }
 0x70a   : > { %v4543_v14 = vrot.slane %v4536_v44, %v8665_v43 }
 0x70d   : > { %v4539_v48 = vpop.permute.xlu0 %4538 }
 0x70e   : > { %v4547_v11 = vrot.slane %v4539_v48, %v8668_v31 }
 0x70f   : > { %v7682_v56 = vpop.eup %7681 }
 0x710   : > { %v4548_v49 = vsel %vm2276_vm2, %v4547_v11, %v4543_v14  ;;  %v3692_v8 = vrot.slane %v7682_v56, %v8028_v18  ;;  %v3696_v36 = vrot.slane %v7682_v56, %v8034_v22  ;;  %v3700_v41 = vrot.slane %v7682_v56, %v8043_v27 }
 0x711   : > { %v4549_v55 = vpack.c.b16 %v4548_v49, %v4548_v49  ;;  %v4598_v46 = vpop.permute.xlu0 %4597 }
 0x712   : > { %v3801_v45 = vmul.f32 %v10827_v63, %v3692_v8  ;;  %v3802_v28 = vmul.f32 %v9654_v12, %v3692_v8  ;;  %v3803_v40 = vmul.f32 %v10828_v58, %v3696_v36  ;;  %v3804_v17 = vmul.f32 %v9671_v24, %v3696_v36 }
 0x713   : > { %7332 = vmatmul.mubr.msk.bf16.vlgmr.msra.gmra.mxu1 %vm1312_vm1, %v4549_v55  ;;  %v4605_v23 = vrot.slane %v4598_v46, %v8665_v43  ;;  %v3805_v34 = vmul.f32 %v10830_v47, %v3700_v41  ;;  %v3806_v33 = vmul.f32 %v9679_v4, %v3700_v41  ;;  %v3704_v12 = vrot.slane %v7682_v56, %v8053_v32  ;;  %v10833_v41 = vld [vmem:[#allocation28_spill] sm:$0xff] }
 0x714   : > { %v3841_v30 = vpack.c.bf16 %v3802_v28, %v3801_v45  ;;  %7336 = vmatpush3.bf16.msra.mxu1 %v10829_v61  ;;  %7337 = vmatprep.mubr.msk.bf16.mxu1 %vm7806_vm7, %v7805_v37  ;;  %v3842_v25 = vpack.c.bf16 %v3804_v17, %v3803_v40 }
 0x715   : > { %v4601_v2 = vpop.permute.xlu0 %4600  ;;  %7341 = vmatprep.subr.bf16.mxu1 %v7805_v37  ;;  %v3807_v21 = vmul.f32 %v10831_v52, %v3704_v12  ;;  %v3843_v4 = vpack.c.bf16 %v3806_v33, %v3805_v34  ;;  %v3808_v38 = vmul.f32 %v9689_v19, %v3704_v12  ;;  %v10834_v52 = vld [vmem:[#allocation29_spill] sm:$0xff] }
 0x716   : > { %v4609_v3 = vrot.slane %v4601_v2, %v8668_v31  ;;  %v5338_v24 = vunpack.c.l.b16 %v3841_v30  ;;  %v5339_v10 = vunpack.c.h.b16 %v3841_v30  ;;  %v5400_v50 = vunpack.c.l.b16 %v3842_v25 }
 0x717   : > { %v5401_v42 = vunpack.c.h.b16 %v3842_v25  ;;  %v5462_v16 = vunpack.c.l.b16 %v3843_v4  ;;  %v5463_v54 = vunpack.c.h.b16 %v3843_v4  ;;  %v3844_v39 = vpack.c.bf16 %v3808_v38, %v3807_v21 }
 0x718   : > { %v4610_v53 = vsel %vm2276_vm2, %v4609_v3, %v4605_v23  ;;  %5341 = vperm.xlu0 %7532, %v5338_v24   ;;  %5344 = vperm.xlu1 %7531, %v5339_v10  }
 0x719   : > { %v4611_v0 = vpack.c.b16 %v4610_v53, %v4610_v53  ;;  %v4663_v57 = vpop.permute.xlu0 %4662  ;;  %v5524_v1 = vunpack.c.l.b16 %v3844_v39  ;;  %v5525_v19 = vunpack.c.h.b16 %v3844_v39 }
 0x71a   : > { %v4671_v14 = vrot.slane %v4663_v57, %v8668_v31 }
 0x71b   : > { %7338 = vmatmul.mubr.msk.bf16.vlgmr.msra.gmra.mxu1 %vm1312_vm1, %v4611_v0 }
 0x71c   : > { %5403 = vperm.xlu0 %7532, %v5400_v50   ;;  %5406 = vperm.xlu1 %7531, %v5401_v42  }
 0x71d   : > { %v4722_v60 = vpop.permute.xlu0 %4721  ;;  %7342 = vmatpush3.bf16.msra.mxu1 %v10832_v59  ;;  %7343 = vmatprep.mubr.msk.bf16.mxu1 %vm7806_vm7, %v7805_v37 }
 0x71e   : > { %7347 = vmatprep.subr.bf16.mxu1 %v7805_v37  ;;  %v4729_v46 = vrot.slane %v4722_v60, %v8665_v43 }
 0x720   : > { %5465 = vperm.xlu0 %7532, %v5462_v16   ;;  %5468 = vperm.xlu1 %7531, %v5463_v54  }
 0x721   : > { %v4725_v35 = vpop.permute.xlu0 %4724 }
 0x722   : > { %v4733_v55 = vrot.slane %v4725_v35, %v8668_v31  ;;  %v10835_v35 = vld [vmem:[#allocation33_spill] sm:$0xff] }
 0x724   : > { %5527 = vperm.xlu0 %7532, %v5524_v1   ;;  %5530 = vperm.xlu1 %7531, %v5525_v19   ;;  %v4734_v45 = vsel %vm2276_vm2, %v4733_v55, %v4729_v46  ;;  %v10836_v46 = vld [vmem:[#allocation30_spill] sm:$0xff] }
 0x725   : > { %v4784_v7 = vpop.permute.xlu0 %4783  ;;  %v4735_v61 = vpack.c.b16 %v4734_v45, %v4734_v45 }
 0x726   : > { %v4791_v23 = vrot.slane %v4784_v7, %v8665_v43 }
 0x729   : > { %v9954_v15 = vpop.permute.xlu0 %4845  ;;  %v3576_v51 = vpop.xlane.xlu1 %3575 }
 0x72a   : > { %7683 = vrcp.f32 %v3576_v51 }
 0x72d   : > { %v4908_v44 = vpop.permute.xlu0 %4907  ;;  %v4660_v48 = vpop.permute.xlu1 %4659 }
 0x72e   : > { %v4667_v11 = vrot.slane %v4660_v48, %v8665_v43  ;;  %v4915_v34 = vrot.slane %v4908_v44, %v8665_v43 }
 0x730   : > { %v4672_v56 = vsel %vm2276_vm2, %v4671_v14, %v4667_v11  ;;  %v4853_v11 = vrot.slane %v9954_v15, %v8665_v43 }
 0x731   : > { %v4673_v49 = vpack.c.b16 %v4672_v56, %v4672_v56  ;;  %v9959_v8 = vpop.permute.xlu0 %4969  ;;  %v4787_v36 = vpop.permute.xlu1 %4786 }
 0x732   : > { %v4795_v40 = vrot.slane %v4787_v36, %v8668_v31 }
 0x733   : > { %7344 = vmatmul.mubr.msk.bf16.vlgmr.msra.gmra.mxu1 %vm1312_vm1, %v4673_v49 }
 0x734   : > { %7348 = vmatpush3.bf16.msra.mxu1 %v10833_v41  ;;  %7349 = vmatprep.mubr.msk.bf16.mxu1 %vm7806_vm7, %v7805_v37  ;;  %v4796_v25 = vsel %vm2276_vm2, %v4795_v40, %v4791_v23  ;;  %v10837_v23 = vld [vmem:[#allocation35_spill] sm:$0xff] }
 0x735   : > { %v9967_v63 = vpop.permute.xlu1 %4848  ;;  %7353 = vmatprep.subr.bf16.mxu1 %v7805_v37  ;;  %v5032_v58 = vpop.permute.xlu0 %5031  ;;  %v4797_v59 = vpack.c.b16 %v4796_v25, %v4796_v25 }
 0x736   : > { %v5039_v16 = vrot.slane %v5032_v58, %v8665_v43  ;;  %v4857_v39 = vrot.slane %v9967_v63, %v8668_v31 }
 0x737   : > { %v7684_v28 = vpop.eup %7683 }
 0x738   : > { %v3708_v17 = vrot.slane %v7684_v28, %v8028_v18  ;;  %v3712_v30 = vrot.slane %v7684_v28, %v8034_v22  ;;  %v3716_v47 = vrot.slane %v7684_v28, %v8043_v27  ;;  %v3720_v50 = vrot.slane %v7684_v28, %v8053_v32 }
 0x739   : > { %v4911_v2 = vpop.permute.xlu1 %4910 }
 0x73a   : > { %v4919_v33 = vrot.slane %v4911_v2, %v8668_v31  ;;  %v3809_v12 = vmul.f32 %v9711_v5, %v3708_v17  ;;  %v3810_v3 = vmul.f32 %v9715_v6, %v3708_v17  ;;  %v3811_v24 = vmul.f32 %v9718_v62, %v3712_v30  ;;  %v9988_v5 = vpop.permute.xlu0 %5093 }
 0x73b   : > { %7350 = vmatmul.mubr.msk.bf16.vlgmr.msra.gmra.mxu1 %vm1312_vm1, %v4735_v61  ;;  %v3812_v10 = vmul.f32 %v9721_v26, %v3712_v30  ;;  %v3813_v62 = vmul.f32 %v9726_v13, %v3716_v47  ;;  %v3814_v26 = vmul.f32 %v9656_v29, %v3716_v47  ;;  %v3815_v1 = vmul.f32 %v9731_v9, %v3720_v50 }
 0x73c   : > { %v4920_v53 = vsel %vm2276_vm2, %v4919_v33, %v4915_v34  ;;  %v3905_v0 = vpop.f32.mrf.mxu1  ;;  %v3845_v57 = vpack.c.bf16 %v3810_v3, %v3809_v12  ;;  %7354 = vmatpush3.bf16.msra.mxu1 %v10834_v52  ;;  %7355 = vmatprep.mubr.msk.bf16.mxu1 %vm7806_vm7, %v7805_v37  ;;  %v3816_v48 = vmul.f32 %v9736_v20, %v3720_v50  ;;  %v10036_v3 = vld [vmem:[%s514_s18] sm:$0xff]  ;;  %s7814_s18 = smov 112  }
 0x73d   : > { %v4921_v6 = vpack.c.b16 %v4920_v53, %v4920_v53  ;;  %v9990_v21 = vpop.permute.xlu1 %4972  ;;  %7359 = vmatprep.subr.bf16.mxu1 %v7805_v37  ;;  %v3846_v60 = vpack.c.bf16 %v3812_v10, %v3811_v24  ;;  %v3847_v29 = vpack.c.bf16 %v3814_v26, %v3813_v62  ;;  %v4858_v20 = vsel %vm2276_vm2, %v4857_v39, %v4853_v11 }
 0x73e   : > { %v7267_v42 = vpop.f32.mrf.mxu1  ;;  %v5587_v4 = vunpack.c.h.b16 %v3845_v57  ;;  %v5586_v38 = vunpack.c.l.b16 %v3845_v57  ;;  %v5156_v14 = vpop.permute.xlu0 %5155  ;;  %v3848_v45 = vpack.c.bf16 %v3816_v48, %v3815_v1  ;;  %v4859_v40 = vpack.c.b16 %v4858_v20, %v4858_v20 }
 0x73f   : > { %7368 = vmatmul.mubr.msk.bf16.vlgmr.msra.gmra.mxu0 %vm1312_vm1, %v4921_v6  ;;  %v5649_v51 = vunpack.c.h.b16 %v3846_v60  ;;  %v5648_v44 = vunpack.c.l.b16 %v3846_v60  ;;  %v5711_v63 = vunpack.c.h.b16 %v3847_v29  ;;  %v5710_v15 = vunpack.c.l.b16 %v3847_v29 }
 0x740   : > { %v3908_v54 = vpop.f32.mrf.mxu1  ;;  %5592 = vperm.xlu1 %7531, %v5587_v4   ;;  %5589 = vperm.xlu0 %7532, %v5586_v38   ;;  %v5163_v17 = vrot.slane %v5156_v14, %v8665_v43  ;;  %v4981_v2 = vrot.slane %v9990_v21, %v8668_v31  ;;  %v5773_v33 = vunpack.c.h.b16 %v3848_v45  ;;  %v5772_v12 = vunpack.c.l.b16 %v3848_v45  ;;  %v10839_v21 = vld [vmem:[#allocation37_spill] sm:$0xff]  ;;  %v10840_v4 = vld [vmem:[#allocation16_spill] sm:$0xff] }
 0x741   : > { %v5035_v13 = vpop.permute.xlu1 %5034  ;;  %7378 = vmatpush3.bf16.msra.mxu0 %v10835_v35  ;;  %7379 = vmatprep.mubr.msk.bf16.mxu0 %vm7806_vm7, %v7805_v37  ;;  %v4977_v24 = vrot.slane %v9959_v8, %v8665_v43  ;;  %v5844_v57 = vrot.slane %v10036_v3, %v8034_v22  ;;  %v5837_v52 = vrot.slane %v10036_v3, %v8028_v18  ;;  %v10060_v38 = vsub.s32 4, %v10840_v4  ;;  %v10841_v35 = vld [vmem:[#allocation34_spill] sm:$0xff]  ;;  %v10843_v14 = vld [vmem:[#allocation36_spill] sm:$0xff] }
 0x742   : > { %v5043_v19 = vrot.slane %v5035_v13, %v8668_v31  ;;  %v7268_v7 = vpop.f32.mrf.mxu1  ;;  %7389 = vmatprep.subr.bf16.mxu0 %v7805_v37  ;;  %v10027_v30 = vpop.permute.xlu0 %5217  ;;  %v5851_v50 = vrot.slane %v10036_v3, %v8043_v27  ;;  %v5858_v42 = vrot.slane %v10036_v3, %v8053_v32  ;;  %v10068_v54 = vsub.s32 5, %v10840_v4 }
 0x743   : > { %7356 = vmatmul.mubr.msk.bf16.vlgmr.msra.gmra.mxu1 %vm1312_vm1, %v4797_v59  ;;  %v4982_v6 = vsel %vm2276_vm2, %v4981_v2, %v4977_v24  ;;  %v5101_v39 = vrot.slane %v9988_v5, %v8665_v43  ;;  %v5865_v1 = vrot.slane %v10036_v3, %v10060_v38  ;;  %v10842_v7 = vld [vmem:[#allocation39_spill] sm:$0xff]  ;;  %v5225_v48 = vrot.slane %v10027_v30, %v8665_v43 }
 0x744   : > { %v5044_v56 = vsel %vm2276_vm2, %v5043_v19, %v5039_v16  ;;  %v3967_v49 = vpop.f32.mrf.mxu1  ;;  %5654 = vperm.xlu1 %7531, %v5649_v51   ;;  %5651 = vperm.xlu0 %7532, %v5648_v44   ;;  %v4983_v62 = vpack.c.b16 %v4982_v6, %v4982_v6  ;;  %v5872_v5 = vrot.slane %v10036_v3, %v10068_v54  ;;  %v10108_v30 = vsub.s32 6, %v10840_v4 }
 0x745   : > { %v5045_v9 = vpack.c.b16 %v5044_v56, %v5044_v56  ;;  %v5922_v36 = vrot.slane %v3967_v49, 7  ;;  %v10011_v55 = vpop.permute.xlu1 %5096  ;;  %7360 = vmatpush3.bf16.msra.mxu1 %v10836_v46  ;;  %7361 = vmatprep.mubr.msk.bf16.mxu1 %vm7806_vm7, %v7805_v37  ;;  %v10844_v49 = vld [vmem:[#allocation38_spill] sm:$0xff] }
 0x746   : > { %v7273_v41 = vpop.f32.mrf.mxu1  ;;  %7371 = vmatprep.subr.bf16.mxu1 %v7805_v37  ;;  %v5280_v8 = vpop.permute.xlu0 %5279  ;;  %v5105_v59 = vrot.slane %v10011_v55, %v8668_v31 }
 0x747   : > { %v10019_v28 = vsel %vm2557_vm3, %v5922_v36, %v3905_v0  ;;  %7380 = vmatmul.mubr.msk.bf16.vlgmr.msra.gmra.mxu0 %vm1312_vm1, %v5045_v9  ;;  %v10838_v0 = vld [vmem:[#allocation32_spill] sm:$0xff]  ;;  %v5287_v60 = vrot.slane %v5280_v8, %v8665_v43 }
 0x748   : > { %v3970_v58 = vpop.f32.mrf.mxu1  ;;  %5716 = vperm.xlu1 %7531, %v5711_v63   ;;  %5713 = vperm.xlu0 %7532, %v5710_v15   ;;  %v5106_v19 = vsel %vm2276_vm2, %v5105_v59, %v5101_v39 }
 0x749   : > { %v5159_v61 = vpop.permute.xlu1 %5158  ;;  %7390 = vmatpush3.bf16.msra.mxu0 %v10837_v23  ;;  %7391 = vmatprep.mubr.msk.bf16.mxu0 %vm7806_vm7, %v7805_v37  ;;  %v5107_v51 = vpack.c.b16 %v5106_v19, %v5106_v19  ;;  %v5879_v23 = vrot.slane %v10036_v3, %v10108_v30 }
 0x74a   : > { %v5167_v47 = vrot.slane %v5159_v61, %v8668_v31  ;;  %v7274_v34 = vpop.f32.mrf.mxu1  ;;  %7401 = vmatprep.subr.bf16.mxu0 %v7805_v37 }
 0x74b   : > { %7362 = vmatmul.mubr.msk.bf16.vlgmr.msra.gmra.mxu1 %vm1312_vm1, %v4859_v40 }
 0x74c   : > { %v5168_v10 = vsel %vm2276_vm2, %v5167_v47, %v5163_v17  ;;  %5778 = vperm.xlu1 %7531, %v5773_v33   ;;  %5775 = vperm.xlu0 %7532, %v5772_v12  }
 0x74d   : > { %v5169_v25 = vpack.c.b16 %v5168_v10, %v5168_v10  ;;  %v5221_v53 = vpop.permute.xlu1 %5220  ;;  %7372 = vmatpush3.bf16.msra.mxu1 %v10838_v0  ;;  %7373 = vmatprep.mubr.msk.bf16.mxu1 %vm7806_vm7, %v7805_v37 }
 0x74e   : > { %7383 = vmatprep.subr.bf16.mxu1 %v7805_v37  ;;  %v5229_v44 = vrot.slane %v5221_v53, %v8668_v31 }
 0x74f   : > { %7392 = vmatmul.mubr.msk.bf16.vlgmr.msra.gmra.mxu0 %vm1312_vm1, %v5169_v25 }
 0x750   : > { %7402 = vmatpush3.bf16.msra.mxu0 %v10839_v21  ;;  %7403 = vmatprep.mubr.msk.bf16.mxu0 %vm7806_vm7, %v7805_v37  ;;  %v5230_v11 = vsel %vm2276_vm2, %v5229_v44, %v5225_v48 }
 0x751   : > { %v5283_v26 = vpop.permute.xlu1 %5282  ;;  %5846 = vbcast.lane.b32.xlu1 %v5844_v57, 256  ;;  %5839 = vbcast.lane.b32.xlu0 %v5837_v52, 256  ;;  %v5231_v56 = vpack.c.b16 %v5230_v11, %v5230_v11 }
 0x752   : > { %v5291_v16 = vrot.slane %v5283_v26, %v8668_v31  ;;  %7413 = vmatprep.subr.bf16.mxu0 %v7805_v37 }
 0x753   : > { %7374 = vmatmul.mubr.msk.bf16.vlgmr.msra.gmra.mxu1 %vm1312_vm1, %v4983_v62 }
 0x754   : > { %v5292_v13 = vsel %vm2276_vm2, %v5291_v16, %v5287_v60  ;;  %7384 = vmatpush3.bf16.msra.mxu1 %v10841_v35  ;;  %7385 = vmatprep.mubr.msk.bf16.mxu1 %vm7806_vm7, %v7805_v37 }
 0x755   : > { %v5293_v29 = vpack.c.b16 %v5292_v13, %v5292_v13  ;;  %7395 = vmatprep.subr.bf16.mxu1 %v7805_v37  ;;  %5853 = vbcast.lane.b32.xlu0 %v5851_v50, 256 }
 0x756   : > { %5860 = vbcast.lane.b32.xlu1 %v5858_v42, 256 }
 0x757   : > { %7404 = vmatmul.mubr.msk.bf16.vlgmr.msra.gmra.mxu0 %vm1312_vm1, %v5293_v29 }
 0x758   : > { %7414 = vmatpush3.bf16.msra.mxu0 %v10842_v7  ;;  %7415 = vmatprep.mubr.msk.bf16.mxu0 %vm7806_vm7, %v7805_v37 }
 0x759   : > { %7425 = vmatprep.subr.bf16.mxu0 %v7805_v37  ;;  %5867 = vbcast.lane.b32.xlu0 %v5865_v1, 256 }
 0x75a   : > { %5874 = vbcast.lane.b32.xlu1 %v5872_v5, 256 }
 0x75b   : > { %7386 = vmatmul.mubr.msk.bf16.vlgmr.msra.gmra.mxu1 %vm1312_vm1, %v5107_v51 }
 0x75c   : > { %7396 = vmatpush3.bf16.msra.mxu1 %v10843_v14  ;;  %7397 = vmatprep.mubr.msk.bf16.mxu1 %vm7806_vm7, %v7805_v37  ;;  %v10845_v14 = vld [vmem:[#allocation40_spill] sm:$0xff] }
 0x75d   : > { %7407 = vmatprep.subr.bf16.mxu1 %v7805_v37  ;;  %5881 = vbcast.lane.b32.xlu0 %v5879_v23, 256 }
 0x763   : > { %7398 = vmatmul.mubr.msk.bf16.vlgmr.msra.gmra.mxu1 %vm1312_vm1, %v5231_v56 }
 0x764   : > { %7408 = vmatpush3.bf16.msra.mxu1 %v10844_v49  ;;  %7409 = vmatprep.mubr.msk.bf16.mxu1 %vm7806_vm7, %v7805_v37 }
 0x765   : > { %7419 = vmatprep.subr.bf16.mxu1 %v7805_v37 }
 0x768   : > { %v4029_v9 = vpop.f32.mrf.mxu1 }
 0x769   : > { %v5924_v36 = vrot.slane %v4029_v9, 6 }
 0x76a   : > { %v7279_v55 = vpop.f32.mrf.mxu1 }
 0x76b   : > { %v5925_v46 = vsel %vm2559_vm4, %v5924_v36, %v10019_v28 }
 0x76c   : > { %v4032_v20 = vpop.f32.mrf.mxu1 }
 0x76e   : > { %v7280_v41 = vpop.f32.mrf.mxu1 }
 0x770   : > { %v4091_v63 = vpop.f32.mrf.mxu1 }
 0x771   : > { %v5926_v15 = vrot.slane %v4091_v63, 5  ;;  %v10846_v63 = vld [vmem:[#allocation41_spill] sm:$0xff] }
 0x772   : > { %v7285_v45 = vpop.f32.mrf.mxu1 }
 0x773   : > { %v10105_v58 = vsel %vm2561_vm5, %v5926_v15, %v5925_v46  ;;  %v10132_v46 = vsub.s32 7, %v10840_v4 }
 0x774   : > { %v4094_v40 = vpop.f32.mrf.mxu1 }
 0x776   : > { %v7286_v17 = vpop.f32.mrf.mxu1 }
 0x777   : > { %v5886_v17 = vrot.slane %v10036_v3, %v10132_v46 }
 0x778   : > { %v4153_v61 = vpop.f32.mrf.mxu1 }
 0x779   : > { %5888 = vbcast.lane.b32.xlu1 %v5886_v17, 256 }
 0x77a   : > { %v7291_v2 = vpop.f32.mrf.mxu1 }
 0x77c   : > { %v4156_v28 = vpop.f32.mrf.mxu1 }
 0x77e   : > { %v7292_v47 = vpop.f32.mrf.mxu1 }
 0x780   : > { %v4215_v34 = vpop.f32.mrf.mxu1 }
 0x781   : > { %v5928_v33 = vrot.slane %v4215_v34, 7 }
 0x782   : > { %v7297_v12 = vpop.f32.mrf.mxu1 }
 0x783   : > { %v5929_v24 = vsel %vm2557_vm3, %v5928_v33, %v4153_v61  ;;  %v10847_v33 = vld [vmem:[#allocation43_spill] sm:$0xff] }
 0x784   : > { %v4218_v10 = vpop.f32.mrf.mxu1 }
 0x786   : > { %v7298_v25 = vpop.f32.mrf.mxu1 }
 0x787   : > { %v10848_v25 = vld [vmem:[#allocation44_spill] sm:$0xff] }
 0x788   : > { %v4277_v53 = vpop.f32.mrf.mxu1 }
 0x789   : > { %v5930_v0 = vrot.slane %v4277_v53, 6 }
 0x78a   : > { %v7303_v57 = vpop.f32.mrf.mxu1 }
 0x78b   : > { %v5931_v52 = vsel %vm2559_vm4, %v5930_v0, %v5929_v24 }
 0x78c   : > { %v4280_v6 = vpop.f32.mrf.mxu1 }
 0x78e   : > { %v7304_v8 = vpop.f32.mrf.mxu1 }
 0x790   : > { %v4339_v21 = vpop.f32.mrf.mxu1 }
 0x791   : > { %v5932_v62 = vrot.slane %v4339_v21, 5 }
 0x792   : > { %v7309_v26 = vpop.f32.mrf.mxu1 }
 0x793   : > { %v5342_v50 = vpop.permute.xlu0 %5341  ;;  %v5345_v42 = vpop.permute.xlu1 %5344  ;;  %v10115_v60 = vsel %vm2561_vm5, %v5932_v62, %v5931_v52 }
 0x794   : > { %v5349_v59 = vrot.slane %v5342_v50, %v8665_v43  ;;  %v5353_v16 = vrot.slane %v5345_v42, %v8668_v31  ;;  %v4342_v39 = vpop.f32.mrf.mxu1 }
 0x796   : > { %v5354_v13 = vsel %vm2276_vm2, %v5353_v16, %v5349_v59  ;;  %v7310_v35 = vpop.f32.mrf.mxu1 }
 0x797   : > { %v5355_v29 = vpack.c.b16 %v5354_v13, %v5354_v13  ;;  %v5404_v1 = vpop.permute.xlu0 %5403  ;;  %v5407_v19 = vpop.permute.xlu1 %5406 }
 0x798   : > { %v5411_v5 = vrot.slane %v5404_v1, %v8665_v43  ;;  %v5415_v7 = vrot.slane %v5407_v19, %v8668_v31  ;;  %v4401_v51 = vpop.f32.mrf.mxu1  ;;  %v10849_v1 = vld [vmem:[#allocation45_spill] sm:$0xff] }
 0x799   : > { %7410 = vmatmul.mubr.msk.bf16.vlgmr.msra.gmra.mxu1 %vm1312_vm1, %v5355_v29 }
 0x79a   : > { %v5416_v44 = vsel %vm2276_vm2, %v5415_v7, %v5411_v5  ;;  %v7315_v48 = vpop.f32.mrf.mxu1  ;;  %7420 = vmatpush3.bf16.msra.mxu1 %v10845_v14  ;;  %7421 = vmatprep.mubr.msk.bf16.mxu1 %vm7806_vm7, %v7805_v37  ;;  %v10850_v14 = vld [vmem:[#allocation46_spill] sm:$0xff] }
 0x79b   : > { %v5417_v11 = vpack.c.b16 %v5416_v44, %v5416_v44  ;;  %v5466_v56 = vpop.permute.xlu0 %5465  ;;  %v5469_v49 = vpop.permute.xlu1 %5468  ;;  %7431 = vmatprep.subr.bf16.mxu1 %v7805_v37 }
 0x79c   : > { %v5473_v9 = vrot.slane %v5466_v56, %v8665_v43  ;;  %v5477_v36 = vrot.slane %v5469_v49, %v8668_v31  ;;  %v4404_v55 = vpop.f32.mrf.mxu1 }
 0x79d   : > { %7416 = vmatmul.mubr.msk.bf16.vlgmr.msra.gmra.mxu0 %vm1312_vm1, %v5417_v11 }
 0x79e   : > { %v5478_v20 = vsel %vm2276_vm2, %v5477_v36, %v5473_v9  ;;  %v7316_v41 = vpop.f32.mrf.mxu1  ;;  %7426 = vmatpush3.bf16.msra.mxu0 %v10846_v63  ;;  %7427 = vmatprep.mubr.msk.bf16.mxu0 %vm7806_vm7, %v7805_v37 }
 0x79f   : > { %v5479_v15 = vpack.c.b16 %v5478_v20, %v5478_v20  ;;  %v5528_v45 = vpop.permute.xlu0 %5527  ;;  %v5531_v40 = vpop.permute.xlu1 %5530  ;;  %7437 = vmatprep.subr.bf16.mxu0 %v7805_v37 }
 0x7a0   : > { %v5535_v61 = vrot.slane %v5528_v45, %v8665_v43  ;;  %v5539_v23 = vrot.slane %v5531_v40, %v8668_v31  ;;  %v4463_v2 = vpop.f32.mrf.mxu1 }
 0x7a1   : > { %v5934_v28 = vrot.slane %v4463_v2, 7  ;;  %7422 = vmatmul.mubr.msk.bf16.vlgmr.msra.gmra.mxu1 %vm1312_vm1, %v5479_v15 }
 0x7a2   : > { %v5540_v47 = vsel %vm2276_vm2, %v5539_v23, %v5535_v61  ;;  %v7321_v34 = vpop.f32.mrf.mxu1  ;;  %7432 = vmatpush3.bf16.msra.mxu1 %v10847_v33  ;;  %7433 = vmatprep.mubr.msk.bf16.mxu1 %vm7806_vm7, %v7805_v37 }
 0x7a3   : > { %v5541_v12 = vpack.c.b16 %v5540_v47, %v5540_v47  ;;  %v5935_v3 = vsel %vm2557_vm3, %v5934_v28, %v4401_v51  ;;  %7443 = vmatprep.subr.bf16.mxu1 %v7805_v37 }
 0x7a4   : > { %v4466_v24 = vpop.f32.mrf.mxu1 }
 0x7a5   : > { %7428 = vmatmul.mubr.msk.bf16.vlgmr.msra.gmra.mxu0 %vm1312_vm1, %v5541_v12  ;;  %v7807_v12 = vmov 1983009808  }
 0x7a6   : > { %v7322_v10 = vpop.f32.mrf.mxu1  ;;  %7438 = vmatpush3.bf16.msra.mxu0 %v10848_v25  ;;  %7439 = vmatprep.mubr.msk.bf16.mxu0 %vm7806_vm7, %v7805_v37 }
 0x7a7   : > { %7449 = vmatprep.subr.bf16.mxu0 %v7805_v37 }
 0x7a8   : > { %v4525_v53 = vpop.f32.mrf.mxu1 }
 0x7a9   : > { %v5936_v0 = vrot.slane %v4525_v53, 6 }
 0x7aa   : > { %v7327_v57 = vpop.f32.mrf.mxu1 }
 0x7ab   : > { %v10156_v52 = vsel %vm2559_vm4, %v5936_v0, %v5935_v3  ;;  %v6009_v3 = vunpack.c.l.s4 %v7807_v12 }
 0x7ac   : > { %v4528_v6 = vpop.f32.mrf.mxu1 }
 0x7ae   : > { %v7328_v8 = vpop.f32.mrf.mxu1 }
 0x7bb   : > { %v5590_v21 = vpop.permute.xlu0 %5589  ;;  %v5593_v62 = vpop.permute.xlu1 %5592 }
 0x7bc   : > { %v5597_v26 = vrot.slane %v5590_v21, %v8665_v43  ;;  %v5601_v50 = vrot.slane %v5593_v62, %v8668_v31 }
 0x7be   : > { %v5602_v42 = vsel %vm2276_vm2, %v5601_v50, %v5597_v26  ;;  %v6010_v26 = vunpack.c.0.s8 %v6009_v3 }
 0x7bf   : > { %v5603_v59 = vpack.c.b16 %v5602_v42, %v5602_v42  ;;  %v5652_v16 = vpop.permute.xlu0 %5651  ;;  %v5655_v39 = vpop.permute.xlu1 %5654 }
 0x7c0   : > { %v5659_v13 = vrot.slane %v5652_v16, %v8665_v43  ;;  %v5663_v35 = vrot.slane %v5655_v39, %v8668_v31 }
 0x7c1   : > { %7434 = vmatmul.mubr.msk.bf16.vlgmr.msra.gmra.mxu1 %vm1312_vm1, %v5603_v59 }
 0x7c2   : > { %v5664_v29 = vsel %vm2276_vm2, %v5663_v35, %v5659_v13  ;;  %7444 = vmatpush3.bf16.msra.mxu1 %v10849_v1  ;;  %7445 = vmatprep.mubr.msk.bf16.mxu1 %vm7806_vm7, %v7805_v37 }
 0x7c3   : > { %v5665_v19 = vpack.c.b16 %v5664_v29, %v5664_v29  ;;  %v5714_v5 = vpop.permute.xlu0 %5713  ;;  %v5717_v7 = vpop.permute.xlu1 %5716 }
 0x7c4   : > { %v5721_v51 = vrot.slane %v5714_v5, %v8665_v43  ;;  %v5725_v44 = vrot.slane %v5717_v7, %v8668_v31  ;;  %v10195_v7 = vsub.s32 %v6010_v26, %v10840_v4 }
 0x7c5   : > { %7440 = vmatmul.mubr.msk.bf16.vlgmr.msra.gmra.mxu0 %vm1312_vm1, %v5665_v19 }
 0x7c6   : > { %v5726_v48 = vsel %vm2276_vm2, %v5725_v44, %v5721_v51  ;;  %7450 = vmatpush3.bf16.msra.mxu0 %v10850_v14  ;;  %7451 = vmatprep.mubr.msk.bf16.mxu0 %vm7806_vm7, %v7805_v37 }
 0x7c7   : > { %v5727_v11 = vpack.c.b16 %v5726_v48, %v5726_v48  ;;  %v5776_v56 = vpop.permute.xlu0 %5775  ;;  %v5779_v49 = vpop.permute.xlu1 %5778  ;;  %7463 = vmatprep.subr.bf16.mxu0 %v7805_v37 }
 0x7c8   : > { %v5783_v9 = vrot.slane %v5776_v56, %v8665_v43  ;;  %v5787_v36 = vrot.slane %v5779_v49, %v8668_v31 }
 0x7c9   : > { %7446 = vmatmul.mubr.msk.bf16.vlgmr.msra.gmra.mxu1 %vm1312_vm1, %v5727_v11 }
 0x7ca   : > { %v5788_v55 = vsel %vm2276_vm2, %v5787_v36, %v5783_v9  ;;  %vm6834_vm2 = vcmask 651780  }
 0x7cb   : > { %v5789_v20 = vpack.c.b16 %v5788_v55, %v5788_v55  ;;  %v5840_v25 = vpop.permute.xlu0 %5839  ;;  %v5847_v53 = vpop.permute.xlu1 %5846 }
 0x7cc   : > { %v10184_v62 = vmul.f32 %v10105_v58, %v5840_v25  ;;  %v10187_v50 = vmul.f32 %v10115_v60, %v5847_v53  ;;  %v7537_v25 = vld [vmem:[%s10450_s8] sm:$0xff]  }
 0x7cd   : > { %7452 = vmatmul.mubr.msk.bf16.vlgmr.msra.gmra.mxu0 %vm1312_vm1, %v5789_v20  ;;  %vm6829_vm1 = vcmask 519555  }
 0x7ce   : > { %7467 = vmatprep.mubr.msk.bf16.mxu0 %vm7806_vm7, %v7805_v37  ;;  %v7072_v60 = vpack.c.bf16 %v10187_v50, %v10184_v62 }
 0x7cf   : > { %v5854_v39 = vpop.permute.xlu0 %5853  ;;  %v5861_v29 = vpop.permute.xlu1 %5860 }
 0x7d0   : > { %v6014_v9 = vrot.slane %v7072_v60, %v10195_v7 }
 0x7d3   : > { %v4587_v41 = vpop.f32.mrf.mxu1 }
 0x7d4   : > { %v5938_v0 = vrot.slane %v4587_v41, 5 }
 0x7d5   : > { %v7333_v63 = vpop.f32.mrf.mxu1 }
 0x7d6   : > { %v5939_v16 = vsel %vm2561_vm5, %v5938_v0, %v10156_v52 }
 0x7d7   : > { %v4590_v15 = vpop.f32.mrf.mxu1  ;;  %v10199_v51 = vmul.f32 %v5939_v16, %v5854_v39 }
 0x7d9   : > { %v7334_v45 = vpop.f32.mrf.mxu1 }
 0x7db   : > { %v4649_v40 = vpop.f32.mrf.mxu1 }
 0x7dd   : > { %v7339_v17 = vpop.f32.mrf.mxu1 }
 0x7de   : > { %v7536_v17 = vld [vmem:[%s10450_s8 + $0x8] sm:$0xff]  }
 0x7df   : > { %v4652_v61 = vpop.f32.mrf.mxu1  ;;  %7455 = vmatprep.subr.bf16.mxu1 %v7536_v17 }
 0x7e0   : > { %7456 = vmatpush3.bf16.msra.mxu1 %v7536_v17 }
 0x7e1   : > { %v7340_v23 = vpop.f32.mrf.mxu1  ;;  %7457 = vmatprep.subr.bf16.mxu1 %v7537_v25 }
 0x7e4   : > { %7458 = vmatpush3.bf16.msra.mxu1 %v7537_v25 }
 0x7f3   : > { %v4711_v2 = vpop.f32.mrf.mxu1 }
 0x7f4   : > { %v5940_v57 = vrot.slane %v4711_v2, 7 }
 0x7f5   : > { %v7345_v31 = vpop.f32.mrf.mxu1 }
 0x7f6   : > { %v5941_v13 = vsel %vm2557_vm3, %v5940_v57, %v4649_v40 }
 0x7f7   : > { %v4714_v28 = vpop.f32.mrf.mxu1 }
 0x7f9   : > { %v7346_v47 = vpop.f32.mrf.mxu1 }
 0x7fb   : > { %v4773_v34 = vpop.f32.mrf.mxu1 }
 0x7fc   : > { %v5942_v6 = vrot.slane %v4773_v34, 6 }
 0x7fd   : > { %v7351_v33 = vpop.f32.mrf.mxu1 }
 0x7fe   : > { %v5943_v5 = vsel %vm2559_vm4, %v5942_v6, %v5941_v13  ;;  %v10223_v6 = vld [vmem:[%s510_s29] sm:$0xff]  ;;  %s7809_s29 = smov 16  }
 0x7ff   : > { %v4776_v24 = vpop.f32.mrf.mxu1  ;;  %v4959_v10 = vpop.f32.mrf.mxu0  ;;  %v6270_v26 = vrot.slane %v10223_v6, %v8028_v18  ;;  %v6284_v13 = vrot.slane %v10223_v6, %v8043_v27 }
 0x800   : > { %v5946_v49 = vrot.slane %v4959_v10, 7 }
 0x801   : > { %v7352_v8 = vpop.f32.mrf.mxu1  ;;  %v7369_v21 = vpop.f32.mrf.mxu0  ;;  %6272 = vbcast.lane.b32.xlu1 %v6270_v26, 256 }
 0x803   : > { %v4835_v42 = vpop.f32.mrf.mxu1  ;;  %v4962_v59 = vpop.f32.mrf.mxu0 }
 0x804   : > { %v5944_v35 = vrot.slane %v4835_v42, 5  ;;  %v6277_v59 = vrot.slane %v10223_v6, %v8034_v22 }
 0x805   : > { %v7357_v1 = vpop.f32.mrf.mxu1  ;;  %v7370_v19 = vpop.f32.mrf.mxu0  ;;  %6286 = vbcast.lane.b32.xlu1 %v6284_v13, 256 }
 0x806   : > { %v5945_v58 = vsel %vm2561_vm5, %v5944_v35, %v5943_v5  ;;  %6279 = vbcast.lane.b32.xlu0 %v6277_v59, 256  ;;  %v6298_v35 = vrot.slane %v10223_v6, %v10060_v38  ;;  %v6291_v19 = vrot.slane %v10223_v6, %v8053_v32 }
 0x807   : > { %v10201_v52 = vmul.f32 %v5945_v58, %v5861_v29  ;;  %v4838_v44 = vpop.f32.mrf.mxu1  ;;  %v5083_v48 = vpop.f32.mrf.mxu0 }
 0x808   : > { %v5950_v47 = vrot.slane %v5083_v48, 5  ;;  %v6305_v48 = vrot.slane %v10223_v6, %v10068_v54 }
 0x809   : > { %v7073_v14 = vpack.c.bf16 %v10201_v52, %v10199_v51  ;;  %v7358_v11 = vpop.f32.mrf.mxu1  ;;  %v7381_v56 = vpop.f32.mrf.mxu0  ;;  %6293 = vbcast.lane.b32.xlu1 %v6291_v19, 256 }
 0x80a   : > { %6300 = vbcast.lane.b32.xlu0 %v6298_v35, 256 }
 0x80b   : > { %v6021_v4 = vrot.slane %v7073_v14, %v10195_v7  ;;  %v4897_v36 = vpop.f32.mrf.mxu1  ;;  %v5086_v55 = vpop.f32.mrf.mxu0 }
 0x80c   : > { %v5947_v20 = vsel %vm2557_vm3, %v5946_v49, %v4897_v36 }
 0x80d   : > { %v6022_v41 = vcombine.low %v6014_v9, %v6021_v4  ;;  %v7363_v63 = vpop.f32.mrf.mxu1  ;;  %v7382_v15 = vpop.f32.mrf.mxu0  ;;  %6307 = vbcast.lane.b32.xlu1 %v6305_v48, 256 }
 0x80f   : > { %v4900_v45 = vpop.f32.mrf.mxu1  ;;  %v5207_v40 = vpop.f32.mrf.mxu0  ;;  %7459 = vmatprep.mubr.msk.bf16.mxu1 %vm636_vm0, %v6022_v41 }
 0x810   : > { %v5952_v57 = vrot.slane %v5207_v40, 7 }
 0x811   : > { %v7364_v61 = vpop.f32.mrf.mxu1  ;;  %v7393_v23 = vpop.f32.mrf.mxu0 }
 0x813   : > { %v5021_v2 = vpop.f32.mrf.mxu1  ;;  %v5210_v31 = vpop.f32.mrf.mxu0 }
 0x814   : > { %v5948_v28 = vrot.slane %v5021_v2, 6 }
 0x815   : > { %v7375_v34 = vpop.f32.mrf.mxu1  ;;  %v7394_v33 = vpop.f32.mrf.mxu0 }
 0x816   : > { %v5949_v12 = vsel %vm2559_vm4, %v5948_v28, %v5947_v20 }
 0x817   : > { %v10214_v3 = vsel %vm2561_vm5, %v5950_v47, %v5949_v12  ;;  %v5024_v24 = vpop.f32.mrf.mxu1  ;;  %v5331_v10 = vpop.f32.mrf.mxu0 }
 0x818   : > { %v5956_v60 = vrot.slane %v5331_v10, 5 }
 0x819   : > { %v7376_v53 = vpop.f32.mrf.mxu1  ;;  %v7405_v0 = vpop.f32.mrf.mxu0 }
 0x81b   : > { %v5145_v8 = vpop.f32.mrf.mxu1  ;;  %v5334_v21 = vpop.f32.mrf.mxu0 }
 0x81c   : > { %v5953_v42 = vsel %vm2557_vm3, %v5952_v57, %v5145_v8  ;;  %v5868_v8 = vpop.permute.xlu0 %5867  ;;  %v5875_v21 = vpop.permute.xlu1 %5874 }
 0x81d   : > { %v7387_v16 = vpop.f32.mrf.mxu1  ;;  %v7406_v39 = vpop.f32.mrf.mxu0 }
 0x81f   : > { %v5148_v29 = vpop.f32.mrf.mxu1 }
 0x820   : > { %v5889_v48 = vpop.permute.xlu1 %5888 }
 0x821   : > { %v7388_v1 = vpop.f32.mrf.mxu1 }
 0x823   : > { %v5269_v5 = vpop.f32.mrf.mxu1 }
 0x824   : > { %v5954_v58 = vrot.slane %v5269_v5, 6  ;;  %v5882_v5 = vpop.permute.xlu0 %5881 }
 0x825   : > { %v7399_v44 = vpop.f32.mrf.mxu1 }
 0x826   : > { %v5955_v14 = vsel %vm2559_vm4, %v5954_v58, %v5953_v42 }
 0x827   : > { %v5272_v11 = vpop.f32.mrf.mxu1  ;;  %v5957_v56 = vsel %vm2561_vm5, %v5956_v60, %v5955_v14  ;;  %v10247_v14 = vmul.f32 %v10214_v3, %v5868_v8 }
 0x828   : > { %v10241_v35 = vmul.f32 %v5957_v56, %v5875_v21 }
 0x829   : > { %v7400_v49 = vpop.f32.mrf.mxu1 }
 0x859   : > { %v5393_v9 = vpop.f32.mrf.mxu1 }
 0x85b   : > { %v7411_v4 = vpop.f32.mrf.mxu1 }
 0x85c   : > { %v7074_v4 = vpack.c.bf16 %v10241_v35, %v10247_v14 }
 0x85d   : > { %v5396_v36 = vpop.f32.mrf.mxu1  ;;  %v5455_v55 = vpop.f32.mrf.mxu0 }
 0x85e   : > { %v5958_v25 = vrot.slane %v5455_v55, 7  ;;  %v6031_v3 = vrot.slane %v7074_v4, %v10195_v7 }
 0x85f   : > { %v7412_v20 = vpop.f32.mrf.mxu1  ;;  %v7417_v41 = vpop.f32.mrf.mxu0 }
 0x860   : > { %v5959_v13 = vsel %vm2557_vm3, %v5958_v25, %v5393_v9 }
 0x861   : > { %v5458_v63 = vpop.f32.mrf.mxu0  ;;  %v5517_v15 = vpop.f32.mrf.mxu1 }
 0x862   : > { %v5960_v53 = vrot.slane %v5517_v15, 6 }
 0x863   : > { %v7418_v45 = vpop.f32.mrf.mxu0  ;;  %v7423_v40 = vpop.f32.mrf.mxu1 }
 0x864   : > { %v5961_v29 = vsel %vm2559_vm4, %v5960_v53, %v5959_v13  ;;  %v6119_v40 = vld [vmem:[%s522_s14] sm:$0xff]  ;;  %s7811_s14 = smov 48  }
 0x865   : > { %v5520_v17 = vpop.f32.mrf.mxu1  ;;  %v5579_v61 = vpop.f32.mrf.mxu0 }
 0x866   : > { %v5962_v26 = vrot.slane %v5579_v61, 5  ;;  %v6121_v17 = vcombine.high %v6119_v40, %v6119_v40  ;;  %v10851_v61 = vld [vmem:[#allocation42_spill] sm:$0xff] }
 0x867   : > { %v7424_v23 = vpop.f32.mrf.mxu1  ;;  %v7429_v2 = vpop.f32.mrf.mxu0 }
 0x868   : > { %v5963_v58 = vsel %vm2561_vm5, %v5962_v26, %v5961_v29  ;;  %v6135_v23 = vrot.slane %v6121_v17, %v10851_v61  ;;  %v6128_v2 = vrot.slane %v6119_v40, %v10851_v61 }
 0x869   : > { %v5582_v31 = vpop.f32.mrf.mxu0  ;;  %v10253_v36 = vmul.f32 %v5963_v58, %v5882_v5 }
 0x86a   : > { %v6137_v31 = vcombine.high %v6135_v23, %v6135_v23 }
 0x86b   : > { %v7430_v28 = vpop.f32.mrf.mxu0 }
 0x86c   : > { %v6151_v28 = vrot.slane %v6135_v23, %v10851_v61 }
 0x881   : > { %v5641_v47 = vpop.f32.mrf.mxu1 }
 0x883   : > { %v7435_v34 = vpop.f32.mrf.mxu1 }
 0x884   : > { %v6165_v34 = vrot.slane %v6137_v31, %v10851_v61 }
 0x885   : > { %v5644_v33 = vpop.f32.mrf.mxu1  ;;  %v5703_v12 = vpop.f32.mrf.mxu0 }
 0x886   : > { %v5964_v42 = vrot.slane %v5703_v12, 7  ;;  %v6189_v33 = vrot.slane %v6151_v28, %v8028_v18  ;;  %v6193_v25 = vrot.slane %v6165_v34, %v8028_v18  ;;  %v6169_v26 = vcombine.high %v6165_v34, %v6165_v34 }
 0x887   : > { %v7436_v24 = vpop.f32.mrf.mxu1  ;;  %v7441_v10 = vpop.f32.mrf.mxu0 }
 0x888   : > { %v5965_v60 = vsel %vm2557_vm3, %v5964_v42, %v5641_v47  ;;  %v6136_v47 = vcombine.high %v6128_v2, %v6128_v2  ;;  %v6167_v24 = vcombine.high %v6151_v28, %v6151_v28 }
 0x889   : > { %v5706_v0 = vpop.f32.mrf.mxu0  ;;  %v5765_v57 = vpop.f32.mrf.mxu1 }
 0x88a   : > { %v5966_v59 = vrot.slane %v5765_v57, 6  ;;  %v6158_v12 = vrot.slane %v6136_v47, %v10851_v61 }
 0x88b   : > { %v7442_v16 = vpop.f32.mrf.mxu0  ;;  %v7447_v39 = vpop.f32.mrf.mxu1 }
 0x88c   : > { %v5967_v56 = vsel %vm2559_vm4, %v5966_v59, %v5965_v60  ;;  %v6177_v21 = vrot.slane %v6158_v12, %v8028_v18  ;;  %v6197_v59 = vrot.slane %v6167_v24, %v8028_v18  ;;  %v6168_v58 = vcombine.high %v6158_v12, %v6158_v12 }
 0x88d   : > { %v5768_v1 = vpop.f32.mrf.mxu1  ;;  %v5827_v19 = vpop.f32.mrf.mxu0 }
 0x88e   : > { %v5968_v44 = vrot.slane %v5827_v19, 5  ;;  %v7080_v19 = vld [vmem:[%s10451_s9] ss:$0 sm:$0xff]  ;;  %v6185_v40 = vrot.slane %v6168_v58, %v8028_v18 }
 0x88f   : > { %v7448_v11 = vpop.f32.mrf.mxu1  ;;  %v7453_v49 = vpop.f32.mrf.mxu0 }
 0x890   : > { %v5969_v9 = vsel %vm2561_vm5, %v5968_v44, %v5967_v56  ;;  %v6201_v11 = vrot.slane %v6169_v26, %v8028_v18  ;;  %v6312_v26 = vrot.slane %v10223_v6, %v10108_v30 }
 0x891   : > { %v10255_v55 = vmul.f32 %v5969_v9, %v5889_v48  ;;  %v5830_v20 = vpop.f32.mrf.mxu0 }
 0x893   : > { %v7075_v41 = vpack.c.bf16 %v10255_v55, %v10253_v36  ;;  %v7454_v63 = vpop.f32.mrf.mxu0 }
 0x895   : > { %v6038_v15 = vrot.slane %v7075_v41, %v10195_v7  ;;  %v6144_v7 = vrot.slane %v6128_v2, %v10851_v61 }
 0x897   : > { %v6039_v45 = vcombine.low %v6031_v3, %v6038_v15  ;;  %v6166_v10 = vcombine.high %v6144_v7, %v6144_v7  ;;  %v6173_v53 = vrot.slane %v6144_v7, %v8028_v18 }
 0x899   : > { %7460 = vmatmul.mubr.msk.bf16.vlgmr.msra.gmra.mxu1 %vm636_vm0, %v6039_v45  ;;  %v6181_v16 = vrot.slane %v6166_v10, %v8028_v18 }
 0x959   : > { %v7461_v0 = vpop.f32.mrf.mxu1 }
 0x95a   : > { %v6113_v57 = vcombine.high %v7461_v0, %v7461_v0  ;;  %v6214_v8 = vadd.f32 %v7461_v0, %v6189_v33 }
 0x95b   : > { %v6092_v42 = vpop.f32.mrf.mxu1 }
 0x95c   : > { %v6215_v39 = vadd.f32 %v6193_v25, %v6113_v57  ;;  %v6222_v13 = vmax.f32 %v6214_v8, 0.0  ;;  %v6111_v29 = vcombine.high %v6092_v42, %v6092_v42  ;;  %v6210_v1 = vadd.f32 %v6173_v53, %v6092_v42  ;;  %v6273_v42 = vpop.permute.xlu1 %6272 }
 0x95d   : > { %v7462_v5 = vpop.f32.mrf.mxu1 }
 0x95e   : > { %v6211_v60 = vadd.f32 %v6177_v21, %v6111_v29  ;;  %v6218_v44 = vmax.f32 %v6210_v1, 0.0  ;;  %v6114_v48 = vcombine.high %v7462_v5, %v7462_v5  ;;  %v6223_v49 = vmax.f32 %v6215_v39, 0.0  ;;  %v6280_v39 = vpop.permute.xlu0 %6279 }
 0x95f   : > { %v6216_v56 = vadd.f32 %v7462_v5, %v6197_v59  ;;  %v6095_v9 = vpop.f32.mrf.mxu1  ;;  %v6237_v4 = vmul.f32 %v7080_v19, %v6222_v13  ;;  %v6319_v21 = vrot.slane %v10223_v6, %v10132_v46 }
 0x960   : > { %v6219_v20 = vmax.f32 %v6211_v60, 0.0  ;;  %v6212_v41 = vadd.f32 %v6181_v16, %v6095_v9  ;;  %v6233_v15 = vmul.f32 %v7080_v19, %v6218_v44  ;;  %v6217_v45 = vadd.f32 %v6201_v11, %v6114_v48  ;;  %v6287_v59 = vpop.permute.xlu1 %6286 }
 0x961   : > { %v6224_v63 = vmax.f32 %v6216_v56, 0.0  ;;  %v6253_v3 = vsel %vm2592_vm6, %v6237_v4, 0.0  ;;  %v6112_v61 = vcombine.high %v6095_v9, %v6095_v9  ;;  %v6238_v31 = vmul.f32 %v7080_v19, %v6223_v49 }
 0x962   : > { %6254 = vadd.xlane.f32.xlu1 %v6253_v3  ;;  %v6234_v17 = vmul.f32 %v7080_v19, %v6219_v20  ;;  %v6220_v23 = vmax.f32 %v6212_v41, 0.0  ;;  %v6241_v2 = vsel %vm2592_vm6, %v6233_v15, 0.0  ;;  %v6225_v34 = vmax.f32 %v6217_v45, 0.0  ;;  %v6301_v29 = vpop.permute.xlu0 %6300 }
 0x963   : > { %6242 = vadd.xlane.f32.xlu0 %v6241_v2  ;;  %v6239_v47 = vmul.f32 %v7080_v19, %v6224_v63  ;;  %v6213_v7 = vadd.f32 %v6185_v40, %v6112_v61  ;;  %v6256_v12 = vsel %vm2592_vm6, %v6238_v31, 0.0 }
 0x964   : > { %v6244_v28 = vsel %vm2592_vm6, %v6234_v17, 0.0  ;;  %v6235_v33 = vmul.f32 %v7080_v19, %v6220_v23  ;;  %v6240_v53 = vmul.f32 %v7080_v19, %v6225_v34  ;;  %v6294_v16 = vpop.permute.xlu1 %6293 }
 0x965   : > { %v6259_v24 = vsel %vm2592_vm6, %v6239_v47, 0.0  ;;  %v6221_v10 = vmax.f32 %v6213_v7, 0.0 }
 0x966   : > { %6245 = vadd.xlane.f32.xlu1 %v6244_v28  ;;  %v6247_v25 = vsel %vm2592_vm6, %v6235_v33, 0.0  ;;  %v6262_v0 = vsel %vm2592_vm6, %v6240_v53, 0.0 }
 0x967   : > { %6257 = vadd.xlane.f32.xlu0 %v6256_v12  ;;  %v6236_v57 = vmul.f32 %v7080_v19, %v6221_v10 }
 0x968   : > { %v6308_v13 = vpop.permute.xlu1 %6307 }
 0x969   : > { %v6250_v8 = vsel %vm2592_vm6, %v6236_v57, 0.0 }
 0x96a   : > { %6260 = vadd.xlane.f32.xlu1 %v6259_v24 }
 0x96b   : > { %6248 = vadd.xlane.f32.xlu0 %v6247_v25 }
 0x96f   : > { %6263 = vadd.xlane.f32.xlu0 %v6262_v0 }
 0x973   : > { %6251 = vadd.xlane.f32.xlu0 %v6250_v8 }
 0x97b   : > { %6321 = vbcast.lane.b32.xlu1 %v6319_v21, 256 }
 0x989   : > { %6314 = vbcast.lane.b32.xlu0 %v6312_v26, 256 }
 0x9eb   : > { %v6255_v1 = vpop.xlane.xlu1 %6254 }
 0x9ec   : > { %v10295_v19 = vadd.f32 %v6301_v29, %v6255_v1  ;;  %v6243_v5 = vpop.xlane.xlu0 %6242 }
 0x9ed   : > { %v6331_v58 = vadd.f32 %v6273_v42, %v6243_v5 }
 0x9ee   : > { %6360 = vperm.xlu0 %7532, %v10295_v19  }
 0x9ef   : > { %v6246_v48 = vpop.xlane.xlu1 %6245 }
 0x9f0   : > { %v6258_v60 = vpop.xlane.xlu0 %6257  ;;  %v6332_v11 = vadd.f32 %v6280_v39, %v6246_v48 }
 0x9f1   : > { %v10298_v44 = vadd.f32 %v6308_v13, %v6258_v60 }
 0x9f2   : > { %6348 = vperm.xlu0 %7532, %v6331_v58  }
 0x9f3   : > { %6363 = vperm.xlu1 %7531, %v10298_v44   ;;  %v6261_v9 = vpop.xlane.xlu1 %6260 }
 0x9f4   : > { %v6249_v6 = vpop.xlane.xlu0 %6248 }
 0x9f5   : > { %v6333_v49 = vadd.f32 %v6287_v59, %v6249_v6 }
 0x9f7   : > { %6354 = vperm.xlu0 %7532, %v6333_v49   ;;  %6351 = vperm.xlu1 %7531, %v6332_v11   ;;  %v6322_v41 = vpop.permute.xlu1 %6321 }
 0x9f8   : > { %v6264_v56 = vpop.xlane.xlu0 %6263 }
 0x9f9   : > { %v10301_v3 = vadd.f32 %v6322_v41, %v6264_v56 }
 0x9fc   : > { %v6252_v4 = vpop.xlane.xlu0 %6251 }
 0x9fd   : > { %v6334_v20 = vadd.f32 %v6294_v16, %v6252_v4 }
 0x9ff   : > { %6357 = vperm.xlu1 %7531, %v6334_v20  }
 0xa00   : > { %v6315_v63 = vpop.permute.xlu0 %6314 }
 0xa01   : > { %v6337_v15 = vadd.f32 %v6315_v63, %v6261_v9 }
 0xa03   : > { %6366 = vperm.xlu0 %7532, %v6337_v15   ;;  %6369 = vperm.xlu1 %7531, %v10301_v3  }
 0xa69   : > { %v6361_v45 = vpop.permute.xlu0 %6360 }
 0xa6a   : > { %v6390_v33 = vrot.slane %v6361_v45, %v8665_v43 }
 0xa6d   : > { %v6349_v17 = vpop.permute.xlu0 %6348 }
 0xa6e   : > { %v6364_v40 = vpop.permute.xlu1 %6363  ;;  %v6374_v31 = vrot.slane %v6349_v17, %v8665_v43 }
 0xa6f   : > { %v6394_v24 = vrot.slane %v6364_v40, %v8665_v43 }
 0xa72   : > { %v6352_v61 = vpop.permute.xlu1 %6351  ;;  %v6355_v23 = vpop.permute.xlu0 %6354 }
 0xa73   : > { %v6378_v2 = vrot.slane %v6352_v61, %v8665_v43  ;;  %v6382_v28 = vrot.slane %v6355_v23, %v8665_v43 }
 0xa75   : > { %v6403_v47 = vsel %vm2557_vm3, %v6378_v2, %v6374_v31 }
 0xa76   : > { %v6404_v12 = vsel %vm2559_vm4, %v6382_v28, %v6403_v47 }
 0xa7a   : > { %v6358_v34 = vpop.permute.xlu1 %6357 }
 0xa7b   : > { %v6386_v7 = vrot.slane %v6358_v34, %v8665_v43 }
 0xa7d   : > { %v6405_v10 = vsel %vm2561_vm5, %v6386_v7, %v6404_v12 }
 0xa7e   : > { %v6407_v25 = vsel %vm6406_vm8, %v6390_v33, %v6405_v10  ;;  %v6367_v53 = vpop.permute.xlu0 %6366  ;;  %v6370_v0 = vpop.permute.xlu1 %6369 }
 0xa7f   : > { %v6398_v57 = vrot.slane %v6367_v53, %v8665_v43  ;;  %v6402_v8 = vrot.slane %v6370_v0, %v8665_v43  ;;  %v6409_v21 = vsel %vm6408_vm9, %v6394_v24, %v6407_v25 }
 0xa81   : > { %v6411_v26 = vsel %vm6410_vm10, %v6398_v57, %v6409_v21 }
 0xa82   : > { %v6413_v42 = vsel %vm6412_vm11, %v6402_v8, %v6411_v26 }
 0xa83   : > { %v6416_v59 = vsel %vm6415_vm12, %v6413_v42, -inf }
 0xa84   : > { %6417 = vmax.xlane.f32.xlu0 %v6416_v59 }
 0xb0d   : > { %v6418_v16 = vpop.xlane.xlu0 %6417 }
 0xb0e   : > { %v6423_v39 = vrot.slane %v6418_v16, %v8028_v18  ;;  %v6427_v13 = vrot.slane %v6418_v16, %v8034_v22  ;;  %v6431_v29 = vrot.slane %v6418_v16, %v8043_v27  ;;  %v6435_v48 = vrot.slane %v6418_v16, %v8053_v32 }
 0xb0f   : > { %v6439_v9 = vrot.slane %v6418_v16, %v10060_v38  ;;  %v6443_v63 = vrot.slane %v6418_v16, %v10068_v54  ;;  %v6451_v61 = vrot.slane %v6418_v16, %v10132_v46 }
 0xb10   : > { %v6460_v1 = vsub.f32 %v6331_v58, %v6423_v39  ;;  %v6461_v5 = vsub.f32 %v6332_v11, %v6427_v13  ;;  %v6462_v6 = vsub.f32 %v6333_v49, %v6431_v29  ;;  %v6463_v4 = vsub.f32 %v6334_v20, %v6435_v48 }
 0xb11   : > { %v6464_v45 = vsub.f32 %v10295_v19, %v6439_v9  ;;  %v6447_v58 = vrot.slane %v6418_v16, %v10108_v30  ;;  %v6465_v11 = vsub.f32 %v10298_v44, %v6443_v63  ;;  %v6467_v31 = vsub.f32 %v10301_v3, %v6451_v61 }
 0xb12   : > { %v6468_v60 = vmul.f32 1.442695, %v6460_v1  ;;  %v6470_v56 = vmul.f32 1.442695, %v6461_v5  ;;  %v6472_v41 = vmul.f32 1.442695, %v6462_v6 }
 0xb13   : > { %v6474_v40 = vmul.f32 1.442695, %v6463_v4  ;;  %v6476_v17 = vmul.f32 1.442695, %v6464_v45  ;;  %v6466_v23 = vsub.f32 %v6337_v15, %v6447_v58  ;;  %v6478_v20 = vmul.f32 1.442695, %v6465_v11 }
 0xb14   : > { %7685 = vpow2.f32 %v6468_v60  ;;  %v6482_v47 = vmul.f32 1.442695, %v6467_v31 }
 0xb15   : > { %7687 = vpow2.f32 %v6470_v56  ;;  %v6480_v19 = vmul.f32 1.442695, %v6466_v23 }
 0xb16   : > { %7689 = vpow2.f32 %v6472_v41 }
 0xb17   : > { %7691 = vpow2.f32 %v6474_v40 }
 0xb18   : > { %7693 = vpow2.f32 %v6476_v17 }
 0xb19   : > { %7695 = vpow2.f32 %v6478_v20 }
 0xb1a   : > { %7697 = vpow2.f32 %v6480_v19 }
 0xb1b   : > { %7699 = vpow2.f32 %v6482_v47 }
 0xb21   : > { %v7686_v49 = vpop.eup %7685 }
 0xb22   : > { %6493 = vperm.xlu1 %7531, %v7686_v49   ;;  %v7688_v2 = vpop.eup %7687 }
 0xb23   : > { %v7690_v28 = vpop.eup %7689 }
 0xb24   : > { %v7692_v44 = vpop.eup %7691 }
 0xb25   : > { %v7694_v34 = vpop.eup %7693 }
 0xb26   : > { %6496 = vperm.xlu1 %7531, %v7688_v2   ;;  %v7696_v7 = vpop.eup %7695 }
 0xb27   : > { %v7698_v15 = vpop.eup %7697 }
 0xb28   : > { %v7700_v33 = vpop.eup %7699 }
 0xb2a   : > { %6499 = vperm.xlu1 %7531, %v7690_v28  }
 0xb2e   : > { %6502 = vperm.xlu1 %7531, %v7692_v44  }
 0xb32   : > { %6505 = vperm.xlu1 %7531, %v7694_v34  }
 0xb36   : > { %6508 = vperm.xlu1 %7531, %v7696_v7  }
 0xb3a   : > { %6511 = vperm.xlu1 %7531, %v7698_v15  }
 0xb3e   : > { %6514 = vperm.xlu1 %7531, %v7700_v33  }
 0xb9d   : > { %v6494_v12 = vpop.permute.xlu1 %6493 }
 0xb9e   : > { %v6519_v8 = vrot.slane %v6494_v12, %v8665_v43 }
 0xba1   : > { %v6497_v24 = vpop.permute.xlu1 %6496 }
 0xba2   : > { %v6523_v0 = vrot.slane %v6497_v24, %v8665_v43 }
 0xba4   : > { %v6548_v59 = vsel %vm2557_vm3, %v6523_v0, %v6519_v8 }
 0xba5   : > { %v6500_v3 = vpop.permute.xlu1 %6499 }
 0xba6   : > { %v6527_v57 = vrot.slane %v6500_v3, %v8665_v43 }
 0xba8   : > { %v6549_v39 = vsel %vm2559_vm4, %v6527_v57, %v6548_v59 }
 0xba9   : > { %v6503_v10 = vpop.permute.xlu1 %6502 }
 0xbaa   : > { %v6531_v21 = vrot.slane %v6503_v10, %v8665_v43 }
 0xbac   : > { %v6550_v29 = vsel %vm2561_vm5, %v6531_v21, %v6549_v39 }
 0xbad   : > { %v6506_v25 = vpop.permute.xlu1 %6505 }
 0xbae   : > { %v6535_v26 = vrot.slane %v6506_v25, %v8665_v43 }
 0xbb0   : > { %v6551_v1 = vsel %vm6406_vm8, %v6535_v26, %v6550_v29 }
 0xbb1   : > { %v6509_v53 = vpop.permute.xlu1 %6508 }
 0xbb2   : > { %v6539_v16 = vrot.slane %v6509_v53, %v8665_v43 }
 0xbb4   : > { %v6552_v60 = vsel %vm6408_vm9, %v6539_v16, %v6551_v1 }
 0xbb5   : > { %v6512_v42 = vpop.permute.xlu1 %6511 }
 0xbb6   : > { %v6543_v13 = vrot.slane %v6512_v42, %v8665_v43 }
 0xbb8   : > { %v6553_v6 = vsel %vm6410_vm10, %v6543_v13, %v6552_v60 }
 0xbb9   : > { %v6515_v5 = vpop.permute.xlu1 %6514 }
 0xbba   : > { %v6547_v48 = vrot.slane %v6515_v5, %v8665_v43 }
 0xbbc   : > { %v6554_v56 = vsel %vm6412_vm11, %v6547_v48, %v6553_v6 }
 0xbbd   : > { %v6556_v9 = vsel %vm6415_vm12, %v6554_v56, 0.0 }
 0xbbe   : > { %6557 = vadd.xlane.f32.xlu0 %v6556_v9 }
 0xc47   : > { %v6558_v4 = vpop.xlane.xlu0 %6557 }
 0xc48   : > { %7701 = vrcp.f32 %v6558_v4 }
 0xc55   : > { %v7702_v41 = vpop.eup %7701 }
 0xc56   : > { %v6568_v63 = vrot.slane %v7702_v41, %v8034_v22  ;;  %v6564_v45 = vrot.slane %v7702_v41, %v8028_v18  ;;  %v6592_v11 = vrot.slane %v7702_v41, %v10132_v46  ;;  %v6572_v43 = vrot.slane %v7702_v41, %v8043_v27 }
 0xc57   : > { %v6576_v23 = vrot.slane %v7702_v41, %v8053_v32  ;;  %v6580_v31 = vrot.slane %v7702_v41, %v10060_v38  ;;  %v6584_v18 = vrot.slane %v7702_v41, %v10068_v54  ;;  %v6588_v46 = vrot.slane %v7702_v41, %v10108_v30  ;;  %v7539_v32 = vld [vmem:[%s10452_s10 + $0x8] sm:$0xff]   ;;  %v7540_v38 = vld [vmem:[%s10452_s10] sm:$0xff]  }
 0xc58   : > { %v6602_v40 = vmul.f32 %v7688_v2, %v6568_v63  ;;  %v6601_v58 = vmul.f32 %v7686_v49, %v6564_v45  ;;  %v6608_v17 = vmul.f32 %v7700_v33, %v6592_v11  ;;  %v6603_v61 = vmul.f32 %v7690_v28, %v6572_v43  ;;  %7464 = vmatpush3.bf16.msra.mxu0 %v7539_v32 }
 0xc59   : > { %v6604_v20 = vmul.f32 %v7692_v44, %v6576_v23  ;;  %v6605_v22 = vmul.f32 %v7694_v34, %v6580_v31  ;;  %v6606_v49 = vmul.f32 %v7696_v7, %v6584_v18  ;;  %v6607_v27 = vmul.f32 %v7698_v15, %v6588_v46  ;;  %7465 = vmatprep.subr.bf16.mxu0 %v7805_v37 }
 0xc5a   : > { %6616 = vperm.xlu0 %7532, %v6602_v40   ;;  %6611 = vperm.xlu1 %7531, %v6601_v58  }
 0xc5c   : > { %7466 = vmatpush3.bf16.msra.mxu0 %v7540_v38 }
 0xc5e   : > { %6646 = vperm.xlu0 %7532, %v6608_v17   ;;  %6621 = vperm.xlu1 %7531, %v6603_v61  }
 0xc62   : > { %6626 = vperm.xlu1 %7531, %v6604_v20  }
 0xc66   : > { %6631 = vperm.xlu1 %7531, %v6605_v22  }
 0xc6a   : > { %6636 = vperm.xlu1 %7531, %v6606_v49  }
 0xc6e   : > { %6641 = vperm.xlu1 %7531, %v6607_v27  }
 0xcd5   : > { %v6617_v54 = vpop.permute.xlu0 %6616  ;;  %v6612_v2 = vpop.permute.xlu1 %6611 }
 0xcd6   : > { %v6650_v30 = vmul.f32 %v6617_v54, %v10187_v50  ;;  %v6649_v19 = vmul.f32 %v6612_v2, %v10184_v62 }
 0xcd8   : > { %v6665_v28 = vsel %vm6657_vm13, %v6650_v30, 0.0  ;;  %v6658_v47 = vsel %vm6657_vm13, %v6649_v19, 0.0 }
 0xcd9   : > { %v6666_v44 = vrot.slane %v6665_v28, 4  ;;  %v6659_v34 = vrot.slane %v6658_v47, 4  ;;  %v6647_v7 = vpop.permute.xlu0 %6646  ;;  %v6622_v15 = vpop.permute.xlu1 %6621 }
 0xcda   : > { %v6656_v33 = vmul.f32 %v6647_v7, %v10255_v55  ;;  %v6651_v37 = vmul.f32 %v6622_v15, %v10199_v51 }
 0xcdb   : > { %v6667_v12 = vadd.f32 %v6666_v44, %v6665_v28  ;;  %v6660_v24 = vadd.f32 %v6659_v34, %v6658_v47 }
 0xcdc   : > { %v6672_v3 = vsel %vm6657_vm13, %v6651_v37, 0.0  ;;  %v6707_v50 = vsel %vm6657_vm13, %v6656_v33, 0.0 }
 0xcdd   : > { %v6673_v10 = vrot.slane %v6672_v3, 4  ;;  %v6627_v62 = vpop.permute.xlu1 %6626  ;;  %v6668_v53 = vrot.slane %v6667_v12, 2  ;;  %v6661_v0 = vrot.slane %v6660_v24, 2  ;;  %v6708_v8 = vrot.slane %v6707_v50, 4 }
 0xcde   : > { %v6652_v25 = vmul.f32 %v6627_v62, %v10201_v52 }
 0xcdf   : > { %v6674_v57 = vadd.f32 %v6673_v10, %v6672_v3  ;;  %v6669_v59 = vadd.f32 %v6668_v53, %v6667_v12  ;;  %v6662_v16 = vadd.f32 %v6661_v0, %v6660_v24  ;;  %v6709_v39 = vadd.f32 %v6708_v8, %v6707_v50 }
 0xce0   : > { %v6679_v21 = vsel %vm6657_vm13, %v6652_v25, 0.0 }
 0xce1   : > { %v6675_v26 = vrot.slane %v6674_v57, 2  ;;  %v6632_v55 = vpop.permute.xlu1 %6631  ;;  %v6680_v42 = vrot.slane %v6679_v21, 4  ;;  %v6670_v6 = vrot.slane %v6669_v59, 1  ;;  %v6663_v56 = vrot.slane %v6662_v16, 1 }
 0xce2   : > { %v6653_v51 = vmul.f32 %v6632_v55, %v10247_v14  ;;  %v6710_v9 = vrot.slane %v6709_v39, 2 }
 0xce3   : > { %v6681_v13 = vadd.f32 %v6680_v42, %v6679_v21  ;;  %v6676_v1 = vadd.f32 %v6675_v26, %v6674_v57  ;;  %v6671_v17 = vadd.f32 %v6670_v6, %v6669_v59  ;;  %v6664_v23 = vadd.f32 %v6663_v56, %v6662_v16 }
 0xce4   : > { %v6686_v29 = vsel %vm6657_vm13, %v6653_v51, 0.0  ;;  %v6711_v20 = vadd.f32 %v6710_v9, %v6709_v39 }
 0xce5   : > { %v6637_v5 = vpop.permute.xlu1 %6636  ;;  %v6682_v52 = vrot.slane %v6681_v13, 2  ;;  %v6687_v60 = vrot.slane %v6686_v29, 4  ;;  %v6677_v14 = vrot.slane %v6676_v1, 1  ;;  %v6715_v54 = vpack.c.bf16 %v6671_v17, %v6671_v17 }
 0xce6   : > { %v6654_v48 = vmul.f32 %v6637_v5, %v10241_v35  ;;  %v6714_v2 = vpack.c.bf16 %v6664_v23, %v6664_v23  ;;  %v6712_v30 = vrot.slane %v6711_v20, 1 }
 0xce7   : > { %v6683_v4 = vadd.f32 %v6682_v52, %v6681_v13  ;;  %v6688_v41 = vadd.f32 %v6687_v60, %v6686_v29  ;;  %v6678_v22 = vadd.f32 %v6677_v14, %v6676_v1  ;;  %v6742_v33 = vunpack.c.l.b16 %v6715_v54  ;;  %v7081_v29 = vld [vmem:[%s10453_s11] ss:$0 sm:$0xff] }
 0xce8   : > { %v6693_v63 = vsel %vm6657_vm13, %v6654_v48, 0.0  ;;  %v6741_v37 = vunpack.c.l.b16 %v6714_v2  ;;  %v6713_v12 = vadd.f32 %v6712_v30, %v6711_v20 }
 0xce9   : > { %v6694_v45 = vrot.slane %v6693_v63, 4  ;;  %v6642_v40 = vpop.permute.xlu1 %6641  ;;  %v6684_v58 = vrot.slane %v6683_v4, 1  ;;  %v6689_v11 = vrot.slane %v6688_v41, 2  ;;  %v6716_v28 = vpack.c.bf16 %v6678_v22, %v6678_v22 }
 0xcea   : > { %v6655_v43 = vmul.f32 %v6642_v40, %v10253_v36  ;;  %v6749_v53 = vsel %vm2557_vm3, %v6742_v33, %v6741_v37  ;;  %v6721_v0 = vpack.c.bf16 %v6713_v12, %v6713_v12  ;;  %vm6839_vm3 = vcmask 784005  }
 0xceb   : > { %v6695_v61 = vadd.f32 %v6694_v45, %v6693_v63  ;;  %v6690_v31 = vadd.f32 %v6689_v11, %v6688_v41  ;;  %v6685_v46 = vadd.f32 %v6684_v58, %v6683_v4  ;;  %v6743_v24 = vunpack.c.l.b16 %v6716_v28 }
 0xcec   : > { %v6700_v35 = vsel %vm6657_vm13, %v6655_v43, 0.0  ;;  %v6748_v51 = vunpack.c.l.b16 %v6721_v0 }
 0xced   : > { %v6696_v18 = vrot.slane %v6695_v61, 2  ;;  %v6701_v49 = vrot.slane %v6700_v35, 4  ;;  %v6691_v27 = vrot.slane %v6690_v31, 1  ;;  %v6717_v44 = vpack.c.bf16 %v6685_v46, %v6685_v46 }
 0xcee   : > { %v6750_v8 = vsel %vm2559_vm4, %v6743_v24, %v6749_v53  ;;  %vm6844_vm4 = vcmask 916230  }
 0xcef   : > { %v6697_v32 = vadd.f32 %v6696_v18, %v6695_v61  ;;  %v6702_v38 = vadd.f32 %v6701_v49, %v6700_v35  ;;  %v6692_v19 = vadd.f32 %v6691_v27, %v6690_v31  ;;  %v6744_v10 = vunpack.c.l.b16 %v6717_v44 }
 0xcf1   : > { %v6698_v36 = vrot.slane %v6697_v32, 1  ;;  %v6703_v47 = vrot.slane %v6702_v38, 2  ;;  %v6718_v34 = vpack.c.bf16 %v6692_v19, %v6692_v19  ;;  %v6751_v26 = vsel %vm2561_vm5, %v6744_v10, %v6750_v8 }
 0xcf2   : > { %vm6849_vm5 = vcmask 1048455  }
 0xcf3   : > { %v6699_v7 = vadd.f32 %v6698_v36, %v6697_v32  ;;  %v6704_v15 = vadd.f32 %v6703_v47, %v6702_v38  ;;  %v6745_v62 = vunpack.c.l.b16 %v6718_v34 }
 0xcf5   : > { %v6719_v3 = vpack.c.bf16 %v6699_v7, %v6699_v7  ;;  %v6705_v50 = vrot.slane %v6704_v15, 1  ;;  %v6752_v55 = vsel %vm6406_vm8, %v6745_v62, %v6751_v26 }
 0xcf7   : > { %v6706_v25 = vadd.f32 %v6705_v50, %v6704_v15  ;;  %v6746_v57 = vunpack.c.l.b16 %v6719_v3 }
 0xcf9   : > { %v6720_v21 = vpack.c.bf16 %v6706_v25, %v6706_v25  ;;  %v6753_v59 = vsel %vm6408_vm9, %v6746_v57, %v6752_v55 }
 0xcfb   : > { %v6747_v42 = vunpack.c.l.b16 %v6720_v21 }
 0xcfd   : > { %v6754_v16 = vsel %vm6410_vm10, %v6747_v42, %v6753_v59 }
 0xcfe   : > { %v6755_v39 = vsel %vm6412_vm11, %v6748_v51, %v6754_v16 }
 0xcff   : > { %v6756_v13 = vpack.c.b16 %v6755_v39, %v6755_v39 }
 0xd01   : > { %7468 = vmatmul.mubr.msk.bf16.vlgmr.msra.gmra.mxu0 %vm636_vm0, %v6756_v13  ;;  %vm6824_vm0 = vcmask 387330  }
 0xdc1   : > { %v6806_v1 = vpop.f32.mrf.mxu0 }
 0xdc2   : > { %v6807_v5 = vadd.f32 %v7081_v29, %v6806_v1 }
 0xdc3   : > { %v7469_v52 = vpop.f32.mrf.mxu0 }
 0xdc4   : > { %7703 = vtanh.f32 %v6807_v5 }
 0xdc5   : > { %v6809_v60 = vpop.f32.mrf.mxu0 }
 0xdc7   : > { %v7470_v48 = vpop.f32.mrf.mxu0 }
 0xdd1   : > { %v7704_v6 = vpop.eup %7703 }
 0xdd2   : > { %6821 = vrot.lane.b32.xlu0 %v7704_v6, %s7808_s30  ;;  %6816 = vrot.lane.b32.xlu1 %v7704_v6, %s7809_s29  ;;  %6814 = vst.msk [vmem:[%s10390_s28] sm:$0x1] %vm6813_vm14, %v7704_v6  ;;  %s6852_s30 = scalar_lea.sflag [#allocation4], %s7978_s21  ;;  %s7734_s29 = scalar_lea.vmem %s6865_s20, 16 }
 0xdd3   : > { %p7735_p13 = scmp.ne.s32.totalorder %s6865_s20, %s7734_s29 }
 0xdd5   : > { %p7736_p5 = pnand %p7735_p13, %p10852_p4 }
 0xdd6   : > { %6831 = vrot.lane.b32.xlu0 %v7704_v6, %s7810_s17  ;;  %6826 = vrot.lane.b32.xlu1 %v7704_v6, %s7811_s14  ;;  %s7815_s17 = smov [#allocation5]  }
 0xdd7   : > { %p7737_p7 = pneg %p7736_p5  ;;  %s7738_s25 = sshll.u32 %s7815_s17, 4  ;;  %s7739_s25 = int_to_ptr.vmem [resolvable:$false] %s7738_s25 }
 0xdd8   : > { %s7740_s14 = scalar_lea.vmem %s7739_s25, 32  ;;  %p7741_p8 = scmp.lt.s32.totalorder %s6865_s20, %s7739_s25 }
 0xdd9   : > { %p7742_p10 = scmp.lt.s32.totalorder %s7740_s14, %s7734_s29 }
 0xdda   : > { %6841 = vrot.lane.b32.xlu0 %v7704_v6, %s7812_s19  ;;  %6836 = vrot.lane.b32.xlu1 %v7704_v6, %s7813_s26 }
 0xddb   : > { %p7743_p0 = por %p7742_p10, %p7741_p8 }
 0xddd   : > { %p7744_p2 = pnand %p7743_p0, %p7737_p7 }
 0xdde   : > { %6846 = vrot.lane.b32.xlu1 %v7704_v6, %s7814_s18 }
 0xe44   : > { %v6822_v56 = vpop.permute.xlu0 %6821  ;;  %v6817_v9 = vpop.permute.xlu1 %6816 }
 0xe45   : > { %6820 = vst.msk [vmem:[%s10390_s28 - $0x1] sm:$0x2] %vm6819_vm15, %v6817_v9 }
 0xe46   : > { %6825 = vst.msk [vmem:[%s10390_s28 - $0x2] sm:$0x4] %vm6824_vm0, %v6822_v56 }
 0xe48   : > { %v6832_v4 = vpop.permute.xlu0 %6831  ;;  %v6827_v41 = vpop.permute.xlu1 %6826 }
 0xe49   : > { %6830 = vst.msk [vmem:[%s10390_s28 - $0x3] sm:$0x8] %vm6829_vm1, %v6827_v41 }
 0xe4a   : > { %6835 = vst.msk [vmem:[%s10390_s28 - $0x4] sm:$0x10] %vm6834_vm2, %v6832_v4 }
 0xe4c   : > { %v6842_v63 = vpop.permute.xlu0 %6841  ;;  %v6837_v14 = vpop.permute.xlu1 %6836 }
 0xe4d   : > { %6840 = vst.msk [vmem:[%s10390_s28 - $0x5] sm:$0x20] %vm6839_vm3, %v6837_v14 }
 0xe4e   : > { %6845 = vst.msk [vmem:[%s10390_s28 - $0x6] sm:$0x40] %vm6844_vm4, %v6842_v63 }
 0xe50   : > { %v6847_v45 = vpop.permute.xlu1 %6846 }
 0xe51   : > { %6850 = vst.msk [vmem:[%s10390_s28 - $0x7] sm:$0x80] %vm6849_vm5, %v6847_v45 }
 0xe52   : > { %7747 = shalt.err (!%p7744_p2)
}
 0xe53   : > { %s7748_s28 = scalar_lea.hbm %s10404_s27, 16  ;;  %s7752_s26 = scalar_lea.hbm %s10454_s12, 32 }
 0xe54   : > { %p7749_p9 = scmp.ne.s32.totalorder %s10404_s27, %s7748_s28  ;;  %p7753_p6 = scmp.lt.s32.totalorder %s10404_s27, %s10454_s12 }
 0xe55   : > { %p7754_p11 = scmp.lt.s32.totalorder %s7752_s26, %s7748_s28 }
 0xe56   : > { %p7750_p1 = pnand %p7749_p9, %p10852_p4 }
 0xe57   : > { %p7755_p12 = por %p7754_p11, %p7753_p6 }
 0xe58   : > { %p7751_p3 = pneg %p7750_p1 }
 0xe5a   : > { %p7756_p13 = pnand %p7755_p12, %p7751_p3 }
 0xe5c   : > { %7759 = shalt.err (!%p7756_p13)
}
 0xe5d   : > { %7473 = dma.vmem_to_hbm [thread:$0]  (%p10852_p4), %s6865_s20, 16, %s10404_s27, %s6852_s30  }
 0xe5e PF: > { %s10853_s13 = sld [smem:[#allocation8_spill]]  ;;  %p10856_p7 = scmp.ge.s32.totalorder %s7798_s24, 2 }
 0xe5f   : > { %s10854_s23 = sld [smem:[#allocation12_spill]] }
 0xe64   : > { %s6876_s29 = sand.u32 1, %s10853_s13  }
 0xe65   : > { %p10855_p5 = scmp.ne.s32.totalorder %s10854_s23, 0  ;;  %s6877_s17 = scalar_lea.sflag [#allocation4], %s6876_s29 }
 0xe67   : > { %p7480_p8 = pnand %p10856_p7, %p10855_p5 }
 0xe69   : > { %p7481_p10 = pneg %p7480_p8 }
 0xe6b   : > { %7781 = dma.done.wait (%p7481_p10), %s6877_s17, 16  }
 0xe6c   : > { %7783 = vsyncadd (%p7481_p10), %s6877_s17, 4294967280  ;;  %s10857_s24 = sld [smem:[#allocation10_spill]]  ;;  %s10860_s21 = smov %s7790_s22 }
 0xe6d   : > { %s10858_s25 = sld [smem:[#allocation9_spill]] }
 0xe6e   : > { %s10859_s23 = sld [smem:[#allocation11_spill]] }
 0xe72   : > { %p25_p0 = scmp.ge.s32.totalorder %s10857_s24, 4  }
 0xe73   : > { %s10861_s22 = smov %s10858_s25 }
 0xe74   :  { %27 = sbr.rel (!%p25_p0) target bundleno = 5 (0x5), region = 128 }
 0xe79   :  { %6881 = vsyncpa [#allocation3], 1 }
 0xe7a   :  { %6883 = vsyncpa [#allocation3 + $0x1], 1 }
 0xe7b   :  { %6884 = vsyncpa [#allocation4], 1 }
 0xe7c   :  { %6886 = vsyncpa [#allocation4 + $0x1], 1 }

</bundles_post_ra>
